<compile_context>
chip_gen: v7x
topology: tpu7x:2x2x1
jax: 0.10.0
libtpu: 0.0.40
codegen_flags: <defaults>
</compile_context>

<pallas_src>
import jax
import jax.numpy as jnp
from jax import lax
from jax.experimental import pallas as pl
from jax.experimental.pallas import tpu as pltpu


def _bottleneck_kernel(x_ref, s1_ref, b1_ref, w1_ref, b2_ref, w2_ref,
                       o_ref, acc_ref):
    """One batch element per grid step.

    x_ref:   (1, H, W, Cin)     f32 input tile
    s1/b1:   (1, Cin)           f32 BN1 inference scale / shift
    w1:      (Cin, inter)       bf16 1x1 conv weight with BN2 scale folded in
    b2:      (1, inter)         f32 BN2 inference shift
    w2:      (9, inter, growth) bf16 3x3 conv taps, tap t = 3*ky + kx
    o_ref:   (1, H, W, growth)  f32 new channels only (concat happens outside)
    acc_ref: (H+2, W+2, growth) f32 padded shift-accumulator scratch
    """
    H, W, Cin = x_ref.shape[1], x_ref.shape[2], x_ref.shape[3]
    growth = acc_ref.shape[2]

    # ---- BN1 + ReLU (f32, VPU), cast to bf16 right away for the MXU ----
    x = x_ref[0]                                                  # (H, W, Cin)
    h = jnp.maximum(x * s1_ref[0] + b1_ref[0], 0.0)
    h_bf = h.astype(jnp.bfloat16).reshape(H * W, Cin)

    # ---- 1x1 conv (BN2 scale pre-folded): bf16 in, f32 accumulation ----
    # TODO(synk): at the toy sizes exercised here (Cin=4, inter=12) the MXU is
    # <10% utilized and a pure-VPU MAC would win; not worth a second code path
    # since the MXU form is the one that matters at real DenseNet sizes.
    y1 = jnp.dot(h_bf, w1_ref[...], preferred_element_type=jnp.float32)

    # ---- BN2 shift + ReLU, cast to bf16 BEFORE any conv2 staging ----
    h2_bf = jnp.maximum(y1 + b2_ref[...], 0.0).astype(jnp.bfloat16)  # (H*W, inter)

    # ---- 3x3 conv, padding=1: 9 per-tap matmuls + shift-accumulate ----
    # For tap (ky, kx) the contribution of pixel (u, v) lands at output pixel
    # (u + 1 - ky, v + 1 - kx); with the accumulator padded by 1 on every side
    # that is the static slice [2-ky : 2-ky+H, 2-kx : 2-kx+W].  No im2col
    # replication, no pad concats, no cross-lane tap concatenate.
    acc_ref[...] = jnp.zeros_like(acc_ref)
    for t in range(9):
        ky, kx = t // 3, t % 3
        y_tap = jnp.dot(h2_bf, w2_ref[t],
                        preferred_element_type=jnp.float32)      # (H*W, growth)
        acc_ref[2 - ky:2 - ky + H, 2 - kx:2 - kx + W, :] += (
            y_tap.reshape(H, W, growth))

    # ---- dropout (eval) = identity; lane-dense store of the new channels ----
    o_ref[0] = acc_ref[1:H + 1, 1:W + 1, :].astype(o_ref.dtype)


def _vmem_limit_bytes():
    """Raise the scoped-VMEM limit, staying under physical VMEM per chip gen."""
    try:
        cap = int(pltpu.get_tpu_info().vmem_capacity_bytes)
    except Exception:  # conservative fallback (safe on every generation)
        cap = 64 * 1024 * 1024
    return min(100 * 1024 * 1024, (cap * 3) // 4)


def bottleneck_block_pallas_nhwc(x_nhwc, kparams):
    """x_nhwc: (N, H, W, Cin) f32.  Returns (N, H, W, Cin+growth) f32."""
    s1, b1, w1f, b2, w2 = kparams
    N, H, W, Cin = x_nhwc.shape
    inter = w1f.shape[1]
    growth = w2.shape[2]

    new = pl.pallas_call(
        _bottleneck_kernel,
        out_shape=jax.ShapeDtypeStruct((N, H, W, growth), jnp.float32),
        grid_spec=pltpu.PrefetchScalarGridSpec(
            num_scalar_prefetch=0,
            grid=(N,),
            in_specs=[
                pl.BlockSpec((1, H, W, Cin), lambda n: (n, 0, 0, 0)),
                pl.BlockSpec((1, Cin), lambda n: (0, 0)),
                pl.BlockSpec((1, Cin), lambda n: (0, 0)),
                pl.BlockSpec((Cin, inter), lambda n: (0, 0)),
                pl.BlockSpec((1, inter), lambda n: (0, 0)),
                pl.BlockSpec((9, inter, growth), lambda n: (0, 0, 0)),
            ],
            out_specs=pl.BlockSpec((1, H, W, growth), lambda n: (n, 0, 0, 0)),
            scratch_shapes=[pltpu.VMEM((H + 2, W + 2, growth), jnp.float32)],
        ),
        compiler_params=pltpu.CompilerParams(
            dimension_semantics=("parallel",),
            vmem_limit_bytes=_vmem_limit_bytes()),
    )(x_nhwc, s1, b1, w1f, b2, w2)

    # DenseNet concat at the network level: the passthrough copy of x never
    # enters the kernel's vector-store path.
    return jnp.concatenate([x_nhwc, new], axis=-1)


def bottleneck_block_pallas(x_nchw, kparams):
    """NCHW wrapper for parity with the PyTorch module (transposes are layout
    plumbing; an NHWC network should call the NHWC entry point directly)."""
    x = jnp.transpose(x_nchw, (0, 2, 3, 1))
    out = bottleneck_block_pallas_nhwc(x, kparams)
    return jnp.transpose(out, (0, 3, 1, 2))


# ----------------------------------------------------------------------------
# Parameter construction / folding and references
# ----------------------------------------------------------------------------
def make_raw_params(key, input_size, growth_rate, num_bn=3):
    """Deterministic synthetic parameters matching BottleneckBlock shapes."""
    inter = num_bn * growth_rate
    ks = jax.random.split(key, 10)
    g1 = jax.random.normal(ks[0], (input_size,)) * 0.1 + 1.0
    be1 = jax.random.normal(ks[1], (input_size,)) * 0.1
    m1 = jax.random.normal(ks[2], (input_size,)) * 0.1
    v1 = jnp.abs(jax.random.normal(ks[3], (input_size,))) * 0.1 + 0.5
    g2 = jax.random.normal(ks[4], (inter,)) * 0.1 + 1.0
    be2 = jax.random.normal(ks[5], (inter,)) * 0.1
    m2 = jax.random.normal(ks[6], (inter,)) * 0.1
    v2 = jnp.abs(jax.random.normal(ks[7], (inter,))) * 0.1 + 0.5
    w1 = jax.random.normal(ks[8], (input_size, inter)) * 0.1         # (Cin, inter)
    w2_hwio = jax.random.normal(ks[9], (3, 3, inter, growth_rate)) * 0.1
    return dict(g1=g1, be1=be1, m1=m1, v1=v1, g2=g2, be2=be2, m2=m2, v2=v2,
                w1=w1, w2_hwio=w2_hwio)


def fold_params(raw, eps=1e-5):
    """Fold BN stats into inference scale/shift, fold BN2 scale into the 1x1
    conv weight (exact: conv1 is linear), and cast MXU operands to bf16."""
    s1 = raw["g1"] / jnp.sqrt(raw["v1"] + eps)
    b1 = raw["be1"] - raw["m1"] * s1
    s2 = raw["g2"] / jnp.sqrt(raw["v2"] + eps)
    b2 = raw["be2"] - raw["m2"] * s2
    w1f = (raw["w1"] * s2[None, :]).astype(jnp.bfloat16)              # (Cin, inter)
    inter, growth = raw["w2_hwio"].shape[2], raw["w2_hwio"].shape[3]
    w2 = raw["w2_hwio"].reshape(9, inter, growth).astype(jnp.bfloat16)  # tap-major
    return (s1.reshape(1, -1).astype(jnp.float32),
            b1.reshape(1, -1).astype(jnp.float32),
            w1f,
            b2.reshape(1, -1).astype(jnp.float32),
            w2)


def reference_f32(x_nchw, raw, eps=1e-5):
    """Pure f32 eval-mode reference (mirrors the PyTorch module)."""
    s1 = raw["g1"] / jnp.sqrt(raw["v1"] + eps)
    b1 = raw["be1"] - raw["m1"] * s1
    s2 = raw["g2"] / jnp.sqrt(raw["v2"] + eps)
    b2 = raw["be2"] - raw["m2"] * s2
    x = jnp.transpose(x_nchw, (0, 2, 3, 1))
    h = jnp.maximum(x * s1 + b1, 0.0)
    w1 = raw["w1"]
    y1 = lax.conv_general_dilated(
        h, w1.reshape(1, 1, *w1.shape), (1, 1), "VALID",
        dimension_numbers=("NHWC", "HWIO", "NHWC"))
    h2 = jnp.maximum(y1 * s2 + b2, 0.0)
    y2 = lax.conv_general_dilated(
        h2, raw["w2_hwio"], (1, 1), "SAME",
        dimension_numbers=("NHWC", "HWIO", "NHWC"))
    out = jnp.concatenate([x, y2], axis=-1)
    return jnp.transpose(out, (0, 3, 1, 2))


def reference_matched(x_nchw, kparams):
    """Reference sharing the kernel's exact bf16 rounding points (tight check;
    remaining difference is only f32 accumulation order)."""
    s1, b1, w1f, b2, w2 = kparams
    Cin, inter = w1f.shape
    growth = w2.shape[2]
    x = jnp.transpose(x_nchw, (0, 2, 3, 1))
    h = jnp.maximum(x * s1[0] + b1[0], 0.0)
    y1 = lax.conv_general_dilated(
        h.astype(jnp.bfloat16), w1f.reshape(1, 1, Cin, inter), (1, 1), "VALID",
        dimension_numbers=("NHWC", "HWIO", "NHWC"),
        preferred_element_type=jnp.float32)
    h2 = jnp.maximum(y1 + b2[0], 0.0)
    y2 = lax.conv_general_dilated(
        h2.astype(jnp.bfloat16), w2.reshape(3, 3, inter, growth), (1, 1), "SAME",
        dimension_numbers=("NHWC", "HWIO", "NHWC"),
        preferred_element_type=jnp.float32)
    out = jnp.concatenate([x, y2], axis=-1)
    return jnp.transpose(out, (0, 3, 1, 2))


if __name__ == "__main__":
    # Small shapes consistent with the module: batch=2, input_size=4,
    # growth_rate=4 (num_bn=3 -> inter=12), spatial 16x16.
    N, Cin, H, W = 2, 4, 16, 16
    growth_rate, num_bn = 4, 3

    key = jax.random.PRNGKey(0)
    kx, kp = jax.random.split(key)
    x = jax.random.normal(kx, (N, Cin, H, W), dtype=jnp.float32)

    raw = make_raw_params(kp, Cin, growth_rate, num_bn)
    kparams = fold_params(raw)

    out = jax.block_until_ready(bottleneck_block_pallas(x, kparams))
    assert out.shape == (N, Cin + growth_rate, H, W), out.shape

    # Passthrough channels must be bit-exact.
    assert jnp.array_equal(out[:, :Cin], x)

    # Tight check against a reference with identical bf16 rounding points.
    ref_m = jax.block_until_ready(reference_matched(x, kparams))
    err_m = float(jnp.max(jnp.abs(out - ref_m)))
    assert err_m < 2e-3, err_m

    # Looser check against pure-f32 eval-mode semantics (difference is only
    # the bf16 rounding of the MXU inputs).
    ref_f = jax.block_until_ready(reference_f32(x, raw))
    err_f = float(jnp.max(jnp.abs(out - ref_f)))
    assert err_f < 1e-1, err_f

    print("KERNEL_OK")
</pallas_src>

<mosaic_0001>
module attributes {stable_mosaic.version = 11 : i64} {
  func.func @_bottleneck_kernel(%arg0: i32, %arg1: memref<1x16x16x4xf32, #tpu.memory_space<vmem>>, %arg2: memref<1x4xf32, #tpu.memory_space<vmem>>, %arg3: memref<1x4xf32, #tpu.memory_space<vmem>>, %arg4: memref<4x12xbf16, #tpu.memory_space<vmem>>, %arg5: memref<1x12xf32, #tpu.memory_space<vmem>>, %arg6: memref<9x12x4xbf16, #tpu.memory_space<vmem>>, %arg7: memref<1x16x16x4xf32, #tpu.memory_space<vmem>>, %arg8: memref<18x18x4xf32, #tpu.memory_space<vmem>>) attributes {dimension_semantics = [#tpu.dimension_semantics<parallel>], iteration_bounds = array<i64: 2>, scalar_prefetch = 0 : i64, scratch_operands = 1 : i64, tpu.core_type = #tpu.core_type<tc>, window_params = [{transform_indices = @transform_0, window_bounds = array<i64: 1, 16, 16, 4>}, {pipeline_mode = #tpu.pipeline_mode<synchronous>, transform_indices = @transform_1, window_bounds = array<i64: 1, 4>}, {pipeline_mode = #tpu.pipeline_mode<synchronous>, transform_indices = @transform_2, window_bounds = array<i64: 1, 4>}, {pipeline_mode = #tpu.pipeline_mode<synchronous>, transform_indices = @transform_3, window_bounds = array<i64: 4, 12>}, {pipeline_mode = #tpu.pipeline_mode<synchronous>, transform_indices = @transform_4, window_bounds = array<i64: 1, 12>}, {pipeline_mode = #tpu.pipeline_mode<synchronous>, transform_indices = @transform_5, window_bounds = array<i64: 9, 12, 4>}, {transform_indices = @transform_6, window_bounds = array<i64: 1, 16, 16, 4>}]} {
    %c0 = arith.constant 0 : index
    %c0_0 = arith.constant 0 : index
    %c0_1 = arith.constant 0 : index
    %c0_2 = arith.constant 0 : index
    %0 = vector.load %arg1[%c0, %c0_0, %c0_1, %c0_2] : memref<1x16x16x4xf32, #tpu.memory_space<vmem>>, vector<1x16x16x4xf32>
    %1 = vector.shape_cast %0 : vector<1x16x16x4xf32> to vector<16x16x4xf32>
    %c0_3 = arith.constant 0 : index
    %c0_4 = arith.constant 0 : index
    %2 = vector.load %arg2[%c0_3, %c0_4] : memref<1x4xf32, #tpu.memory_space<vmem>>, vector<1x4xf32>
    %3 = vector.shape_cast %2 : vector<1x4xf32> to vector<4xf32>
    %4 = vector.shape_cast %3 : vector<4xf32> to vector<1x1x4xf32>
    %5 = vector.broadcast %4 : vector<1x1x4xf32> to vector<16x16x4xf32>
    %6 = arith.mulf %1, %5 : vector<16x16x4xf32>
    %c0_5 = arith.constant 0 : index
    %c0_6 = arith.constant 0 : index
    %7 = vector.load %arg3[%c0_5, %c0_6] : memref<1x4xf32, #tpu.memory_space<vmem>>, vector<1x4xf32>
    %8 = vector.shape_cast %7 : vector<1x4xf32> to vector<4xf32>
    %9 = vector.shape_cast %8 : vector<4xf32> to vector<1x1x4xf32>
    %10 = vector.broadcast %9 : vector<1x1x4xf32> to vector<16x16x4xf32>
    %11 = arith.addf %6, %10 : vector<16x16x4xf32>
    %cst = arith.constant 0.000000e+00 : f32
    %12 = vector.broadcast %cst : f32 to vector<16x16x4xf32>
    %13 = arith.maximumf %11, %12 : vector<16x16x4xf32>
    %14 = arith.truncf %13 : vector<16x16x4xf32> to vector<16x16x4xbf16>
    %15 = vector.shape_cast %14 : vector<16x16x4xbf16> to vector<256x4xbf16>
    %c0_7 = arith.constant 0 : index
    %c0_8 = arith.constant 0 : index
    %16 = vector.load %arg4[%c0_7, %c0_8] : memref<4x12xbf16, #tpu.memory_space<vmem>>, vector<4x12xbf16>
    %cst_9 = arith.constant dense<0.000000e+00> : vector<256x12xf32>
    %17 = tpu.matmul %15, %16, %cst_9 {dimension_numbers = #tpu.dot_dimension_numbers<[1], [0], [0], [1], [0, 0, 1, 1], [], []>} : vector<256x4xbf16>, vector<4x12xbf16>, vector<256x12xf32> -> vector<256x12xf32>
    %c0_10 = arith.constant 0 : index
    %c0_11 = arith.constant 0 : index
    %18 = vector.load %arg5[%c0_10, %c0_11] : memref<1x12xf32, #tpu.memory_space<vmem>>, vector<1x12xf32>
    %19 = vector.broadcast %18 : vector<1x12xf32> to vector<256x12xf32>
    %20 = arith.addf %17, %19 : vector<256x12xf32>
    %cst_12 = arith.constant 0.000000e+00 : f32
    %21 = vector.broadcast %cst_12 : f32 to vector<256x12xf32>
    %22 = arith.maximumf %20, %21 : vector<256x12xf32>
    %23 = arith.truncf %22 : vector<256x12xf32> to vector<256x12xbf16>
    %cst_13 = arith.constant 0.000000e+00 : f32
    %24 = vector.broadcast %cst_13 : f32 to vector<18x18x4xf32>
    %c0_14 = arith.constant 0 : index
    %c0_15 = arith.constant 0 : index
    %c0_16 = arith.constant 0 : index
    %25 = vector.load %arg8[%c0_14, %c0_15, %c0_16] : memref<18x18x4xf32, #tpu.memory_space<vmem>>, vector<18x18x4xf32>
    tpu.vector_store %arg8[%c0_14, %c0_15, %c0_16], %24 {strides = array<i32>} : memref<18x18x4xf32, #tpu.memory_space<vmem>>, vector<18x18x4xf32>,
    %c0_17 = arith.constant 0 : index
    %c0_18 = arith.constant 0 : index
    %c0_19 = arith.constant 0 : index
    %26 = vector.load %arg6[%c0_17, %c0_18, %c0_19] : memref<9x12x4xbf16, #tpu.memory_space<vmem>>, vector<1x12x4xbf16>
    %27 = vector.shape_cast %26 : vector<1x12x4xbf16> to vector<12x4xbf16>
    %cst_20 = arith.constant dense<0.000000e+00> : vector<256x4xf32>
    %28 = tpu.matmul %23, %27, %cst_20 {dimension_numbers = #tpu.dot_dimension_numbers<[1], [0], [0], [1], [0, 0, 1, 1], [], []>} : vector<256x12xbf16>, vector<12x4xbf16>, vector<256x4xf32> -> vector<256x4xf32>
    %c2 = arith.constant 2 : index
    %c2_21 = arith.constant 2 : index
    %c0_22 = arith.constant 0 : index
    %29 = vector.load %arg8[%c2, %c2_21, %c0_22] : memref<18x18x4xf32, #tpu.memory_space<vmem>>, vector<16x16x4xf32>
    %30 = vector.shape_cast %28 : vector<256x4xf32> to vector<16x16x4xf32>
    %31 = arith.addf %29, %30 : vector<16x16x4xf32>
    %c2_23 = arith.constant 2 : index
    %c2_24 = arith.constant 2 : index
    %c0_25 = arith.constant 0 : index
    %32 = vector.load %arg8[%c2_23, %c2_24, %c0_25] : memref<18x18x4xf32, #tpu.memory_space<vmem>>, vector<16x16x4xf32>
    tpu.vector_store %arg8[%c2_23, %c2_24, %c0_25], %31 {strides = array<i32>} : memref<18x18x4xf32, #tpu.memory_space<vmem>>, vector<16x16x4xf32>,
    %c1 = arith.constant 1 : index
    %c0_26 = arith.constant 0 : index
    %c0_27 = arith.constant 0 : index
    %33 = vector.load %arg6[%c1, %c0_26, %c0_27] : memref<9x12x4xbf16, #tpu.memory_space<vmem>>, vector<1x12x4xbf16>
    %34 = vector.shape_cast %33 : vector<1x12x4xbf16> to vector<12x4xbf16>
    %cst_28 = arith.constant dense<0.000000e+00> : vector<256x4xf32>
    %35 = tpu.matmul %23, %34, %cst_28 {dimension_numbers = #tpu.dot_dimension_numbers<[1], [0], [0], [1], [0, 0, 1, 1], [], []>} : vector<256x12xbf16>, vector<12x4xbf16>, vector<256x4xf32> -> vector<256x4xf32>
    %c2_29 = arith.constant 2 : index
    %c1_30 = arith.constant 1 : index
    %c0_31 = arith.constant 0 : index
    %36 = vector.load %arg8[%c2_29, %c1_30, %c0_31] : memref<18x18x4xf32, #tpu.memory_space<vmem>>, vector<16x16x4xf32>
    %37 = vector.shape_cast %35 : vector<256x4xf32> to vector<16x16x4xf32>
    %38 = arith.addf %36, %37 : vector<16x16x4xf32>
    %c2_32 = arith.constant 2 : index
    %c1_33 = arith.constant 1 : index
    %c0_34 = arith.constant 0 : index
    %39 = vector.load %arg8[%c2_32, %c1_33, %c0_34] : memref<18x18x4xf32, #tpu.memory_space<vmem>>, vector<16x16x4xf32>
    tpu.vector_store %arg8[%c2_32, %c1_33, %c0_34], %38 {strides = array<i32>} : memref<18x18x4xf32, #tpu.memory_space<vmem>>, vector<16x16x4xf32>,
    %c2_35 = arith.constant 2 : index
    %c0_36 = arith.constant 0 : index
    %c0_37 = arith.constant 0 : index
    %40 = vector.load %arg6[%c2_35, %c0_36, %c0_37] : memref<9x12x4xbf16, #tpu.memory_space<vmem>>, vector<1x12x4xbf16>
    %41 = vector.shape_cast %40 : vector<1x12x4xbf16> to vector<12x4xbf16>
    %cst_38 = arith.constant dense<0.000000e+00> : vector<256x4xf32>
    %42 = tpu.matmul %23, %41, %cst_38 {dimension_numbers = #tpu.dot_dimension_numbers<[1], [0], [0], [1], [0, 0, 1, 1], [], []>} : vector<256x12xbf16>, vector<12x4xbf16>, vector<256x4xf32> -> vector<256x4xf32>
    %c2_39 = arith.constant 2 : index
    %c0_40 = arith.constant 0 : index
    %c0_41 = arith.constant 0 : index
    %43 = vector.load %arg8[%c2_39, %c0_40, %c0_41] : memref<18x18x4xf32, #tpu.memory_space<vmem>>, vector<16x16x4xf32>
    %44 = vector.shape_cast %42 : vector<256x4xf32> to vector<16x16x4xf32>
    %45 = arith.addf %43, %44 : vector<16x16x4xf32>
    %c2_42 = arith.constant 2 : index
    %c0_43 = arith.constant 0 : index
    %c0_44 = arith.constant 0 : index
    %46 = vector.load %arg8[%c2_42, %c0_43, %c0_44] : memref<18x18x4xf32, #tpu.memory_space<vmem>>, vector<16x16x4xf32>
    tpu.vector_store %arg8[%c2_42, %c0_43, %c0_44], %45 {strides = array<i32>} : memref<18x18x4xf32, #tpu.memory_space<vmem>>, vector<16x16x4xf32>,
    %c3 = arith.constant 3 : index
    %c0_45 = arith.constant 0 : index
    %c0_46 = arith.constant 0 : index
    %47 = vector.load %arg6[%c3, %c0_45, %c0_46] : memref<9x12x4xbf16, #tpu.memory_space<vmem>>, vector<1x12x4xbf16>
    %48 = vector.shape_cast %47 : vector<1x12x4xbf16> to vector<12x4xbf16>
    %cst_47 = arith.constant dense<0.000000e+00> : vector<256x4xf32>
    %49 = tpu.matmul %23, %48, %cst_47 {dimension_numbers = #tpu.dot_dimension_numbers<[1], [0], [0], [1], [0, 0, 1, 1], [], []>} : vector<256x12xbf16>, vector<12x4xbf16>, vector<256x4xf32> -> vector<256x4xf32>
    %c1_48 = arith.constant 1 : index
    %c2_49 = arith.constant 2 : index
    %c0_50 = arith.constant 0 : index
    %50 = vector.load %arg8[%c1_48, %c2_49, %c0_50] : memref<18x18x4xf32, #tpu.memory_space<vmem>>, vector<16x16x4xf32>
    %51 = vector.shape_cast %49 : vector<256x4xf32> to vector<16x16x4xf32>
    %52 = arith.addf %50, %51 : vector<16x16x4xf32>
    %c1_51 = arith.constant 1 : index
    %c2_52 = arith.constant 2 : index
    %c0_53 = arith.constant 0 : index
    %53 = vector.load %arg8[%c1_51, %c2_52, %c0_53] : memref<18x18x4xf32, #tpu.memory_space<vmem>>, vector<16x16x4xf32>
    tpu.vector_store %arg8[%c1_51, %c2_52, %c0_53], %52 {strides = array<i32>} : memref<18x18x4xf32, #tpu.memory_space<vmem>>, vector<16x16x4xf32>,
    %c4 = arith.constant 4 : index
    %c0_54 = arith.constant 0 : index
    %c0_55 = arith.constant 0 : index
    %54 = vector.load %arg6[%c4, %c0_54, %c0_55] : memref<9x12x4xbf16, #tpu.memory_space<vmem>>, vector<1x12x4xbf16>
    %55 = vector.shape_cast %54 : vector<1x12x4xbf16> to vector<12x4xbf16>
    %cst_56 = arith.constant dense<0.000000e+00> : vector<256x4xf32>
    %56 = tpu.matmul %23, %55, %cst_56 {dimension_numbers = #tpu.dot_dimension_numbers<[1], [0], [0], [1], [0, 0, 1, 1], [], []>} : vector<256x12xbf16>, vector<12x4xbf16>, vector<256x4xf32> -> vector<256x4xf32>
    %c1_57 = arith.constant 1 : index
    %c1_58 = arith.constant 1 : index
    %c0_59 = arith.constant 0 : index
    %57 = vector.load %arg8[%c1_57, %c1_58, %c0_59] : memref<18x18x4xf32, #tpu.memory_space<vmem>>, vector<16x16x4xf32>
    %58 = vector.shape_cast %56 : vector<256x4xf32> to vector<16x16x4xf32>
    %59 = arith.addf %57, %58 : vector<16x16x4xf32>
    %c1_60 = arith.constant 1 : index
    %c1_61 = arith.constant 1 : index
    %c0_62 = arith.constant 0 : index
    %60 = vector.load %arg8[%c1_60, %c1_61, %c0_62] : memref<18x18x4xf32, #tpu.memory_space<vmem>>, vector<16x16x4xf32>
    tpu.vector_store %arg8[%c1_60, %c1_61, %c0_62], %59 {strides = array<i32>} : memref<18x18x4xf32, #tpu.memory_space<vmem>>, vector<16x16x4xf32>,
    %c5 = arith.constant 5 : index
    %c0_63 = arith.constant 0 : index
    %c0_64 = arith.constant 0 : index
    %61 = vector.load %arg6[%c5, %c0_63, %c0_64] : memref<9x12x4xbf16, #tpu.memory_space<vmem>>, vector<1x12x4xbf16>
    %62 = vector.shape_cast %61 : vector<1x12x4xbf16> to vector<12x4xbf16>
    %cst_65 = arith.constant dense<0.000000e+00> : vector<256x4xf32>
    %63 = tpu.matmul %23, %62, %cst_65 {dimension_numbers = #tpu.dot_dimension_numbers<[1], [0], [0], [1], [0, 0, 1, 1], [], []>} : vector<256x12xbf16>, vector<12x4xbf16>, vector<256x4xf32> -> vector<256x4xf32>
    %c1_66 = arith.constant 1 : index
    %c0_67 = arith.constant 0 : index
    %c0_68 = arith.constant 0 : index
    %64 = vector.load %arg8[%c1_66, %c0_67, %c0_68] : memref<18x18x4xf32, #tpu.memory_space<vmem>>, vector<16x16x4xf32>
    %65 = vector.shape_cast %63 : vector<256x4xf32> to vector<16x16x4xf32>
    %66 = arith.addf %64, %65 : vector<16x16x4xf32>
    %c1_69 = arith.constant 1 : index
    %c0_70 = arith.constant 0 : index
    %c0_71 = arith.constant 0 : index
    %67 = vector.load %arg8[%c1_69, %c0_70, %c0_71] : memref<18x18x4xf32, #tpu.memory_space<vmem>>, vector<16x16x4xf32>
    tpu.vector_store %arg8[%c1_69, %c0_70, %c0_71], %66 {strides = array<i32>} : memref<18x18x4xf32, #tpu.memory_space<vmem>>, vector<16x16x4xf32>,
    %c6 = arith.constant 6 : index
    %c0_72 = arith.constant 0 : index
    %c0_73 = arith.constant 0 : index
    %68 = vector.load %arg6[%c6, %c0_72, %c0_73] : memref<9x12x4xbf16, #tpu.memory_space<vmem>>, vector<1x12x4xbf16>
    %69 = vector.shape_cast %68 : vector<1x12x4xbf16> to vector<12x4xbf16>
    %cst_74 = arith.constant dense<0.000000e+00> : vector<256x4xf32>
    %70 = tpu.matmul %23, %69, %cst_74 {dimension_numbers = #tpu.dot_dimension_numbers<[1], [0], [0], [1], [0, 0, 1, 1], [], []>} : vector<256x12xbf16>, vector<12x4xbf16>, vector<256x4xf32> -> vector<256x4xf32>
    %c0_75 = arith.constant 0 : index
    %c2_76 = arith.constant 2 : index
    %c0_77 = arith.constant 0 : index
    %71 = vector.load %arg8[%c0_75, %c2_76, %c0_77] : memref<18x18x4xf32, #tpu.memory_space<vmem>>, vector<16x16x4xf32>
    %72 = vector.shape_cast %70 : vector<256x4xf32> to vector<16x16x4xf32>
    %73 = arith.addf %71, %72 : vector<16x16x4xf32>
    %c0_78 = arith.constant 0 : index
    %c2_79 = arith.constant 2 : index
    %c0_80 = arith.constant 0 : index
    %74 = vector.load %arg8[%c0_78, %c2_79, %c0_80] : memref<18x18x4xf32, #tpu.memory_space<vmem>>, vector<16x16x4xf32>
    tpu.vector_store %arg8[%c0_78, %c2_79, %c0_80], %73 {strides = array<i32>} : memref<18x18x4xf32, #tpu.memory_space<vmem>>, vector<16x16x4xf32>,
    %c7 = arith.constant 7 : index
    %c0_81 = arith.constant 0 : index
    %c0_82 = arith.constant 0 : index
    %75 = vector.load %arg6[%c7, %c0_81, %c0_82] : memref<9x12x4xbf16, #tpu.memory_space<vmem>>, vector<1x12x4xbf16>
    %76 = vector.shape_cast %75 : vector<1x12x4xbf16> to vector<12x4xbf16>
    %cst_83 = arith.constant dense<0.000000e+00> : vector<256x4xf32>
    %77 = tpu.matmul %23, %76, %cst_83 {dimension_numbers = #tpu.dot_dimension_numbers<[1], [0], [0], [1], [0, 0, 1, 1], [], []>} : vector<256x12xbf16>, vector<12x4xbf16>, vector<256x4xf32> -> vector<256x4xf32>
    %c0_84 = arith.constant 0 : index
    %c1_85 = arith.constant 1 : index
    %c0_86 = arith.constant 0 : index
    %78 = vector.load %arg8[%c0_84, %c1_85, %c0_86] : memref<18x18x4xf32, #tpu.memory_space<vmem>>, vector<16x16x4xf32>
    %79 = vector.shape_cast %77 : vector<256x4xf32> to vector<16x16x4xf32>
    %80 = arith.addf %78, %79 : vector<16x16x4xf32>
    %c0_87 = arith.constant 0 : index
    %c1_88 = arith.constant 1 : index
    %c0_89 = arith.constant 0 : index
    %81 = vector.load %arg8[%c0_87, %c1_88, %c0_89] : memref<18x18x4xf32, #tpu.memory_space<vmem>>, vector<16x16x4xf32>
    tpu.vector_store %arg8[%c0_87, %c1_88, %c0_89], %80 {strides = array<i32>} : memref<18x18x4xf32, #tpu.memory_space<vmem>>, vector<16x16x4xf32>,
    %c8 = arith.constant 8 : index
    %c0_90 = arith.constant 0 : index
    %c0_91 = arith.constant 0 : index
    %82 = vector.load %arg6[%c8, %c0_90, %c0_91] : memref<9x12x4xbf16, #tpu.memory_space<vmem>>, vector<1x12x4xbf16>
    %83 = vector.shape_cast %82 : vector<1x12x4xbf16> to vector<12x4xbf16>
    %cst_92 = arith.constant dense<0.000000e+00> : vector<256x4xf32>
    %84 = tpu.matmul %23, %83, %cst_92 {dimension_numbers = #tpu.dot_dimension_numbers<[1], [0], [0], [1], [0, 0, 1, 1], [], []>} : vector<256x12xbf16>, vector<12x4xbf16>, vector<256x4xf32> -> vector<256x4xf32>
    %c0_93 = arith.constant 0 : index
    %c0_94 = arith.constant 0 : index
    %c0_95 = arith.constant 0 : index
    %85 = vector.load %arg8[%c0_93, %c0_94, %c0_95] : memref<18x18x4xf32, #tpu.memory_space<vmem>>, vector<16x16x4xf32>
    %86 = vector.shape_cast %84 : vector<256x4xf32> to vector<16x16x4xf32>
    %87 = arith.addf %85, %86 : vector<16x16x4xf32>
    %c0_96 = arith.constant 0 : index
    %c0_97 = arith.constant 0 : index
    %c0_98 = arith.constant 0 : index
    %88 = vector.load %arg8[%c0_96, %c0_97, %c0_98] : memref<18x18x4xf32, #tpu.memory_space<vmem>>, vector<16x16x4xf32>
    tpu.vector_store %arg8[%c0_96, %c0_97, %c0_98], %87 {strides = array<i32>} : memref<18x18x4xf32, #tpu.memory_space<vmem>>, vector<16x16x4xf32>,
    %c1_99 = arith.constant 1 : index
    %c1_100 = arith.constant 1 : index
    %c0_101 = arith.constant 0 : index
    %89 = vector.load %arg8[%c1_99, %c1_100, %c0_101] : memref<18x18x4xf32, #tpu.memory_space<vmem>>, vector<16x16x4xf32>
    %c0_102 = arith.constant 0 : index
    %c0_103 = arith.constant 0 : index
    %c0_104 = arith.constant 0 : index
    %c0_105 = arith.constant 0 : index
    %90 = vector.load %arg7[%c0_102, %c0_103, %c0_104, %c0_105] : memref<1x16x16x4xf32, #tpu.memory_space<vmem>>, vector<1x16x16x4xf32>
    %91 = vector.shape_cast %90 : vector<1x16x16x4xf32> to vector<16x16x4xf32>
    %92 = vector.shape_cast %89 : vector<16x16x4xf32> to vector<1x16x16x4xf32>
    tpu.vector_store %arg7[%c0_102, %c0_103, %c0_104, %c0_105], %92 {strides = array<i32>} : memref<1x16x16x4xf32, #tpu.memory_space<vmem>>, vector<1x16x16x4xf32>,
    return
  }
  func.func @transform_0(%arg0: i32) -> (i32, i32, i32, i32) {
    %c0_i32 = arith.constant 0 : i32
    %c0_i32_0 = arith.constant 0 : i32
    %c0_i32_1 = arith.constant 0 : i32
    %c0_i32_2 = arith.constant 0 : i32
    return %arg0, %c0_i32, %c0_i32_0, %c0_i32_1 : i32, i32, i32, i32
  }
  func.func @transform_1(%arg0: i32) -> (i32, i32) {
    %c0_i32 = arith.constant 0 : i32
    %c0_i32_0 = arith.constant 0 : i32
    %c0_i32_1 = arith.constant 0 : i32
    return %c0_i32, %c0_i32_0 : i32, i32
  }
  func.func @transform_2(%arg0: i32) -> (i32, i32) {
    %c0_i32 = arith.constant 0 : i32
    %c0_i32_0 = arith.constant 0 : i32
    %c0_i32_1 = arith.constant 0 : i32
    return %c0_i32, %c0_i32_0 : i32, i32
  }
  func.func @transform_3(%arg0: i32) -> (i32, i32) {
    %c0_i32 = arith.constant 0 : i32
    %c0_i32_0 = arith.constant 0 : i32
    %c0_i32_1 = arith.constant 0 : i32
    return %c0_i32, %c0_i32_0 : i32, i32
  }
  func.func @transform_4(%arg0: i32) -> (i32, i32) {
    %c0_i32 = arith.constant 0 : i32
    %c0_i32_0 = arith.constant 0 : i32
    %c0_i32_1 = arith.constant 0 : i32
    return %c0_i32, %c0_i32_0 : i32, i32
  }
  func.func @transform_5(%arg0: i32) -> (i32, i32, i32) {
    %c0_i32 = arith.constant 0 : i32
    %c0_i32_0 = arith.constant 0 : i32
    %c0_i32_1 = arith.constant 0 : i32
    %c0_i32_2 = arith.constant 0 : i32
    return %c0_i32, %c0_i32_0, %c0_i32_1 : i32, i32, i32
  }
  func.func @transform_6(%arg0: i32) -> (i32, i32, i32, i32) {
    %c0_i32 = arith.constant 0 : i32
    %c0_i32_0 = arith.constant 0 : i32
    %c0_i32_1 = arith.constant 0 : i32
    %c0_i32_2 = arith.constant 0 : i32
    return %arg0, %c0_i32, %c0_i32_0, %c0_i32_1 : i32, i32, i32, i32
  }
}

</mosaic_0001>

<bundles_post_ra>
// kernel: tpu_custom_call.1
= control target key start
LH: loop header
LB: loop body
LE: loop exit
PB: predicated region body
PF: predicated region fallthrough
CT: control target
= control target key end

     0   :  { %s4101_s21 = smov 0   ;;  %s5081_s0 = inlined_call_operand.vmem [shape: f32[2,16,16,4], index: 0, kind: input, shape index: {}]   ;;  %s5082_s1 = inlined_call_operand.vmem [shape: f32[1,4], index: 1, kind: input, shape index: {}]   ;;  %s5083_s2 = inlined_call_operand.vmem [shape: f32[1,4], index: 2, kind: input, shape index: {}]   ;;  %s5084_s3 = inlined_call_operand.vmem [shape: bf16[4,12], index: 3, kind: input, shape index: {}]   ;;  %s5085_s4 = inlined_call_operand.vmem [shape: f32[1,12], index: 4, kind: input, shape index: {}]   ;;  %s5086_s5 = inlined_call_operand.vmem [shape: bf16[9,12,4], index: 5, kind: input, shape index: {}]   ;;  %s5087_s6 = inlined_call_operand.vmem [shape: f32[2,16,16,4], index: 6, kind: output, shape index: {}]  }
   0x1 LB: > { %s3318_s22 = sadd.s32 4294967295, %s4063_s21   ;;  %p3322_p0 = scmp.ge.s32.totalorder %s4063_s21, 1  ;;  %s4063_s21 = sphi %s4101_s21, %s16_s21  }
   0x2   : > { %p212_p1 = scmp.lt.s32.totalorder %s4063_s21, 3 }
   0x4   : > { %p213_p2 = pnand %p3322_p0, %p212_p1 }
   0x5   : > { %v411_v0 = vld [vmem:[%s5084_s3] sm:$0x3] (!%p213_p2)  ;;  %vm468_vm0 = vcmask (!%p213_p2), 1041408   ;;  %p242_p3 = scmp.lt.s32.totalorder (!%p213_p2), %s3318_s22, 1  ;;  %vm419_vm1 = vcmask (!%p213_p2), 31744   ;;  %vm792_vm2 = vcmask (!%p213_p2), 1045504  }
   0x6   : > { %216 = sbr.rel (%p213_p2) target bundleno = 787 (0x313), region = 44  ;;  %4029 = vmatprep.subr.msk.bf16.mxu0 (!%p213_p2), %vm468_vm0, %v411_v0  ;;  %v470_v1 = vsel (!%p213_p2), %vm468_vm0, %v411_v0, 0  ;;  %v4117_v2 = vld [vmem:[%s5082_s1] ss:$0 sm:$0xff] (!%p213_p2)  ;;  %vm743_vm3 = vcmask (!%p213_p2), 97280   ;;  %vm683_vm4 = vcmask (!%p213_p2), 25600  }
   0x7   : > { %3690 = vmatpush3.bf16.msra.mxu0 (!%p213_p2), %v470_v1  ;;  %v4123_v3 = vld [vmem:[%s5083_s2] ss:$0 sm:$0xff] (!%p213_p2) }
   0xd   : > { %s5089_s22 = smov (!%p242_p3, %s3318_s22), 1 }
   0xe   : > { %s3517_s27 = sshll.u32 %s5089_s22, 8 }
   0xf   : > { %s4130_s8 = scalar_lea.vmem %s5081_s0, %s3517_s27  ;;  %s4921_s10 = scalar_lea.vmem %s5087_s6, %s3517_s27 }
  0x10   : > { %v253_v4 = vld [vmem:[%s4130_s8] sm:$0xff]  ;;  %v254_v5 = vld [vmem:[%s4130_s8 + $0x8] sm:$0xff]  ;;  %v255_v6 = vld [vmem:[%s4130_s8 + $0x10] sm:$0xff] }
  0x11   : > { %v292_v7 = vmul.f32 %v4117_v2, %v253_v4  ;;  %v293_v8 = vmul.f32 %v4117_v2, %v254_v5  ;;  %v256_v9 = vld [vmem:[%s4130_s8 + $0x18] sm:$0xff]  ;;  %v294_v10 = vmul.f32 %v4117_v2, %v255_v6  ;;  %v257_v11 = vld [vmem:[%s4130_s8 + $0x20] sm:$0xff]  ;;  %v258_v12 = vld [vmem:[%s4130_s8 + $0x28] sm:$0xff] }
  0x12   : > { %v295_v13 = vmul.f32 %v4117_v2, %v256_v9  ;;  %v296_v14 = vmul.f32 %v4117_v2, %v257_v11  ;;  %v297_v15 = vmul.f32 %v4117_v2, %v258_v12  ;;  %v259_v16 = vld [vmem:[%s4130_s8 + $0x30] sm:$0xff]  ;;  %v260_v17 = vld [vmem:[%s4130_s8 + $0x38] sm:$0xff]  ;;  %v261_v26 = vld [vmem:[%s4130_s8 + $0x40] sm:$0xff] }
  0x13   : > { %v331_v18 = vadd.f32 %v4123_v3, %v292_v7  ;;  %v332_v19 = vadd.f32 %v4123_v3, %v293_v8  ;;  %v333_v20 = vadd.f32 %v4123_v3, %v294_v10  ;;  %v298_v21 = vmul.f32 %v4117_v2, %v259_v16  ;;  %v262_v27 = vld [vmem:[%s4130_s8 + $0x48] sm:$0xff]  ;;  %v263_v39 = vld [vmem:[%s4130_s8 + $0x50] sm:$0xff]  ;;  %v264_v40 = vld [vmem:[%s4130_s8 + $0x58] sm:$0xff] }
  0x14   : > { %v334_v22 = vadd.f32 %v4123_v3, %v295_v13  ;;  %v335_v23 = vadd.f32 %v4123_v3, %v296_v14  ;;  %v336_v24 = vadd.f32 %v4123_v3, %v297_v15  ;;  %v299_v25 = vmul.f32 %v4117_v2, %v260_v17  ;;  %v265_v43 = vld [vmem:[%s4130_s8 + $0x60] sm:$0xff]  ;;  %v266_v44 = vld [vmem:[%s4130_s8 + $0x68] sm:$0xff]  ;;  %v267_v61 = vld [vmem:[%s4130_s8 + $0x70] sm:$0xff] }
  0x15   : > { %v363_v28 = vmax.f32 %v331_v18, 0.0  ;;  %v364_v29 = vmax.f32 %v332_v19, 0.0  ;;  %v365_v30 = vmax.f32 %v333_v20, 0.0  ;;  %v337_v31 = vadd.f32 %v4123_v3, %v298_v21  ;;  %v268_v62 = vld [vmem:[%s4130_s8 + $0x78] sm:$0xff]  ;;  %v269_v63 = vld [vmem:[%s4130_s8 + $0x80] sm:$0xff]  ;;  %v270_v0 = vld [vmem:[%s4130_s8 + $0x88] sm:$0xff] }
  0x16   : > { %v366_v32 = vmax.f32 %v334_v22, 0.0  ;;  %v367_v33 = vmax.f32 %v335_v23, 0.0  ;;  %v368_v34 = vmax.f32 %v336_v24, 0.0  ;;  %v338_v35 = vadd.f32 %v4123_v3, %v299_v25  ;;  %v271_v17 = vld [vmem:[%s4130_s8 + $0x90] sm:$0xff]  ;;  %v272_v18 = vld [vmem:[%s4130_s8 + $0x98] sm:$0xff]  ;;  %v273_v19 = vld [vmem:[%s4130_s8 + $0xa0] sm:$0xff] }
  0x17   : > { %v395_v36 = vpack.c.bf16 %v364_v29, %v363_v28  ;;  %v300_v37 = vmul.f32 %v4117_v2, %v261_v26  ;;  %v301_v38 = vmul.f32 %v4117_v2, %v262_v27  ;;  %v369_v47 = vmax.f32 %v337_v31, 0.0  ;;  %v274_v20 = vld [vmem:[%s4130_s8 + $0xa8] sm:$0xff] }
  0x18   : > { %v396_v41 = vpack.c.bf16 %v366_v32, %v365_v30  ;;  %v397_v42 = vpack.c.bf16 %v368_v34, %v367_v33  ;;  %v370_v48 = vmax.f32 %v338_v35, 0.0  ;;  %v302_v49 = vmul.f32 %v4117_v2, %v263_v39  ;;  %v275_v35 = vld [vmem:[%s4130_s8 + $0xb0] sm:$0xff] }
  0x19   : > { %3691 = vmatprep.mubr.msk.bf16.mxu0 %vm419_vm1, %v395_v36  ;;  %v339_v45 = vadd.f32 %v4123_v3, %v300_v37  ;;  %v340_v46 = vadd.f32 %v4123_v3, %v301_v38  ;;  %v303_v50 = vmul.f32 %v4117_v2, %v264_v40  ;;  %v304_v53 = vmul.f32 %v4117_v2, %v265_v43  ;;  %v276_v36 = vld [vmem:[%s4130_s8 + $0xb8] sm:$0xff]  ;;  %v277_v37 = vld [vmem:[%s4130_s8 + $0xc0] sm:$0xff]  ;;  %v278_v38 = vld [vmem:[%s4130_s8 + $0xc8] sm:$0xff] }
  0x1a   : > { %3692 = vmatmul.mubr.msk.bf16.vlgmr.msra.gmra.mrb[0].mxu0 %vm419_vm1, %v396_v41  ;;  %v305_v54 = vmul.f32 %v4117_v2, %v266_v44  ;;  %v398_v55 = vpack.c.bf16 %v370_v48, %v369_v47  ;;  %v341_v56 = vadd.f32 %v4123_v3, %v302_v49  ;;  %v306_v5 = vmul.f32 %v4117_v2, %v267_v61 }
  0x1b   : > { %3695 = vmatprep.mubr.msk.bf16.mxu0 %vm419_vm1, %v397_v42  ;;  %v371_v51 = vmax.f32 %v339_v45, 0.0  ;;  %v372_v52 = vmax.f32 %v340_v46, 0.0  ;;  %v342_v57 = vadd.f32 %v4123_v3, %v303_v50  ;;  %v343_v59 = vadd.f32 %v4123_v3, %v304_v53  ;;  %v279_v53 = vld [vmem:[%s4130_s8 + $0xd0] sm:$0xff] }
  0x1c   : > { %v344_v60 = vadd.f32 %v4123_v3, %v305_v54  ;;  %v373_v1 = vmax.f32 %v341_v56, 0.0  ;;  %v307_v6 = vmul.f32 %v4117_v2, %v268_v62  ;;  %v308_v9 = vmul.f32 %v4117_v2, %v269_v63  ;;  %v280_v54 = vld [vmem:[%s4130_s8 + $0xd8] sm:$0xff]  ;;  %v282_v56 = vld [vmem:[%s4130_s8 + $0xe8] sm:$0xff] }
  0x1d   : > { %v399_v58 = vpack.c.bf16 %v372_v52, %v371_v51  ;;  %v374_v4 = vmax.f32 %v342_v57, 0.0  ;;  %v375_v7 = vmax.f32 %v343_v59, 0.0  ;;  %v309_v10 = vmul.f32 %v4117_v2, %v270_v0 }
  0x1e   : > { %v376_v8 = vmax.f32 %v344_v60, 0.0  ;;  %v345_v12 = vadd.f32 %v4123_v3, %v306_v5  ;;  %v346_v13 = vadd.f32 %v4123_v3, %v307_v6  ;;  %v347_v15 = vadd.f32 %v4123_v3, %v308_v9  ;;  %v283_v9 = vld [vmem:[%s4130_s8 + $0xf0] sm:$0xff] }
  0x1f   : > { %v400_v11 = vpack.c.bf16 %v374_v4, %v373_v1  ;;  %v348_v16 = vadd.f32 %v4123_v3, %v309_v10  ;;  %v310_v23 = vmul.f32 %v4117_v2, %v271_v17  ;;  %v311_v24 = vmul.f32 %v4117_v2, %v272_v18  ;;  %v284_v10 = vld [vmem:[%s4130_s8 + $0xf8] sm:$0xff] }
  0x20   : > { %v401_v14 = vpack.c.bf16 %v376_v8, %v375_v7  ;;  %v377_v21 = vmax.f32 %v345_v12, 0.0  ;;  %v378_v22 = vmax.f32 %v346_v13, 0.0  ;;  %v379_v25 = vmax.f32 %v347_v15, 0.0 }
  0x21   : > { %v380_v26 = vmax.f32 %v348_v16, 0.0  ;;  %v312_v27 = vmul.f32 %v4117_v2, %v273_v19  ;;  %v313_v28 = vmul.f32 %v4117_v2, %v274_v20  ;;  %v349_v30 = vadd.f32 %v4123_v3, %v310_v23 }
  0x22   : > { %3696 = vmatmul.mubr.msk.bf16.gmra.mrb[4].mxu0 %vm419_vm1, %v398_v55  ;;  %v402_v29 = vpack.c.bf16 %v378_v22, %v377_v21  ;;  %v350_v31 = vadd.f32 %v4123_v3, %v311_v24  ;;  %v314_v41 = vmul.f32 %v4117_v2, %v275_v35  ;;  %v315_v42 = vmul.f32 %v4117_v2, %v276_v36  ;;  %v281_v55 = vld [vmem:[%s4130_s8 + $0xe0] sm:$0xff] }
  0x23   : > { %3699 = vmatprep.mubr.msk.bf16.mxu0 %vm419_vm1, %v399_v58  ;;  %v403_v32 = vpack.c.bf16 %v380_v26, %v379_v25  ;;  %v351_v33 = vadd.f32 %v4123_v3, %v312_v27  ;;  %v352_v34 = vadd.f32 %v4123_v3, %v313_v28  ;;  %v381_v39 = vmax.f32 %v349_v30, 0.0  ;;  %v4050_v26 = vld [vmem:[%s5086_s5 + $0x10] sm:$0x3f]   ;;  %v4051_v27 = vld [vmem:[%s5086_s5 + $0x18] sm:$0x3f]  }
  0x24   : > { %v382_v40 = vmax.f32 %v350_v31, 0.0  ;;  %v316_v45 = vmul.f32 %v4117_v2, %v277_v37  ;;  %v317_v46 = vmul.f32 %v4117_v2, %v278_v38  ;;  %v353_v48 = vadd.f32 %v4123_v3, %v314_v41  ;;  %v4265_v28 = vld [vmem:[%s5085_s4] ss:$0 sm:$0xff] }
  0x25   : > { %v383_v43 = vmax.f32 %v351_v33, 0.0  ;;  %v384_v44 = vmax.f32 %v352_v34, 0.0  ;;  %v354_v49 = vadd.f32 %v4123_v3, %v315_v42  ;;  %v318_v59 = vmul.f32 %v4117_v2, %v279_v53 }
  0x26   : > { %v404_v47 = vpack.c.bf16 %v382_v40, %v381_v39  ;;  %v355_v51 = vadd.f32 %v4123_v3, %v316_v45  ;;  %v356_v52 = vadd.f32 %v4123_v3, %v317_v46  ;;  %v385_v57 = vmax.f32 %v353_v48, 0.0  ;;  %v4281_v48 = vld [vmem:[%s5086_s5 + $0x20] sm:$0x3f]  }
  0x27   : > { %v405_v50 = vpack.c.bf16 %v384_v44, %v383_v43  ;;  %v386_v58 = vmax.f32 %v354_v49, 0.0  ;;  %v319_v60 = vmul.f32 %v4117_v2, %v280_v54  ;;  %v320_v63 = vmul.f32 %v4117_v2, %v281_v55  ;;  %v4286_v49 = vld [vmem:[%s5086_s5 + $0x28] sm:$0x3f]  }
  0x28   : > { %v387_v61 = vmax.f32 %v355_v51, 0.0  ;;  %v388_v62 = vmax.f32 %v356_v52, 0.0  ;;  %v321_v0 = vmul.f32 %v4117_v2, %v282_v56  ;;  %v357_v4 = vadd.f32 %v4123_v3, %v318_v59 }
  0x29   : > { %v406_v1 = vpack.c.bf16 %v386_v58, %v385_v57  ;;  %v358_v5 = vadd.f32 %v4123_v3, %v319_v60  ;;  %v359_v7 = vadd.f32 %v4123_v3, %v320_v63  ;;  %v322_v13 = vmul.f32 %v4117_v2, %v283_v9 }
  0x2a   : > { %3700 = vmatmul.mubr.msk.bf16.gmra.mrb[8].mxu0 %vm419_vm1, %v400_v11  ;;  %v407_v6 = vpack.c.bf16 %v388_v62, %v387_v61  ;;  %v360_v8 = vadd.f32 %v4123_v3, %v321_v0  ;;  %v389_v11 = vmax.f32 %v357_v4, 0.0  ;;  %v1331_v44 = vsel %vm792_vm2, %v4050_v26, 0 }
  0x2b   : > { %3703 = vmatprep.mubr.msk.bf16.mxu0 %vm419_vm1, %v401_v14  ;;  %v390_v12 = vmax.f32 %v358_v5, 0.0  ;;  %v323_v14 = vmul.f32 %v4117_v2, %v284_v10  ;;  %v391_v15 = vmax.f32 %v359_v7, 0.0  ;;  %v361_v18 = vadd.f32 %v4123_v3, %v322_v13  ;;  %v4048_v2 = vld [vmem:[%s5086_s5 + $0x8] sm:$0x3f]  }
  0x2c   : > { %v392_v16 = vmax.f32 %v360_v8, 0.0  ;;  %4031 = vmatprep.subr.msk.bf16.mxu0 %vm792_vm2, %v4048_v2  ;;  %v1063_v24 = vsel %vm792_vm2, %v4048_v2, 0 }
  0x2d   : > { %v408_v17 = vpack.c.bf16 %v390_v12, %v389_v11  ;;  %v362_v19 = vadd.f32 %v4123_v3, %v323_v14  ;;  %v393_v21 = vmax.f32 %v361_v18, 0.0  ;;  %v4049_v3 = vld [vmem:[%s5086_s5] sm:$0x3f]   ;;  %3758 = vmatpush3.bf16.msra.mxu0 %v1063_v24 }
  0x2e   : > { %v409_v20 = vpack.c.bf16 %v392_v16, %v391_v15  ;;  %4030 = vmatprep.subr.msk.bf16.mxu1 %vm792_vm2, %v4049_v3  ;;  %v794_v25 = vsel %vm792_vm2, %v4049_v3, 0  ;;  %4033 = vmatprep.subr.msk.bf16.mxu0 %vm792_vm2, %v4051_v27 }
  0x2f   : > { %v394_v22 = vmax.f32 %v362_v19, 0.0  ;;  %3724 = vmatpush3.bf16.msra.mxu1 %v794_v25 }
  0x30   : > { %4032 = vmatprep.subr.msk.bf16.mxu1 %vm792_vm2, %v4050_v26 }
  0x31   : > { %v410_v23 = vpack.c.bf16 %v394_v22, %v393_v21 }
  0x32   : > { %3704 = vmatmul.mubr.msk.bf16.gmra.mrb[12].mxu0 %vm419_vm1, %v402_v29 }
  0x33   : > { %3707 = vmatprep.mubr.msk.bf16.mxu0 %vm419_vm1, %v403_v32 }
  0x3a   : > { %3708 = vmatmul.mubr.msk.bf16.gmra.mrb[16].mxu0 %vm419_vm1, %v404_v47  ;;  %v1599_v47 = vsel %vm792_vm2, %v4051_v27, 0 }
  0x3b   : > { %3711 = vmatprep.mubr.msk.bf16.mxu0 %vm419_vm1, %v405_v50 }
  0x42   : > { %3712 = vmatmul.mubr.msk.bf16.gmra.mrb[20].mxu0 %vm419_vm1, %v406_v1 }
  0x43   : > { %3715 = vmatprep.mubr.msk.bf16.mxu0 %vm419_vm1, %v407_v6 }
  0x4a   : > { %3716 = vmatmul.mubr.msk.bf16.gmra.mrb[24].mxu0 %vm419_vm1, %v408_v17 }
  0x4b   : > { %3719 = vmatprep.mubr.msk.bf16.mxu0 %vm419_vm1, %v409_v20 }
  0x52   : > { %3720 = vmatmul.mubr.msk.bf16.gmra.mrb[28].mxu0 %vm419_vm1, %v410_v23 }
  0xed   : > { %v3693_v29 = vpop.f32.mrb[0].mxu0 }
  0xee   : > { %v515_v30 = vadd.f32 %v3693_v29, %v4265_v28  ;;  %v506_v31 = vpop.f32.mrb[1].mxu0 }
  0xef   : > { %v507_v32 = vadd.f32 %v4265_v28, %v506_v31  ;;  %v3694_v33 = vpop.f32.mrb[2].mxu0 }
  0xf0   : > { %v518_v34 = vadd.f32 %v3694_v33, %v4265_v28  ;;  %v509_v35 = vpop.f32.mrb[3].mxu0  ;;  %v635_v37 = vmax.f32 %v515_v30, 0.0 }
  0xf1   : > { %v510_v36 = vadd.f32 %v4265_v28, %v509_v35  ;;  %v633_v39 = vmax.f32 %v507_v32, 0.0 }
  0xf2   : > { %v636_v38 = vmax.f32 %v518_v34, 0.0 }
  0xf3   : > { %v634_v40 = vmax.f32 %v510_v36, 0.0 }
  0xf4   : > { %v4271_v41 = vpack.c.bf16 %v636_v38, %v635_v37 }
  0xf5   : > { %v4273_v42 = vpack.c.bf16 %v634_v40, %v633_v39  ;;  %v3697_v43 = vpop.f32.mrb[4].mxu0 }
  0xf6   : > { %v531_v45 = vadd.f32 %v3697_v43, %v4265_v28  ;;  %v522_v46 = vpop.f32.mrb[5].mxu0 }
  0xf7   : > { %v523_v50 = vadd.f32 %v4265_v28, %v522_v46  ;;  %v3698_v51 = vpop.f32.mrb[6].mxu0  ;;  %3725 = vmatprep.mubr.msk.bf16.mxu1 %vm743_vm3, %v4273_v42  ;;  %3759 = vmatprep.mubr.msk.bf16.mxu0 %vm743_vm3, %v4273_v42 }
  0xf8   : > { %v534_v52 = vadd.f32 %v3698_v51, %v4265_v28  ;;  %v525_v53 = vpop.f32.mrb[7].mxu0  ;;  %3726 = vmatmul.mubr.msk.bf16.vlgmr.msra.gmra.mrb[0].mxu1 %vm743_vm3, %v4271_v41  ;;  %3760 = vmatmul.mubr.msk.bf16.vlgmr.msra.gmra.mrb[32].mxu0 %vm743_vm3, %v4271_v41  ;;  %v639_v55 = vmax.f32 %v531_v45, 0.0 }
  0xf9   : > { %v526_v54 = vadd.f32 %v4265_v28, %v525_v53  ;;  %3792 = vmatpush3.bf16.msra.mxu1 %v1331_v44  ;;  %3826 = vmatpush3.bf16.msra.mxu0 %v1599_v47  ;;  %v637_v57 = vmax.f32 %v523_v50, 0.0 }
  0xfa   : > { %v640_v56 = vmax.f32 %v534_v52, 0.0  ;;  %4034 = vmatprep.subr.msk.bf16.mxu1 %vm792_vm2, %v4281_v48  ;;  %4035 = vmatprep.subr.msk.bf16.mxu0 %vm792_vm2, %v4286_v49 }
  0xfb   : > { %v638_v58 = vmax.f32 %v526_v54, 0.0 }
  0xfc   : > { %v4303_v59 = vpack.c.bf16 %v640_v56, %v639_v55 }
  0xfd   : > { %v4305_v60 = vpack.c.bf16 %v638_v58, %v637_v57  ;;  %v3701_v61 = vpop.f32.mrb[8].mxu0 }
  0xfe   : > { %v547_v62 = vadd.f32 %v3701_v61, %v4265_v28  ;;  %v538_v63 = vpop.f32.mrb[9].mxu0 }
  0xff   : > { %v539_v0 = vadd.f32 %v4265_v28, %v538_v63  ;;  %v3702_v1 = vpop.f32.mrb[10].mxu0  ;;  %3729 = vmatprep.mubr.msk.bf16.mxu1 %vm743_vm3, %v4305_v60  ;;  %3763 = vmatprep.mubr.msk.bf16.mxu0 %vm743_vm3, %v4305_v60 }
 0x100   : > { %v550_v4 = vadd.f32 %v3702_v1, %v4265_v28  ;;  %v541_v5 = vpop.f32.mrb[11].mxu0  ;;  %3730 = vmatmul.mubr.msk.bf16.gmra.mrb[4].mxu1 %vm743_vm3, %v4303_v59  ;;  %3764 = vmatmul.mubr.msk.bf16.gmra.mrb[36].mxu0 %vm743_vm3, %v4303_v59  ;;  %v643_v7 = vmax.f32 %v547_v62, 0.0 }
 0x101   : > { %v542_v6 = vadd.f32 %v4265_v28, %v541_v5  ;;  %v641_v9 = vmax.f32 %v539_v0, 0.0 }
 0x102   : > { %v644_v8 = vmax.f32 %v550_v4, 0.0 }
 0x103   : > { %v642_v10 = vmax.f32 %v542_v6, 0.0 }
 0x104   : > { %v4319_v11 = vpack.c.bf16 %v644_v8, %v643_v7 }
 0x105   : > { %v4321_v12 = vpack.c.bf16 %v642_v10, %v641_v9  ;;  %v3705_v13 = vpop.f32.mrb[12].mxu0 }
 0x106   : > { %v563_v14 = vadd.f32 %v3705_v13, %v4265_v28  ;;  %v554_v15 = vpop.f32.mrb[13].mxu0 }
 0x107   : > { %v555_v16 = vadd.f32 %v4265_v28, %v554_v15  ;;  %v3706_v17 = vpop.f32.mrb[14].mxu0  ;;  %3733 = vmatprep.mubr.msk.bf16.mxu1 %vm743_vm3, %v4321_v12  ;;  %3767 = vmatprep.mubr.msk.bf16.mxu0 %vm743_vm3, %v4321_v12 }
 0x108   : > { %v566_v18 = vadd.f32 %v3706_v17, %v4265_v28  ;;  %v557_v19 = vpop.f32.mrb[15].mxu0  ;;  %3734 = vmatmul.mubr.msk.bf16.gmra.mrb[8].mxu1 %vm743_vm3, %v4319_v11  ;;  %3768 = vmatmul.mubr.msk.bf16.gmra.mrb[40].mxu0 %vm743_vm3, %v4319_v11  ;;  %v647_v21 = vmax.f32 %v563_v14, 0.0 }
 0x109   : > { %v558_v20 = vadd.f32 %v4265_v28, %v557_v19  ;;  %v645_v23 = vmax.f32 %v555_v16, 0.0 }
 0x10a   : > { %v648_v22 = vmax.f32 %v566_v18, 0.0 }
 0x10b   : > { %v646_v2 = vmax.f32 %v558_v20, 0.0 }
 0x10c   : > { %v4335_v24 = vpack.c.bf16 %v648_v22, %v647_v21 }
 0x10d   : > { %v4337_v3 = vpack.c.bf16 %v646_v2, %v645_v23  ;;  %v3709_v25 = vpop.f32.mrb[16].mxu0 }
 0x10e   : > { %v579_v26 = vadd.f32 %v3709_v25, %v4265_v28  ;;  %v570_v27 = vpop.f32.mrb[17].mxu0 }
 0x10f   : > { %v571_v29 = vadd.f32 %v4265_v28, %v570_v27  ;;  %v3710_v30 = vpop.f32.mrb[18].mxu0  ;;  %3737 = vmatprep.mubr.msk.bf16.mxu1 %vm743_vm3, %v4337_v3  ;;  %3771 = vmatprep.mubr.msk.bf16.mxu0 %vm743_vm3, %v4337_v3 }
 0x110   : > { %v582_v31 = vadd.f32 %v3710_v30, %v4265_v28  ;;  %v573_v32 = vpop.f32.mrb[19].mxu0  ;;  %3738 = vmatmul.mubr.msk.bf16.gmra.mrb[12].mxu1 %vm743_vm3, %v4335_v24  ;;  %3772 = vmatmul.mubr.msk.bf16.gmra.mrb[44].mxu0 %vm743_vm3, %v4335_v24  ;;  %v651_v34 = vmax.f32 %v579_v26, 0.0  ;;  %v4422_v30 = vld [vmem:[%s5086_s5 + $0x30] sm:$0x3f]  }
 0x111   : > { %v574_v33 = vadd.f32 %v4265_v28, %v573_v32  ;;  %v649_v36 = vmax.f32 %v571_v29, 0.0  ;;  %v2136_v29 = vsel %vm792_vm2, %v4286_v49, 0  ;;  %v2404_v49 = vsel %vm792_vm2, %v4422_v30, 0 }
 0x112   : > { %v652_v35 = vmax.f32 %v582_v31, 0.0  ;;  %v4427_v31 = vld [vmem:[%s5086_s5 + $0x38] sm:$0x3f]  }
 0x113   : > { %v650_v37 = vmax.f32 %v574_v33, 0.0  ;;  %v2672_v32 = vsel %vm792_vm2, %v4427_v31, 0  ;;  %v4056_v33 = vld [vmem:[%s5086_s5 + $0x40] sm:$0x3f]  }
 0x114   : > { %v4351_v38 = vpack.c.bf16 %v652_v35, %v651_v34  ;;  %v2940_v34 = vsel %vm792_vm2, %v4056_v33, 0 }
 0x115   : > { %v4353_v39 = vpack.c.bf16 %v650_v37, %v649_v36  ;;  %v3713_v40 = vpop.f32.mrb[20].mxu0 }
 0x116   : > { %v595_v43 = vadd.f32 %v3713_v40, %v4265_v28  ;;  %v586_v44 = vpop.f32.mrb[21].mxu0 }
 0x117   : > { %v587_v45 = vadd.f32 %v4265_v28, %v586_v44  ;;  %v3714_v46 = vpop.f32.mrb[22].mxu0  ;;  %3741 = vmatprep.mubr.msk.bf16.mxu1 %vm743_vm3, %v4353_v39  ;;  %3775 = vmatprep.mubr.msk.bf16.mxu0 %vm743_vm3, %v4353_v39 }
 0x118   : > { %v598_v47 = vadd.f32 %v3714_v46, %v4265_v28  ;;  %v589_v50 = vpop.f32.mrb[23].mxu0  ;;  %3742 = vmatmul.mubr.msk.bf16.gmra.mrb[16].mxu1 %vm743_vm3, %v4351_v38  ;;  %3776 = vmatmul.mubr.msk.bf16.gmra.mrb[48].mxu0 %vm743_vm3, %v4351_v38  ;;  %v655_v52 = vmax.f32 %v595_v43, 0.0 }
 0x119   : > { %v590_v51 = vadd.f32 %v4265_v28, %v589_v50  ;;  %v653_v54 = vmax.f32 %v587_v45, 0.0 }
 0x11a   : > { %v656_v53 = vmax.f32 %v598_v47, 0.0 }
 0x11b   : > { %v654_v55 = vmax.f32 %v590_v51, 0.0 }
 0x11c   : > { %v4367_v56 = vpack.c.bf16 %v656_v53, %v655_v52 }
 0x11d   : > { %v4369_v57 = vpack.c.bf16 %v654_v55, %v653_v54  ;;  %v3717_v58 = vpop.f32.mrb[24].mxu0 }
 0x11e   : > { %v611_v61 = vadd.f32 %v3717_v58, %v4265_v28  ;;  %v602_v62 = vpop.f32.mrb[25].mxu0 }
 0x11f   : > { %v603_v63 = vadd.f32 %v4265_v28, %v602_v62  ;;  %v3718_v0 = vpop.f32.mrb[26].mxu0  ;;  %3745 = vmatprep.mubr.msk.bf16.mxu1 %vm743_vm3, %v4369_v57  ;;  %3779 = vmatprep.mubr.msk.bf16.mxu0 %vm743_vm3, %v4369_v57 }
 0x120   : > { %v614_v1 = vadd.f32 %v3718_v0, %v4265_v28  ;;  %v605_v4 = vpop.f32.mrb[27].mxu0  ;;  %3746 = vmatmul.mubr.msk.bf16.gmra.mrb[20].mxu1 %vm743_vm3, %v4367_v56  ;;  %3780 = vmatmul.mubr.msk.bf16.gmra.mrb[52].mxu0 %vm743_vm3, %v4367_v56  ;;  %v659_v6 = vmax.f32 %v611_v61, 0.0 }
 0x121   : > { %v606_v5 = vadd.f32 %v4265_v28, %v605_v4  ;;  %v657_v8 = vmax.f32 %v603_v63, 0.0 }
 0x122   : > { %v660_v7 = vmax.f32 %v614_v1, 0.0 }
 0x123   : > { %v658_v9 = vmax.f32 %v606_v5, 0.0 }
 0x124   : > { %v4383_v10 = vpack.c.bf16 %v660_v7, %v659_v6 }
 0x125   : > { %v4385_v13 = vpack.c.bf16 %v658_v9, %v657_v8  ;;  %v3721_v14 = vpop.f32.mrb[28].mxu0 }
 0x126   : > { %v627_v15 = vadd.f32 %v3721_v14, %v4265_v28  ;;  %v618_v16 = vpop.f32.mrb[29].mxu0 }
 0x127   : > { %v619_v17 = vadd.f32 %v4265_v28, %v618_v16  ;;  %v3722_v18 = vpop.f32.mrb[30].mxu0  ;;  %3749 = vmatprep.mubr.msk.bf16.mxu1 %vm743_vm3, %v4385_v13  ;;  %3783 = vmatprep.mubr.msk.bf16.mxu0 %vm743_vm3, %v4385_v13 }
 0x128   : > { %v630_v19 = vadd.f32 %v3722_v18, %v4265_v28  ;;  %v621_v20 = vpop.f32.mrb[31].mxu0  ;;  %3750 = vmatmul.mubr.msk.bf16.gmra.mrb[24].mxu1 %vm743_vm3, %v4383_v10  ;;  %3784 = vmatmul.mubr.msk.bf16.gmra.mrb[56].mxu0 %vm743_vm3, %v4383_v10  ;;  %v663_v22 = vmax.f32 %v627_v15, 0.0 }
 0x129   : > { %v622_v21 = vadd.f32 %v4265_v28, %v621_v20  ;;  %v661_v2 = vmax.f32 %v619_v17, 0.0  ;;  %v1868_v28 = vsel %vm792_vm2, %v4281_v48, 0  ;;  %v4065_v48 = vmov 0.0  }
 0x12a   : > { %v664_v23 = vmax.f32 %v630_v19, 0.0  ;;  %691 = vst.msk [vmem:[#allocation2 + $0x48] sm:$0xff] %vm419_vm1, %v4065_v48  ;;  %692 = vst.msk [vmem:[#allocation2 + $0x50] sm:$0xff] %vm419_vm1, %v4065_v48 }
 0x12b   : > { %v662_v25 = vmax.f32 %v622_v21, 0.0  ;;  %681 = vst.msk [vmem:[#allocation2] sm:$0xff] %vm419_vm1, %v4065_v48  ;;  %682 = vst.msk [vmem:[#allocation2 + $0x8] sm:$0xff] %vm419_vm1, %v4065_v48 }
 0x12c   : > { %v4399_v26 = vpack.c.bf16 %v664_v23, %v663_v22  ;;  %685 = vst.msk [vmem:[#allocation2 + $0x18] sm:$0xff] %vm419_vm1, %v4065_v48  ;;  %686 = vst.msk [vmem:[#allocation2 + $0x20] sm:$0xff] %vm419_vm1, %v4065_v48 }
 0x12d   : > { %v4401_v27 = vpack.c.bf16 %v662_v25, %v661_v2  ;;  %688 = vst.msk [vmem:[#allocation2 + $0x30] sm:$0xff] %vm419_vm1, %v4065_v48  ;;  %689 = vst.msk [vmem:[#allocation2 + $0x38] sm:$0xff] %vm419_vm1, %v4065_v48 }
 0x12e   : > { %694 = vst.msk [vmem:[#allocation2 + $0x60] sm:$0xff] %vm419_vm1, %v4065_v48  ;;  %695 = vst.msk [vmem:[#allocation2 + $0x68] sm:$0xff] %vm419_vm1, %v4065_v48 }
 0x12f   : > { %3753 = vmatprep.mubr.msk.bf16.mxu1 %vm743_vm3, %v4401_v27  ;;  %3787 = vmatprep.mubr.msk.bf16.mxu0 %vm743_vm3, %v4401_v27  ;;  %697 = vst.msk [vmem:[#allocation2 + $0x78] sm:$0xff] %vm419_vm1, %v4065_v48  ;;  %698 = vst.msk [vmem:[#allocation2 + $0x80] sm:$0xff] %vm419_vm1, %v4065_v48 }
 0x130   : > { %3754 = vmatmul.mubr.msk.bf16.gmra.mrb[28].mxu1 %vm743_vm3, %v4399_v26  ;;  %3788 = vmatmul.mubr.msk.bf16.gmra.mrb[60].mxu0 %vm743_vm3, %v4399_v26  ;;  %700 = vst.msk [vmem:[#allocation2 + $0x90] sm:$0xff] %vm419_vm1, %v4065_v48  ;;  %701 = vst.msk [vmem:[#allocation2 + $0x98] sm:$0xff] %vm419_vm1, %v4065_v48 }
 0x131   : > { %3793 = vmatprep.mubr.msk.bf16.mxu1 %vm743_vm3, %v4273_v42  ;;  %3827 = vmatprep.mubr.msk.bf16.mxu0 %vm743_vm3, %v4273_v42  ;;  %703 = vst.msk [vmem:[#allocation2 + $0xa8] sm:$0xff] %vm419_vm1, %v4065_v48  ;;  %704 = vst.msk [vmem:[#allocation2 + $0xb0] sm:$0xff] %vm419_vm1, %v4065_v48  ;;  %v960_v35 = vld [vmem:[#allocation2 + $0x4a] sm:$0xff] }
 0x132   : > { %706 = vst.msk [vmem:[#allocation2 + $0xc0] sm:$0xff] %vm419_vm1, %v4065_v48  ;;  %707 = vst.msk [vmem:[#allocation2 + $0xc8] sm:$0xff] %vm419_vm1, %v4065_v48 }
 0x133   : > { %709 = vst.msk [vmem:[#allocation2 + $0xd8] sm:$0xff] %vm419_vm1, %v4065_v48  ;;  %710 = vst.msk [vmem:[#allocation2 + $0xe0] sm:$0xff] %vm419_vm1, %v4065_v48 }
 0x134   : > { %712 = vst.msk [vmem:[#allocation2 + $0xf0] sm:$0xff] %vm419_vm1, %v4065_v48  ;;  %713 = vst.msk [vmem:[#allocation2 + $0xf8] sm:$0xff] %vm419_vm1, %v4065_v48  ;;  %v958_v36 = vld [vmem:[#allocation2 + $0x32] sm:$0xff] }
 0x135   : > { %715 = vst.msk [vmem:[#allocation2 + $0x108] sm:$0xff] %vm419_vm1, %v4065_v48  ;;  %716 = vst.msk [vmem:[#allocation2 + $0x110] sm:$0xff] %vm419_vm1, %v4065_v48  ;;  %v962_v62 = vld [vmem:[#allocation2 + $0x62] sm:$0xff] }
 0x136   : > { %718 = vst.msk [vmem:[#allocation2 + $0x120] sm:$0xff] %vm419_vm1, %v4065_v48  ;;  %719 = vst.msk [vmem:[#allocation2 + $0x128] sm:$0xff] %vm419_vm1, %v4065_v48  ;;  %v964_v61 = vld [vmem:[#allocation2 + $0x7a] sm:$0xff] }
 0x137   : > { %721 = vst.msk [vmem:[#allocation2 + $0x138] sm:$0xff] %vm419_vm1, %v4065_v48  ;;  %722 = vst.msk [vmem:[#allocation2 + $0x140] sm:$0xff] %vm419_vm1, %v4065_v48 }
 0x138   : > { %3794 = vmatmul.mubr.msk.bf16.vlgmr.msra.gmra.mrb[32].mxu1 %vm743_vm3, %v4271_v41  ;;  %3828 = vmatmul.mubr.msk.bf16.vlgmr.msra.gmra.mrb[64].mxu0 %vm743_vm3, %v4271_v41  ;;  %724 = vst.msk [vmem:[#allocation2 + $0x150] sm:$0xff] %vm419_vm1, %v4065_v48  ;;  %725 = vst.msk [vmem:[#allocation2 + $0x158] sm:$0xff] %vm419_vm1, %v4065_v48 }
 0x139   : > { %3860 = vmatpush3.bf16.msra.mxu1 %v1868_v28  ;;  %3797 = vmatprep.mubr.msk.bf16.mxu1 %vm743_vm3, %v4305_v60  ;;  %727 = vst.msk [vmem:[#allocation2 + $0x168] sm:$0xff] %vm419_vm1, %v4065_v48  ;;  %728 = vst.msk [vmem:[#allocation2 + $0x170] sm:$0xff] %vm419_vm1, %v4065_v48 }
 0x13a   : > { %3831 = vmatprep.mubr.msk.bf16.mxu0 %vm743_vm3, %v4305_v60  ;;  %3894 = vmatpush3.bf16.msra.mxu0 %v2136_v29  ;;  %730 = vst.msk [vmem:[#allocation2 + $0x180] sm:$0xff] %vm419_vm1, %v4065_v48  ;;  %731 = vst.msk [vmem:[#allocation2 + $0x188] sm:$0xff] %vm419_vm1, %v4065_v48  ;;  %v968_v29 = vld [vmem:[#allocation2 + $0xaa] sm:$0xff] }
 0x13b   : > { %4036 = vmatprep.subr.msk.bf16.mxu1 %vm792_vm2, %v4422_v30  ;;  %4037 = vmatprep.subr.msk.bf16.mxu0 %vm792_vm2, %v4427_v31  ;;  %733 = vst.msk [vmem:[#allocation2 + $0x198] sm:$0xff] %vm419_vm1, %v4065_v48  ;;  %734 = vst.msk [vmem:[#allocation2 + $0x1a0] sm:$0xff] %vm419_vm1, %v4065_v48  ;;  %v966_v30 = vld [vmem:[#allocation2 + $0x92] sm:$0xff] }
 0x13c   : > { %693 = vst.msk [vmem:[#allocation2 + $0x58] sm:$0x3] %vm683_vm4, %v4065_v48  ;;  %684 = vst.msk [vmem:[#allocation2 + $0x10] sm:$0x3] %vm683_vm4, %v4065_v48 }
 0x13d   : > { %687 = vst.msk [vmem:[#allocation2 + $0x28] sm:$0x3] %vm683_vm4, %v4065_v48  ;;  %690 = vst.msk [vmem:[#allocation2 + $0x40] sm:$0x3] %vm683_vm4, %v4065_v48 }
 0x13e   : > { %696 = vst.msk [vmem:[#allocation2 + $0x70] sm:$0x3] %vm683_vm4, %v4065_v48  ;;  %699 = vst.msk [vmem:[#allocation2 + $0x88] sm:$0x3] %vm683_vm4, %v4065_v48 }
 0x13f   : > { %702 = vst.msk [vmem:[#allocation2 + $0xa0] sm:$0x3] %vm683_vm4, %v4065_v48  ;;  %705 = vst.msk [vmem:[#allocation2 + $0xb8] sm:$0x3] %vm683_vm4, %v4065_v48 }
 0x140   : > { %3798 = vmatmul.mubr.msk.bf16.gmra.mrb[36].mxu1 %vm743_vm3, %v4303_v59  ;;  %3832 = vmatmul.mubr.msk.bf16.gmra.mrb[68].mxu0 %vm743_vm3, %v4303_v59  ;;  %708 = vst.msk [vmem:[#allocation2 + $0xd0] sm:$0x3] %vm683_vm4, %v4065_v48  ;;  %711 = vst.msk [vmem:[#allocation2 + $0xe8] sm:$0x3] %vm683_vm4, %v4065_v48 }
 0x141   : > { %3801 = vmatprep.mubr.msk.bf16.mxu1 %vm743_vm3, %v4321_v12  ;;  %3835 = vmatprep.mubr.msk.bf16.mxu0 %vm743_vm3, %v4321_v12  ;;  %714 = vst.msk [vmem:[#allocation2 + $0x100] sm:$0x3] %vm683_vm4, %v4065_v48  ;;  %717 = vst.msk [vmem:[#allocation2 + $0x118] sm:$0x3] %vm683_vm4, %v4065_v48 }
 0x142   : > { %720 = vst.msk [vmem:[#allocation2 + $0x130] sm:$0x3] %vm683_vm4, %v4065_v48  ;;  %723 = vst.msk [vmem:[#allocation2 + $0x148] sm:$0x3] %vm683_vm4, %v4065_v48 }
 0x143   : > { %726 = vst.msk [vmem:[#allocation2 + $0x160] sm:$0x3] %vm683_vm4, %v4065_v48  ;;  %729 = vst.msk [vmem:[#allocation2 + $0x178] sm:$0x3] %vm683_vm4, %v4065_v48  ;;  %v961_v43 = vld [vmem:[#allocation2 + $0x52] sm:$0xff] }
 0x144   : > { %732 = vst.msk [vmem:[#allocation2 + $0x190] sm:$0x3] %vm683_vm4, %v4065_v48  ;;  %735 = vst.msk [vmem:[#allocation2 + $0x1a8] sm:$0x3] %vm683_vm4, %v4065_v48  ;;  %v959_v47 = vld [vmem:[#allocation2 + $0x3a] sm:$0xff] }
 0x145   : > { %v965_v1 = vld [vmem:[#allocation2 + $0x82] sm:$0xff]  ;;  %v963_v7 = vld [vmem:[#allocation2 + $0x6a] sm:$0xff] }
 0x148   : > { %3802 = vmatmul.mubr.msk.bf16.gmra.mrb[40].mxu1 %vm743_vm3, %v4319_v11  ;;  %3836 = vmatmul.mubr.msk.bf16.gmra.mrb[72].mxu0 %vm743_vm3, %v4319_v11 }
 0x149   : > { %3805 = vmatprep.mubr.msk.bf16.mxu1 %vm743_vm3, %v4337_v3  ;;  %3839 = vmatprep.mubr.msk.bf16.mxu0 %vm743_vm3, %v4337_v3 }
 0x150   : > { %3806 = vmatmul.mubr.msk.bf16.gmra.mrb[44].mxu1 %vm743_vm3, %v4335_v24  ;;  %3840 = vmatmul.mubr.msk.bf16.gmra.mrb[76].mxu0 %vm743_vm3, %v4335_v24 }
 0x151   : > { %3809 = vmatprep.mubr.msk.bf16.mxu1 %vm743_vm3, %v4353_v39  ;;  %3843 = vmatprep.mubr.msk.bf16.mxu0 %vm743_vm3, %v4353_v39 }
 0x158   : > { %3810 = vmatmul.mubr.msk.bf16.gmra.mrb[48].mxu1 %vm743_vm3, %v4351_v38  ;;  %3844 = vmatmul.mubr.msk.bf16.gmra.mrb[80].mxu0 %vm743_vm3, %v4351_v38 }
 0x159   : > { %3813 = vmatprep.mubr.msk.bf16.mxu1 %vm743_vm3, %v4369_v57  ;;  %3847 = vmatprep.mubr.msk.bf16.mxu0 %vm743_vm3, %v4369_v57 }
 0x160   : > { %3814 = vmatmul.mubr.msk.bf16.gmra.mrb[52].mxu1 %vm743_vm3, %v4367_v56  ;;  %3848 = vmatmul.mubr.msk.bf16.gmra.mrb[84].mxu0 %vm743_vm3, %v4367_v56 }
 0x161   : > { %3817 = vmatprep.mubr.msk.bf16.mxu1 %vm743_vm3, %v4385_v13  ;;  %3851 = vmatprep.mubr.msk.bf16.mxu0 %vm743_vm3, %v4385_v13 }
 0x168   : > { %3818 = vmatmul.mubr.msk.bf16.gmra.mrb[56].mxu1 %vm743_vm3, %v4383_v10  ;;  %3852 = vmatmul.mubr.msk.bf16.gmra.mrb[88].mxu0 %vm743_vm3, %v4383_v10 }
 0x169   : > { %3821 = vmatprep.mubr.msk.bf16.mxu1 %vm743_vm3, %v4401_v27  ;;  %3855 = vmatprep.mubr.msk.bf16.mxu0 %vm743_vm3, %v4401_v27 }
 0x170   : > { %3822 = vmatmul.mubr.msk.bf16.gmra.mrb[60].mxu1 %vm743_vm3, %v4399_v26  ;;  %3856 = vmatmul.mubr.msk.bf16.gmra.mrb[92].mxu0 %vm743_vm3, %v4399_v26 }
 0x171   : > { %3861 = vmatprep.mubr.msk.bf16.mxu1 %vm743_vm3, %v4273_v42  ;;  %3895 = vmatprep.mubr.msk.bf16.mxu0 %vm743_vm3, %v4273_v42 }
 0x178   : > { %3862 = vmatmul.mubr.msk.bf16.vlgmr.msra.gmra.mrb[64].mxu1 %vm743_vm3, %v4271_v41  ;;  %3896 = vmatmul.mubr.msk.bf16.vlgmr.msra.gmra.mrb[96].mxu0 %vm743_vm3, %v4271_v41 }
 0x179   : > { %3928 = vmatpush3.bf16.msra.mxu1 %v2404_v49  ;;  %3865 = vmatprep.mubr.msk.bf16.mxu1 %vm743_vm3, %v4305_v60  ;;  %v969_v49 = vld [vmem:[#allocation2 + $0xb2] sm:$0xff] }
 0x17a   : > { %3899 = vmatprep.mubr.msk.bf16.mxu0 %vm743_vm3, %v4305_v60  ;;  %3962 = vmatpush3.bf16.msra.mxu0 %v2672_v32 }
 0x17b   : > { %4038 = vmatprep.subr.msk.bf16.mxu1 %vm792_vm2, %v4056_v33 }
 0x180   : > { %3866 = vmatmul.mubr.msk.bf16.gmra.mrb[68].mxu1 %vm743_vm3, %v4303_v59  ;;  %3900 = vmatmul.mubr.msk.bf16.gmra.mrb[100].mxu0 %vm743_vm3, %v4303_v59 }
 0x181   : > { %3869 = vmatprep.mubr.msk.bf16.mxu1 %vm743_vm3, %v4321_v12  ;;  %3903 = vmatprep.mubr.msk.bf16.mxu0 %vm743_vm3, %v4321_v12 }
 0x188   : > { %3870 = vmatmul.mubr.msk.bf16.gmra.mrb[72].mxu1 %vm743_vm3, %v4319_v11  ;;  %3904 = vmatmul.mubr.msk.bf16.gmra.mrb[104].mxu0 %vm743_vm3, %v4319_v11 }
 0x189   : > { %3873 = vmatprep.mubr.msk.bf16.mxu1 %vm743_vm3, %v4337_v3  ;;  %3907 = vmatprep.mubr.msk.bf16.mxu0 %vm743_vm3, %v4337_v3 }
 0x190   : > { %3874 = vmatmul.mubr.msk.bf16.gmra.mrb[76].mxu1 %vm743_vm3, %v4335_v24  ;;  %3908 = vmatmul.mubr.msk.bf16.gmra.mrb[108].mxu0 %vm743_vm3, %v4335_v24 }
 0x191   : > { %3877 = vmatprep.mubr.msk.bf16.mxu1 %vm743_vm3, %v4353_v39  ;;  %3911 = vmatprep.mubr.msk.bf16.mxu0 %vm743_vm3, %v4353_v39 }
 0x198   : > { %3878 = vmatmul.mubr.msk.bf16.gmra.mrb[80].mxu1 %vm743_vm3, %v4351_v38  ;;  %3912 = vmatmul.mubr.msk.bf16.gmra.mrb[112].mxu0 %vm743_vm3, %v4351_v38 }
 0x199   : > { %3881 = vmatprep.mubr.msk.bf16.mxu1 %vm743_vm3, %v4369_v57  ;;  %3915 = vmatprep.mubr.msk.bf16.mxu0 %vm743_vm3, %v4369_v57 }
 0x1a0   : > { %3882 = vmatmul.mubr.msk.bf16.gmra.mrb[84].mxu1 %vm743_vm3, %v4367_v56  ;;  %3916 = vmatmul.mubr.msk.bf16.gmra.mrb[116].mxu0 %vm743_vm3, %v4367_v56 }
 0x1a1   : > { %3885 = vmatprep.mubr.msk.bf16.mxu1 %vm743_vm3, %v4385_v13  ;;  %3919 = vmatprep.mubr.msk.bf16.mxu0 %vm743_vm3, %v4385_v13 }
 0x1a8   : > { %3886 = vmatmul.mubr.msk.bf16.gmra.mrb[88].mxu1 %vm743_vm3, %v4383_v10  ;;  %3920 = vmatmul.mubr.msk.bf16.gmra.mrb[120].mxu0 %vm743_vm3, %v4383_v10 }
 0x1a9   : > { %3889 = vmatprep.mubr.msk.bf16.mxu1 %vm743_vm3, %v4401_v27  ;;  %3923 = vmatprep.mubr.msk.bf16.mxu0 %vm743_vm3, %v4401_v27 }
 0x1b0   : > { %3890 = vmatmul.mubr.msk.bf16.gmra.mrb[92].mxu1 %vm743_vm3, %v4399_v26  ;;  %3924 = vmatmul.mubr.msk.bf16.gmra.mrb[124].mxu0 %vm743_vm3, %v4399_v26 }
 0x1b1   : > { %3929 = vmatprep.mubr.msk.bf16.mxu1 %vm743_vm3, %v4273_v42  ;;  %3963 = vmatprep.mubr.msk.bf16.mxu0 %vm743_vm3, %v4273_v42 }
 0x1b8   : > { %3930 = vmatmul.mubr.msk.bf16.vlgmr.msra.gmra.mrb[96].mxu1 %vm743_vm3, %v4271_v41  ;;  %3964 = vmatmul.mubr.msk.bf16.vlgmr.msra.gmra.mrb[128].mxu0 %vm743_vm3, %v4271_v41 }
 0x1b9   : > { %3996 = vmatpush3.bf16.msra.mxu1 %v2940_v34  ;;  %3933 = vmatprep.mubr.msk.bf16.mxu1 %vm743_vm3, %v4305_v60 }
 0x1ba   : > { %3967 = vmatprep.mubr.msk.bf16.mxu0 %vm743_vm3, %v4305_v60 }
 0x1c0   : > { %3934 = vmatmul.mubr.msk.bf16.gmra.mrb[100].mxu1 %vm743_vm3, %v4303_v59  ;;  %3968 = vmatmul.mubr.msk.bf16.gmra.mrb[132].mxu0 %vm743_vm3, %v4303_v59 }
 0x1c1   : > { %3937 = vmatprep.mubr.msk.bf16.mxu1 %vm743_vm3, %v4321_v12  ;;  %3971 = vmatprep.mubr.msk.bf16.mxu0 %vm743_vm3, %v4321_v12 }
 0x1c8   : > { %3938 = vmatmul.mubr.msk.bf16.gmra.mrb[104].mxu1 %vm743_vm3, %v4319_v11  ;;  %3972 = vmatmul.mubr.msk.bf16.gmra.mrb[136].mxu0 %vm743_vm3, %v4319_v11 }
 0x1c9   : > { %3941 = vmatprep.mubr.msk.bf16.mxu1 %vm743_vm3, %v4337_v3  ;;  %3975 = vmatprep.mubr.msk.bf16.mxu0 %vm743_vm3, %v4337_v3 }
 0x1cb   : > { %v3727_v37 = vpop.f32.mrb[0].mxu1  ;;  %v3761_v40 = vpop.f32.mrb[32].mxu0 }
 0x1cc   : > { %v992_v44 = vadd.f32 %v3727_v37, %v960_v35  ;;  %v830_v45 = vpop.f32.mrb[1].mxu1  ;;  %v1099_v46 = vpop.f32.mrb[33].mxu0  ;;  %v967_v35 = vld [vmem:[#allocation2 + $0x9a] sm:$0xff] }
 0x1cd   : > { %v990_v50 = vadd.f32 %v958_v36, %v830_v45  ;;  %v3728_v51 = vpop.f32.mrb[2].mxu1  ;;  %v3762_v52 = vpop.f32.mrb[34].mxu0 }
 0x1ce   : > { %1024 = vst.msk [vmem:[#allocation2 + $0x4a] sm:$0xff] %vm419_vm1, %v992_v44  ;;  %v993_v53 = vadd.f32 %v3728_v51, %v961_v43  ;;  %v833_v54 = vpop.f32.mrb[3].mxu1  ;;  %v1102_v55 = vpop.f32.mrb[35].mxu0 }
 0x1cf   : > { %1022 = vst.msk [vmem:[#allocation2 + $0x32] sm:$0xff] %vm419_vm1, %v990_v50  ;;  %v991_v58 = vadd.f32 %v959_v47, %v833_v54 }
 0x1d0   : > { %1025 = vst.msk [vmem:[#allocation2 + $0x52] sm:$0xff] %vm419_vm1, %v993_v53  ;;  %3942 = vmatmul.mubr.msk.bf16.gmra.mrb[108].mxu1 %vm743_vm3, %v4335_v24  ;;  %3976 = vmatmul.mubr.msk.bf16.gmra.mrb[140].mxu0 %vm743_vm3, %v4335_v24 }
 0x1d1   : > { %1023 = vst.msk [vmem:[#allocation2 + $0x3a] sm:$0xff] %vm419_vm1, %v991_v58  ;;  %3945 = vmatprep.mubr.msk.bf16.mxu1 %vm743_vm3, %v4353_v39  ;;  %3979 = vmatprep.mubr.msk.bf16.mxu0 %vm743_vm3, %v4353_v39 }
 0x1d3   : > { %v3731_v63 = vpop.f32.mrb[4].mxu1  ;;  %v3765_v0 = vpop.f32.mrb[36].mxu0 }
 0x1d4   : > { %v996_v4 = vadd.f32 %v3731_v63, %v964_v61  ;;  %v846_v5 = vpop.f32.mrb[5].mxu1  ;;  %v1115_v6 = vpop.f32.mrb[37].mxu0  ;;  %v972_v61 = vld [vmem:[#allocation2 + $0xda] sm:$0xff] }
 0x1d5   : > { %v1228_v8 = vld [vmem:[#allocation2 + $0x49] sm:$0xff]  ;;  %v994_v9 = vadd.f32 %v962_v62, %v846_v5  ;;  %v3732_v14 = vpop.f32.mrb[6].mxu1  ;;  %v3766_v15 = vpop.f32.mrb[38].mxu0 }
 0x1d6   : > { %v1260_v16 = vadd.f32 %v3761_v40, %v1228_v8  ;;  %v1226_v17 = vld [vmem:[#allocation2 + $0x31] sm:$0xff]  ;;  %1028 = vst.msk [vmem:[#allocation2 + $0x7a] sm:$0xff] %vm419_vm1, %v996_v4  ;;  %v997_v18 = vadd.f32 %v3732_v14, %v965_v1  ;;  %v849_v19 = vpop.f32.mrb[7].mxu1  ;;  %v1118_v20 = vpop.f32.mrb[39].mxu0  ;;  %v970_v62 = vld [vmem:[#allocation2 + $0xc2] sm:$0xff] }
 0x1d7   : > { %v1258_v21 = vadd.f32 %v1226_v17, %v1099_v46  ;;  %v1229_v22 = vld [vmem:[#allocation2 + $0x51] sm:$0xff]  ;;  %1026 = vst.msk [vmem:[#allocation2 + $0x62] sm:$0xff] %vm419_vm1, %v994_v9  ;;  %v995_v23 = vadd.f32 %v963_v7, %v849_v19  ;;  %v973_v1 = vld [vmem:[#allocation2 + $0xe2] sm:$0xff] }
 0x1d8   : > { %1292 = vst.msk [vmem:[#allocation2 + $0x49] sm:$0xff] %vm419_vm1, %v1260_v16  ;;  %v1261_v2 = vadd.f32 %v3762_v52, %v1229_v22  ;;  %v1227_v25 = vld [vmem:[#allocation2 + $0x39] sm:$0xff]  ;;  %1029 = vst.msk [vmem:[#allocation2 + $0x82] sm:$0xff] %vm419_vm1, %v997_v18  ;;  %3946 = vmatmul.mubr.msk.bf16.gmra.mrb[112].mxu1 %vm743_vm3, %v4351_v38  ;;  %3980 = vmatmul.mubr.msk.bf16.gmra.mrb[144].mxu0 %vm743_vm3, %v4351_v38  ;;  %v971_v7 = vld [vmem:[#allocation2 + $0xca] sm:$0xff] }
 0x1d9   : > { %1290 = vst.msk [vmem:[#allocation2 + $0x31] sm:$0xff] %vm419_vm1, %v1258_v21  ;;  %v1259_v28 = vadd.f32 %v1227_v25, %v1102_v55  ;;  %1027 = vst.msk [vmem:[#allocation2 + $0x6a] sm:$0xff] %vm419_vm1, %v995_v23  ;;  %3949 = vmatprep.mubr.msk.bf16.mxu1 %vm743_vm3, %v4369_v57  ;;  %3983 = vmatprep.mubr.msk.bf16.mxu0 %vm743_vm3, %v4369_v57 }
 0x1da   : > { %1293 = vst.msk [vmem:[#allocation2 + $0x51] sm:$0xff] %vm419_vm1, %v1261_v2 }
 0x1db   : > { %1291 = vst.msk [vmem:[#allocation2 + $0x39] sm:$0xff] %vm419_vm1, %v1259_v28  ;;  %v3735_v31 = vpop.f32.mrb[8].mxu1  ;;  %v3769_v48 = vpop.f32.mrb[40].mxu0 }
 0x1dc   : > { %v1000_v32 = vadd.f32 %v3735_v31, %v968_v29  ;;  %v862_v33 = vpop.f32.mrb[9].mxu1  ;;  %v1131_v34 = vpop.f32.mrb[41].mxu0  ;;  %v976_v29 = vld [vmem:[#allocation2 + $0x10a] sm:$0xff] }
 0x1dd   : > { %v1232_v36 = vld [vmem:[#allocation2 + $0x79] sm:$0xff]  ;;  %v998_v37 = vadd.f32 %v966_v30, %v862_v33  ;;  %v3736_v40 = vpop.f32.mrb[10].mxu1  ;;  %v3770_v43 = vpop.f32.mrb[42].mxu0 }
 0x1de   : > { %v1264_v44 = vadd.f32 %v3765_v0, %v1232_v36  ;;  %v1230_v45 = vld [vmem:[#allocation2 + $0x61] sm:$0xff]  ;;  %1032 = vst.msk [vmem:[#allocation2 + $0xaa] sm:$0xff] %vm419_vm1, %v1000_v32  ;;  %v1001_v46 = vadd.f32 %v3736_v40, %v969_v49  ;;  %v865_v47 = vpop.f32.mrb[11].mxu1  ;;  %v1134_v50 = vpop.f32.mrb[43].mxu0  ;;  %v974_v30 = vld [vmem:[#allocation2 + $0xf2] sm:$0xff] }
 0x1df   : > { %v1262_v51 = vadd.f32 %v1230_v45, %v1115_v6  ;;  %v1233_v52 = vld [vmem:[#allocation2 + $0x81] sm:$0xff]  ;;  %1030 = vst.msk [vmem:[#allocation2 + $0x92] sm:$0xff] %vm419_vm1, %v998_v37  ;;  %v999_v53 = vadd.f32 %v967_v35, %v865_v47  ;;  %v977_v49 = vld [vmem:[#allocation2 + $0x112] sm:$0xff] }
 0x1e0   : > { %1296 = vst.msk [vmem:[#allocation2 + $0x79] sm:$0xff] %vm419_vm1, %v1264_v44  ;;  %v1265_v54 = vadd.f32 %v3766_v15, %v1233_v52  ;;  %v1231_v55 = vld [vmem:[#allocation2 + $0x69] sm:$0xff]  ;;  %1033 = vst.msk [vmem:[#allocation2 + $0xb2] sm:$0xff] %vm419_vm1, %v1001_v46  ;;  %3950 = vmatmul.mubr.msk.bf16.gmra.mrb[116].mxu1 %vm743_vm3, %v4367_v56  ;;  %3984 = vmatmul.mubr.msk.bf16.gmra.mrb[148].mxu0 %vm743_vm3, %v4367_v56  ;;  %v975_v35 = vld [vmem:[#allocation2 + $0xfa] sm:$0xff] }
 0x1e1   : > { %1294 = vst.msk [vmem:[#allocation2 + $0x61] sm:$0xff] %vm419_vm1, %v1262_v51  ;;  %v1263_v58 = vadd.f32 %v1231_v55, %v1118_v20  ;;  %1031 = vst.msk [vmem:[#allocation2 + $0x9a] sm:$0xff] %vm419_vm1, %v999_v53  ;;  %3953 = vmatprep.mubr.msk.bf16.mxu1 %vm743_vm3, %v4385_v13  ;;  %3987 = vmatprep.mubr.msk.bf16.mxu0 %vm743_vm3, %v4385_v13 }
 0x1e2   : > { %1297 = vst.msk [vmem:[#allocation2 + $0x81] sm:$0xff] %vm419_vm1, %v1265_v54 }
 0x1e3   : > { %1295 = vst.msk [vmem:[#allocation2 + $0x69] sm:$0xff] %vm419_vm1, %v1263_v58  ;;  %v3739_v63 = vpop.f32.mrb[12].mxu1  ;;  %v3773_v0 = vpop.f32.mrb[44].mxu0 }
 0x1e4   : > { %v1004_v4 = vadd.f32 %v3739_v63, %v972_v61  ;;  %v878_v5 = vpop.f32.mrb[13].mxu1  ;;  %v1147_v6 = vpop.f32.mrb[45].mxu0  ;;  %v980_v61 = vld [vmem:[#allocation2 + $0x13a] sm:$0xff] }
 0x1e5   : > { %v1236_v8 = vld [vmem:[#allocation2 + $0xa9] sm:$0xff]  ;;  %v1002_v9 = vadd.f32 %v970_v62, %v878_v5  ;;  %v3740_v14 = vpop.f32.mrb[14].mxu1  ;;  %v3774_v15 = vpop.f32.mrb[46].mxu0 }
 0x1e6   : > { %v1268_v16 = vadd.f32 %v3769_v48, %v1236_v8  ;;  %v1234_v17 = vld [vmem:[#allocation2 + $0x91] sm:$0xff]  ;;  %1036 = vst.msk [vmem:[#allocation2 + $0xda] sm:$0xff] %vm419_vm1, %v1004_v4  ;;  %v1005_v18 = vadd.f32 %v3740_v14, %v973_v1  ;;  %v881_v19 = vpop.f32.mrb[15].mxu1  ;;  %v1150_v20 = vpop.f32.mrb[47].mxu0  ;;  %v978_v62 = vld [vmem:[#allocation2 + $0x122] sm:$0xff] }
 0x1e7   : > { %v1266_v21 = vadd.f32 %v1234_v17, %v1131_v34  ;;  %v1237_v22 = vld [vmem:[#allocation2 + $0xb1] sm:$0xff]  ;;  %1034 = vst.msk [vmem:[#allocation2 + $0xc2] sm:$0xff] %vm419_vm1, %v1002_v9  ;;  %v1003_v23 = vadd.f32 %v971_v7, %v881_v19  ;;  %v981_v1 = vld [vmem:[#allocation2 + $0x142] sm:$0xff] }
 0x1e8   : > { %1300 = vst.msk [vmem:[#allocation2 + $0xa9] sm:$0xff] %vm419_vm1, %v1268_v16  ;;  %v1269_v2 = vadd.f32 %v3770_v43, %v1237_v22  ;;  %v1235_v25 = vld [vmem:[#allocation2 + $0x99] sm:$0xff]  ;;  %1037 = vst.msk [vmem:[#allocation2 + $0xe2] sm:$0xff] %vm419_vm1, %v1005_v18  ;;  %3954 = vmatmul.mubr.msk.bf16.gmra.mrb[120].mxu1 %vm743_vm3, %v4383_v10  ;;  %3988 = vmatmul.mubr.msk.bf16.gmra.mrb[152].mxu0 %vm743_vm3, %v4383_v10  ;;  %v979_v7 = vld [vmem:[#allocation2 + $0x12a] sm:$0xff] }
 0x1e9   : > { %1298 = vst.msk [vmem:[#allocation2 + $0x91] sm:$0xff] %vm419_vm1, %v1266_v21  ;;  %v1267_v28 = vadd.f32 %v1235_v25, %v1134_v50  ;;  %1035 = vst.msk [vmem:[#allocation2 + $0xca] sm:$0xff] %vm419_vm1, %v1003_v23  ;;  %3957 = vmatprep.mubr.msk.bf16.mxu1 %vm743_vm3, %v4401_v27  ;;  %3991 = vmatprep.mubr.msk.bf16.mxu0 %vm743_vm3, %v4401_v27 }
 0x1ea   : > { %1301 = vst.msk [vmem:[#allocation2 + $0xb1] sm:$0xff] %vm419_vm1, %v1269_v2 }
 0x1eb   : > { %1299 = vst.msk [vmem:[#allocation2 + $0x99] sm:$0xff] %vm419_vm1, %v1267_v28  ;;  %v3743_v31 = vpop.f32.mrb[16].mxu1  ;;  %v3777_v48 = vpop.f32.mrb[48].mxu0  ;;  %v984_v28 = vld [vmem:[#allocation2 + $0x16a] sm:$0xff] }
 0x1ec   : > { %v1008_v32 = vadd.f32 %v3743_v31, %v976_v29  ;;  %v894_v33 = vpop.f32.mrb[17].mxu1  ;;  %v1163_v34 = vpop.f32.mrb[49].mxu0  ;;  %v982_v29 = vld [vmem:[#allocation2 + $0x152] sm:$0xff] }
 0x1ed   : > { %v1240_v36 = vld [vmem:[#allocation2 + $0xd9] sm:$0xff]  ;;  %v1006_v37 = vadd.f32 %v974_v30, %v894_v33  ;;  %v3744_v40 = vpop.f32.mrb[18].mxu1  ;;  %v3778_v43 = vpop.f32.mrb[50].mxu0 }
 0x1ee   : > { %v1272_v44 = vadd.f32 %v3773_v0, %v1240_v36  ;;  %v1238_v45 = vld [vmem:[#allocation2 + $0xc1] sm:$0xff]  ;;  %1040 = vst.msk [vmem:[#allocation2 + $0x10a] sm:$0xff] %vm419_vm1, %v1008_v32  ;;  %v1009_v46 = vadd.f32 %v3744_v40, %v977_v49  ;;  %v897_v47 = vpop.f32.mrb[19].mxu1  ;;  %v1166_v50 = vpop.f32.mrb[51].mxu0 }
 0x1ef   : > { %v1270_v51 = vadd.f32 %v1238_v45, %v1147_v6  ;;  %v1241_v52 = vld [vmem:[#allocation2 + $0xe1] sm:$0xff]  ;;  %1038 = vst.msk [vmem:[#allocation2 + $0xf2] sm:$0xff] %vm419_vm1, %v1006_v37  ;;  %v1007_v53 = vadd.f32 %v975_v35, %v897_v47 }
 0x1f0   : > { %1304 = vst.msk [vmem:[#allocation2 + $0xd9] sm:$0xff] %vm419_vm1, %v1272_v44  ;;  %v1273_v54 = vadd.f32 %v3774_v15, %v1241_v52  ;;  %v1239_v55 = vld [vmem:[#allocation2 + $0xc9] sm:$0xff]  ;;  %1041 = vst.msk [vmem:[#allocation2 + $0x112] sm:$0xff] %vm419_vm1, %v1009_v46  ;;  %3958 = vmatmul.mubr.msk.bf16.gmra.mrb[124].mxu1 %vm743_vm3, %v4399_v26  ;;  %3992 = vmatmul.mubr.msk.bf16.gmra.mrb[156].mxu0 %vm743_vm3, %v4399_v26  ;;  %v983_v33 = vld [vmem:[#allocation2 + $0x15a] sm:$0xff] }
 0x1f1   : > { %1302 = vst.msk [vmem:[#allocation2 + $0xc1] sm:$0xff] %vm419_vm1, %v1270_v51  ;;  %v1271_v58 = vadd.f32 %v1239_v55, %v1150_v20  ;;  %1039 = vst.msk [vmem:[#allocation2 + $0xfa] sm:$0xff] %vm419_vm1, %v1007_v53  ;;  %3997 = vmatprep.mubr.msk.bf16.mxu1 %vm743_vm3, %v4273_v42  ;;  %v986_v55 = vld [vmem:[#allocation2 + $0x182] sm:$0xff] }
 0x1f2   : > { %1305 = vst.msk [vmem:[#allocation2 + $0xe1] sm:$0xff] %vm419_vm1, %v1273_v54  ;;  %v988_v54 = vld [vmem:[#allocation2 + $0x19a] sm:$0xff] }
 0x1f3   : > { %1303 = vst.msk [vmem:[#allocation2 + $0xc9] sm:$0xff] %vm419_vm1, %v1271_v58  ;;  %v3747_v63 = vpop.f32.mrb[20].mxu1  ;;  %v3781_v0 = vpop.f32.mrb[52].mxu0 }
 0x1f4   : > { %v1012_v4 = vadd.f32 %v3747_v63, %v980_v61  ;;  %v910_v5 = vpop.f32.mrb[21].mxu1  ;;  %v1179_v6 = vpop.f32.mrb[53].mxu0 }
 0x1f5   : > { %v1244_v8 = vld [vmem:[#allocation2 + $0x109] sm:$0xff]  ;;  %v1010_v9 = vadd.f32 %v978_v62, %v910_v5  ;;  %v3748_v14 = vpop.f32.mrb[22].mxu1  ;;  %v3782_v15 = vpop.f32.mrb[54].mxu0 }
 0x1f6   : > { %v1276_v16 = vadd.f32 %v3777_v48, %v1244_v8  ;;  %v1242_v17 = vld [vmem:[#allocation2 + $0xf1] sm:$0xff]  ;;  %1044 = vst.msk [vmem:[#allocation2 + $0x13a] sm:$0xff] %vm419_vm1, %v1012_v4  ;;  %v1013_v42 = vadd.f32 %v3748_v14, %v981_v1  ;;  %v913_v18 = vpop.f32.mrb[23].mxu1  ;;  %v1182_v19 = vpop.f32.mrb[55].mxu0  ;;  %v989_v62 = vld [vmem:[#allocation2 + $0x1a2] sm:$0xff] }
 0x1f7   : > { %v1274_v20 = vadd.f32 %v1242_v17, %v1163_v34  ;;  %v1245_v21 = vld [vmem:[#allocation2 + $0x111] sm:$0xff]  ;;  %1042 = vst.msk [vmem:[#allocation2 + $0x122] sm:$0xff] %vm419_vm1, %v1010_v9  ;;  %v1011_v22 = vadd.f32 %v979_v7, %v913_v18 }
 0x1f8   : > { %1308 = vst.msk [vmem:[#allocation2 + $0x109] sm:$0xff] %vm419_vm1, %v1276_v16  ;;  %v1277_v23 = vadd.f32 %v3778_v43, %v1245_v21  ;;  %v1243_v2 = vld [vmem:[#allocation2 + $0xf9] sm:$0xff]  ;;  %1045 = vst.msk [vmem:[#allocation2 + $0x142] sm:$0xff] %vm419_vm1, %v1013_v42  ;;  %3998 = vmatmul.mubr.msk.bf16.vlgmr.msra.gmra.mrb[128].mxu1 %vm743_vm3, %v4271_v41  ;;  %v987_v1 = vld [vmem:[#allocation2 + $0x18a] sm:$0xff] }
 0x1f9   : > { %1306 = vst.msk [vmem:[#allocation2 + $0xf1] sm:$0xff] %vm419_vm1, %v1274_v20  ;;  %v1275_v25 = vadd.f32 %v1243_v2, %v1166_v50  ;;  %1043 = vst.msk [vmem:[#allocation2 + $0x12a] sm:$0xff] %vm419_vm1, %v1011_v22  ;;  %4001 = vmatprep.mubr.msk.bf16.mxu1 %vm743_vm3, %v4305_v60  ;;  %v985_v48 = vld [vmem:[#allocation2 + $0x172] sm:$0xff]  ;;  %v1763_v21 = vld [vmem:[#allocation2 + $0x1a] sm:$0xff] }
 0x1fa   : > { %1309 = vst.msk [vmem:[#allocation2 + $0x111] sm:$0xff] %vm419_vm1, %v1277_v23  ;;  %v1496_v23 = vld [vmem:[#allocation2 + $0x48] sm:$0xff] }
 0x1fb   : > { %1307 = vst.msk [vmem:[#allocation2 + $0xf9] sm:$0xff] %vm419_vm1, %v1275_v25  ;;  %v3751_v30 = vpop.f32.mrb[24].mxu1  ;;  %v3785_v31 = vpop.f32.mrb[56].mxu0 }
 0x1fc   : > { %v1016_v49 = vadd.f32 %v3751_v30, %v984_v28  ;;  %v926_v32 = vpop.f32.mrb[25].mxu1  ;;  %v1195_v41 = vpop.f32.mrb[57].mxu0  ;;  %v1764_v30 = vld [vmem:[#allocation2 + $0x22] sm:$0xff] }
 0x1fd   : > { %v1248_v34 = vld [vmem:[#allocation2 + $0x139] sm:$0xff]  ;;  %v1014_v35 = vadd.f32 %v982_v29, %v926_v32  ;;  %v3752_v36 = vpop.f32.mrb[26].mxu1  ;;  %v3786_v37 = vpop.f32.mrb[58].mxu0 }
 0x1fe   : > { %v1280_v40 = vadd.f32 %v3781_v0, %v1248_v34  ;;  %v1246_v43 = vld [vmem:[#allocation2 + $0x121] sm:$0xff]  ;;  %1048 = vst.msk [vmem:[#allocation2 + $0x16a] sm:$0xff] %vm419_vm1, %v1016_v49  ;;  %v1017_v60 = vadd.f32 %v3752_v36, %v985_v48  ;;  %v929_v44 = vpop.f32.mrb[27].mxu1  ;;  %v1198_v45 = vpop.f32.mrb[59].mxu0 }
 0x1ff   : > { %v1278_v46 = vadd.f32 %v1246_v43, %v1179_v6  ;;  %v1249_v47 = vld [vmem:[#allocation2 + $0x141] sm:$0xff]  ;;  %1046 = vst.msk [vmem:[#allocation2 + $0x152] sm:$0xff] %vm419_vm1, %v1014_v35  ;;  %v1015_v50 = vadd.f32 %v983_v33, %v929_v44 }
 0x200   : > { %1312 = vst.msk [vmem:[#allocation2 + $0x139] sm:$0xff] %vm419_vm1, %v1280_v40  ;;  %v1281_v51 = vadd.f32 %v3782_v15, %v1249_v47  ;;  %v1247_v52 = vld [vmem:[#allocation2 + $0x129] sm:$0xff]  ;;  %1049 = vst.msk [vmem:[#allocation2 + $0x172] sm:$0xff] %vm419_vm1, %v1017_v60  ;;  %4002 = vmatmul.mubr.msk.bf16.gmra.mrb[132].mxu1 %vm743_vm3, %v4303_v59 }
 0x201   : > { %1310 = vst.msk [vmem:[#allocation2 + $0x121] sm:$0xff] %vm419_vm1, %v1278_v46  ;;  %v1279_v53 = vadd.f32 %v1247_v52, %v1182_v19  ;;  %1047 = vst.msk [vmem:[#allocation2 + $0x15a] sm:$0xff] %vm419_vm1, %v1015_v50  ;;  %4005 = vmatprep.mubr.msk.bf16.mxu1 %vm743_vm3, %v4321_v12  ;;  %v1500_v52 = vld [vmem:[#allocation2 + $0x78] sm:$0xff] }
 0x202   : > { %1313 = vst.msk [vmem:[#allocation2 + $0x141] sm:$0xff] %vm419_vm1, %v1281_v51 }
 0x203   : > { %1311 = vst.msk [vmem:[#allocation2 + $0x129] sm:$0xff] %vm419_vm1, %v1279_v53  ;;  %v3755_v58 = vpop.f32.mrb[28].mxu1  ;;  %v3789_v61 = vpop.f32.mrb[60].mxu0 }
 0x204   : > { %v1020_v63 = vadd.f32 %v3755_v58, %v988_v54  ;;  %v942_v0 = vpop.f32.mrb[29].mxu1  ;;  %v1211_v59 = vpop.f32.mrb[61].mxu0 }
 0x205   : > { %v1252_v4 = vld [vmem:[#allocation2 + $0x169] sm:$0xff]  ;;  %v1018_v5 = vadd.f32 %v986_v55, %v942_v0  ;;  %v3756_v6 = vpop.f32.mrb[30].mxu1  ;;  %v3790_v7 = vpop.f32.mrb[62].mxu0 }
 0x206   : > { %v1284_v8 = vadd.f32 %v3785_v31, %v1252_v4  ;;  %v1250_v9 = vld [vmem:[#allocation2 + $0x151] sm:$0xff]  ;;  %1052 = vst.msk [vmem:[#allocation2 + $0x19a] sm:$0xff] %vm419_vm1, %v1020_v63  ;;  %v1021_v12 = vadd.f32 %v3756_v6, %v989_v62  ;;  %v945_v14 = vpop.f32.mrb[31].mxu1  ;;  %v1214_v15 = vpop.f32.mrb[63].mxu0  ;;  %v1501_v63 = vld [vmem:[#allocation2 + $0x80] sm:$0xff] }
 0x207   : > { %v1282_v16 = vadd.f32 %v1250_v9, %v1195_v41  ;;  %v1253_v17 = vld [vmem:[#allocation2 + $0x171] sm:$0xff]  ;;  %1050 = vst.msk [vmem:[#allocation2 + $0x182] sm:$0xff] %vm419_vm1, %v1018_v5  ;;  %v1019_v42 = vadd.f32 %v987_v1, %v945_v14 }
 0x208   : > { %1316 = vst.msk [vmem:[#allocation2 + $0x169] sm:$0xff] %vm419_vm1, %v1284_v8  ;;  %v1285_v18 = vadd.f32 %v3786_v37, %v1253_v17  ;;  %v1251_v19 = vld [vmem:[#allocation2 + $0x159] sm:$0xff]  ;;  %1053 = vst.msk [vmem:[#allocation2 + $0x1a2] sm:$0xff] %vm419_vm1, %v1021_v12  ;;  %4006 = vmatmul.mubr.msk.bf16.gmra.mrb[136].mxu1 %vm743_vm3, %v4319_v11  ;;  %v1494_v11 = vld [vmem:[#allocation2 + $0x30] sm:$0xff] }
 0x209   : > { %1314 = vst.msk [vmem:[#allocation2 + $0x151] sm:$0xff] %vm419_vm1, %v1282_v16  ;;  %v1283_v20 = vadd.f32 %v1251_v19, %v1198_v45  ;;  %1051 = vst.msk [vmem:[#allocation2 + $0x18a] sm:$0xff] %vm419_vm1, %v1019_v42  ;;  %4009 = vmatprep.mubr.msk.bf16.mxu1 %vm743_vm3, %v4337_v3  ;;  %v1497_v41 = vld [vmem:[#allocation2 + $0x50] sm:$0xff]  ;;  %v1495_v37 = vld [vmem:[#allocation2 + $0x38] sm:$0xff] }
 0x20a   : > { %1317 = vst.msk [vmem:[#allocation2 + $0x171] sm:$0xff] %vm419_vm1, %v1285_v18  ;;  %v1504_v42 = vld [vmem:[#allocation2 + $0xa8] sm:$0xff] }
 0x20b   : > { %1315 = vst.msk [vmem:[#allocation2 + $0x159] sm:$0xff] %vm419_vm1, %v1283_v20  ;;  %v3795_v22 = vpop.f32.mrb[32].mxu1  ;;  %v4758_v2 = vpop.f32.mrb[64].mxu0  ;;  %v1502_v20 = vld [vmem:[#allocation2 + $0x90] sm:$0xff] }
 0x20c   : > { %v1528_v25 = vadd.f32 %v3795_v22, %v1496_v23  ;;  %v1367_v28 = vpop.f32.mrb[33].mxu1  ;;  %v1635_v29 = vpop.f32.mrb[65].mxu0  ;;  %v1505_v23 = vld [vmem:[#allocation2 + $0xb0] sm:$0xff] }
 0x20d   : > { %v1256_v31 = vld [vmem:[#allocation2 + $0x199] sm:$0xff]  ;;  %v1526_v48 = vadd.f32 %v1494_v11, %v1367_v28  ;;  %v1795_v49 = vadd.f32 %v1763_v21, %v1635_v29  ;;  %v3796_v32 = vpop.f32.mrb[34].mxu1  ;;  %v3830_v3 = vpop.f32.mrb[66].mxu0 }
 0x20e   : > { %v1288_v33 = vadd.f32 %v3789_v61, %v1256_v31  ;;  %v1254_v34 = vld [vmem:[#allocation2 + $0x181] sm:$0xff]  ;;  %1560 = vst.msk [vmem:[#allocation2 + $0x48] sm:$0xff] %vm419_vm1, %v1528_v25  ;;  %v1529_v35 = vadd.f32 %v3796_v32, %v1497_v41  ;;  %v1370_v36 = vpop.f32.mrb[35].mxu1  ;;  %v1638_v40 = vpop.f32.mrb[67].mxu0  ;;  %v1503_v11 = vld [vmem:[#allocation2 + $0x98] sm:$0xff] }
 0x20f   : > { %v1286_v43 = vadd.f32 %v1254_v34, %v1211_v59  ;;  %v1257_v60 = vld [vmem:[#allocation2 + $0x1a1] sm:$0xff]  ;;  %1558 = vst.msk [vmem:[#allocation2 + $0x30] sm:$0xff] %vm419_vm1, %v1526_v48  ;;  %1827 = vst.msk [vmem:[#allocation2 + $0x1a] sm:$0xff] %vm419_vm1, %v1795_v49  ;;  %v1527_v44 = vadd.f32 %v1495_v37, %v1370_v36  ;;  %v1796_v45 = vadd.f32 %v1764_v30, %v1638_v40  ;;  %v1508_v36 = vld [vmem:[#allocation2 + $0xd8] sm:$0xff] }
 0x210   : > { %1320 = vst.msk [vmem:[#allocation2 + $0x199] sm:$0xff] %vm419_vm1, %v1288_v33  ;;  %v1289_v46 = vadd.f32 %v3790_v7, %v1257_v60  ;;  %v1255_v47 = vld [vmem:[#allocation2 + $0x189] sm:$0xff]  ;;  %1561 = vst.msk [vmem:[#allocation2 + $0x50] sm:$0xff] %vm419_vm1, %v1529_v35  ;;  %4010 = vmatmul.mubr.msk.bf16.gmra.mrb[140].mxu1 %vm743_vm3, %v4335_v24  ;;  %v1498_v24 = vld [vmem:[#allocation2 + $0x60] sm:$0xff] }
 0x211   : > { %1318 = vst.msk [vmem:[#allocation2 + $0x181] sm:$0xff] %vm419_vm1, %v1286_v43  ;;  %v1287_v50 = vadd.f32 %v1255_v47, %v1214_v15  ;;  %1559 = vst.msk [vmem:[#allocation2 + $0x38] sm:$0xff] %vm419_vm1, %v1527_v44  ;;  %4013 = vmatprep.mubr.msk.bf16.mxu1 %vm743_vm3, %v4353_v39  ;;  %v1499_v39 = vld [vmem:[#allocation2 + $0x68] sm:$0xff]  ;;  %v1506_v43 = vld [vmem:[#allocation2 + $0xc0] sm:$0xff] }
 0x212   : > { %1828 = vst.msk [vmem:[#allocation2 + $0x22] sm:$0xff] %vm419_vm1, %v1796_v45  ;;  %1321 = vst.msk [vmem:[#allocation2 + $0x1a1] sm:$0xff] %vm419_vm1, %v1289_v46 }
 0x213   : > { %1319 = vst.msk [vmem:[#allocation2 + $0x189] sm:$0xff] %vm419_vm1, %v1287_v50  ;;  %v3799_v51 = vpop.f32.mrb[36].mxu1  ;;  %v3833_v53 = vpop.f32.mrb[68].mxu0 }
 0x214   : > { %v1532_v54 = vadd.f32 %v3799_v51, %v1500_v52  ;;  %v1383_v55 = vpop.f32.mrb[37].mxu1  ;;  %v1651_v58 = vpop.f32.mrb[69].mxu0  ;;  %v1507_v51 = vld [vmem:[#allocation2 + $0xc8] sm:$0xff] }
 0x215   : > { %v1530_v61 = vadd.f32 %v1498_v24, %v1383_v55  ;;  %v3800_v62 = vpop.f32.mrb[38].mxu1  ;;  %v3834_v0 = vpop.f32.mrb[70].mxu0 }
 0x216   : > { %1564 = vst.msk [vmem:[#allocation2 + $0x78] sm:$0xff] %vm419_vm1, %v1532_v54  ;;  %v1533_v59 = vadd.f32 %v3800_v62, %v1501_v63  ;;  %v1386_v1 = vpop.f32.mrb[39].mxu1  ;;  %v1654_v4 = vpop.f32.mrb[71].mxu0 }
 0x217   : > { %1562 = vst.msk [vmem:[#allocation2 + $0x60] sm:$0xff] %vm419_vm1, %v1530_v61  ;;  %v1767_v5 = vld [vmem:[#allocation2 + $0x4a] sm:$0xff]  ;;  %v1531_v6 = vadd.f32 %v1499_v39, %v1386_v1  ;;  %v1768_v7 = vld [vmem:[#allocation2 + $0x52] sm:$0xff] }
 0x218   : > { %v1799_v8 = vadd.f32 %v1767_v5, %v1651_v58  ;;  %1565 = vst.msk [vmem:[#allocation2 + $0x80] sm:$0xff] %vm419_vm1, %v1533_v59  ;;  %v1800_v9 = vadd.f32 %v1768_v7, %v1654_v4  ;;  %4014 = vmatmul.mubr.msk.bf16.gmra.mrb[144].mxu1 %vm743_vm3, %v4351_v38  ;;  %v1765_v12 = vld [vmem:[#allocation2 + $0x32] sm:$0xff]  ;;  %v1766_v14 = vld [vmem:[#allocation2 + $0x3a] sm:$0xff]  ;;  %v1512_v1 = vld [vmem:[#allocation2 + $0x108] sm:$0xff] }
 0x219   : > { %1563 = vst.msk [vmem:[#allocation2 + $0x68] sm:$0xff] %vm419_vm1, %v1531_v6  ;;  %4017 = vmatprep.mubr.msk.bf16.mxu1 %vm743_vm3, %v4369_v57  ;;  %v1797_v15 = vadd.f32 %v4758_v2, %v1765_v12  ;;  %v1798_v16 = vadd.f32 %v3830_v3, %v1766_v14  ;;  %v1510_v5 = vld [vmem:[#allocation2 + $0xf0] sm:$0xff] }
 0x21a   : > { %1831 = vst.msk [vmem:[#allocation2 + $0x4a] sm:$0xff] %vm419_vm1, %v1799_v8  ;;  %1832 = vst.msk [vmem:[#allocation2 + $0x52] sm:$0xff] %vm419_vm1, %v1800_v9 }
 0x21b   : > { %v3803_v17 = vpop.f32.mrb[40].mxu1  ;;  %v3837_v18 = vpop.f32.mrb[72].mxu0  ;;  %1829 = vst.msk [vmem:[#allocation2 + $0x32] sm:$0xff] %vm419_vm1, %v1797_v15  ;;  %1830 = vst.msk [vmem:[#allocation2 + $0x3a] sm:$0xff] %vm419_vm1, %v1798_v16  ;;  %v1511_v15 = vld [vmem:[#allocation2 + $0xf8] sm:$0xff] }
 0x21c   : > { %v1536_v38 = vadd.f32 %v3803_v17, %v1504_v42  ;;  %v1399_v19 = vpop.f32.mrb[41].mxu1  ;;  %v1667_v21 = vpop.f32.mrb[73].mxu0 }
 0x21d   : > { %v1534_v22 = vadd.f32 %v1502_v20, %v1399_v19  ;;  %v3804_v57 = vpop.f32.mrb[42].mxu1  ;;  %v3838_v2 = vpop.f32.mrb[74].mxu0 }
 0x21e   : > { %1568 = vst.msk [vmem:[#allocation2 + $0xa8] sm:$0xff] %vm419_vm1, %v1536_v38  ;;  %v1537_v25 = vadd.f32 %v3804_v57, %v1505_v23  ;;  %v1402_v28 = vpop.f32.mrb[43].mxu1  ;;  %v1670_v29 = vpop.f32.mrb[75].mxu0 }
 0x21f   : > { %1566 = vst.msk [vmem:[#allocation2 + $0x90] sm:$0xff] %vm419_vm1, %v1534_v22  ;;  %v1771_v30 = vld [vmem:[#allocation2 + $0x7a] sm:$0xff]  ;;  %v1535_v31 = vadd.f32 %v1503_v11, %v1402_v28  ;;  %v1772_v48 = vld [vmem:[#allocation2 + $0x82] sm:$0xff] }
 0x220   : > { %v1803_v49 = vadd.f32 %v1771_v30, %v1667_v21  ;;  %1569 = vst.msk [vmem:[#allocation2 + $0xb0] sm:$0xff] %vm419_vm1, %v1537_v25  ;;  %v1804_v32 = vadd.f32 %v1772_v48, %v1670_v29  ;;  %4018 = vmatmul.mubr.msk.bf16.gmra.mrb[148].mxu1 %vm743_vm3, %v4367_v56  ;;  %v1769_v41 = vld [vmem:[#allocation2 + $0x62] sm:$0xff]  ;;  %v1770_v3 = vld [vmem:[#allocation2 + $0x6a] sm:$0xff] }
 0x221   : > { %1567 = vst.msk [vmem:[#allocation2 + $0x98] sm:$0xff] %vm419_vm1, %v1535_v31  ;;  %4021 = vmatprep.mubr.msk.bf16.mxu1 %vm743_vm3, %v4385_v13  ;;  %v1801_v33 = vadd.f32 %v3833_v53, %v1769_v41  ;;  %v1802_v34 = vadd.f32 %v3834_v0, %v1770_v3  ;;  %v1509_v13 = vld [vmem:[#allocation2 + $0xe0] sm:$0xff]  ;;  %v1515_v3 = vld [vmem:[#allocation2 + $0x128] sm:$0xff] }
 0x222   : > { %1835 = vst.msk [vmem:[#allocation2 + $0x7a] sm:$0xff] %vm419_vm1, %v1803_v49  ;;  %1836 = vst.msk [vmem:[#allocation2 + $0x82] sm:$0xff] %vm419_vm1, %v1804_v32  ;;  %v1517_v48 = vld [vmem:[#allocation2 + $0x140] sm:$0xff] }
 0x223   : > { %v3807_v35 = vpop.f32.mrb[44].mxu1  ;;  %v3841_v37 = vpop.f32.mrb[76].mxu0  ;;  %1833 = vst.msk [vmem:[#allocation2 + $0x62] sm:$0xff] %vm419_vm1, %v1801_v33  ;;  %1834 = vst.msk [vmem:[#allocation2 + $0x6a] sm:$0xff] %vm419_vm1, %v1802_v34 }
 0x224   : > { %v1540_v56 = vadd.f32 %v3807_v35, %v1508_v36  ;;  %v1415_v40 = vpop.f32.mrb[45].mxu1  ;;  %v1683_v60 = vpop.f32.mrb[77].mxu0 }
 0x225   : > { %v1538_v44 = vadd.f32 %v1506_v43, %v1415_v40  ;;  %v3808_v45 = vpop.f32.mrb[46].mxu1  ;;  %v3842_v46 = vpop.f32.mrb[78].mxu0 }
 0x226   : > { %1572 = vst.msk [vmem:[#allocation2 + $0xd8] sm:$0xff] %vm419_vm1, %v1540_v56  ;;  %v1541_v47 = vadd.f32 %v3808_v45, %v1509_v13  ;;  %v1418_v50 = vpop.f32.mrb[47].mxu1  ;;  %v1686_v52 = vpop.f32.mrb[79].mxu0  ;;  %v1520_v13 = vld [vmem:[#allocation2 + $0x168] sm:$0xff] }
 0x227   : > { %1570 = vst.msk [vmem:[#allocation2 + $0xc0] sm:$0xff] %vm419_vm1, %v1538_v44  ;;  %v1775_v53 = vld [vmem:[#allocation2 + $0xaa] sm:$0xff]  ;;  %v1539_v54 = vadd.f32 %v1507_v51, %v1418_v50  ;;  %v1776_v55 = vld [vmem:[#allocation2 + $0xb2] sm:$0xff] }
 0x228   : > { %v1807_v24 = vadd.f32 %v1775_v53, %v1683_v60  ;;  %1573 = vst.msk [vmem:[#allocation2 + $0xe0] sm:$0xff] %vm419_vm1, %v1541_v47  ;;  %v1808_v58 = vadd.f32 %v1776_v55, %v1686_v52  ;;  %4022 = vmatmul.mubr.msk.bf16.gmra.mrb[152].mxu1 %vm743_vm3, %v4383_v10  ;;  %v1773_v61 = vld [vmem:[#allocation2 + $0x92] sm:$0xff]  ;;  %v1774_v62 = vld [vmem:[#allocation2 + $0x9a] sm:$0xff] }
 0x229   : > { %1571 = vst.msk [vmem:[#allocation2 + $0xc8] sm:$0xff] %vm419_vm1, %v1539_v54  ;;  %4025 = vmatprep.mubr.msk.bf16.mxu1 %vm743_vm3, %v4401_v27  ;;  %v1805_v63 = vadd.f32 %v3837_v18, %v1773_v61  ;;  %v1806_v0 = vadd.f32 %v3838_v2, %v1774_v62  ;;  %v1513_v27 = vld [vmem:[#allocation2 + $0x110] sm:$0xff]  ;;  %v1516_v2 = vld [vmem:[#allocation2 + $0x138] sm:$0xff] }
 0x22a   : > { %1839 = vst.msk [vmem:[#allocation2 + $0xaa] sm:$0xff] %vm419_vm1, %v1807_v24  ;;  %1840 = vst.msk [vmem:[#allocation2 + $0xb2] sm:$0xff] %vm419_vm1, %v1808_v58  ;;  %v1518_v51 = vld [vmem:[#allocation2 + $0x150] sm:$0xff]  ;;  %v1519_v62 = vld [vmem:[#allocation2 + $0x158] sm:$0xff] }
 0x22b   : > { %v3811_v59 = vpop.f32.mrb[48].mxu1  ;;  %v3845_v39 = vpop.f32.mrb[80].mxu0  ;;  %1837 = vst.msk [vmem:[#allocation2 + $0x92] sm:$0xff] %vm419_vm1, %v1805_v63  ;;  %1838 = vst.msk [vmem:[#allocation2 + $0x9a] sm:$0xff] %vm419_vm1, %v1806_v0  ;;  %v1521_v55 = vld [vmem:[#allocation2 + $0x170] sm:$0xff] }
 0x22c   : > { %v1544_v10 = vadd.f32 %v3811_v59, %v1512_v1  ;;  %v1431_v4 = vpop.f32.mrb[49].mxu1  ;;  %v1699_v6 = vpop.f32.mrb[81].mxu0 }
 0x22d   : > { %v1542_v7 = vadd.f32 %v1510_v5, %v1431_v4  ;;  %v3812_v8 = vpop.f32.mrb[50].mxu1  ;;  %v3846_v9 = vpop.f32.mrb[82].mxu0 }
 0x22e   : > { %1576 = vst.msk [vmem:[#allocation2 + $0x108] sm:$0xff] %vm419_vm1, %v1544_v10  ;;  %v1545_v12 = vadd.f32 %v3812_v8, %v1513_v27  ;;  %v1434_v14 = vpop.f32.mrb[51].mxu1  ;;  %v1702_v16 = vpop.f32.mrb[83].mxu0  ;;  %v1524_v27 = vld [vmem:[#allocation2 + $0x198] sm:$0xff] }
 0x22f   : > { %1574 = vst.msk [vmem:[#allocation2 + $0xf0] sm:$0xff] %vm419_vm1, %v1542_v7  ;;  %v1779_v17 = vld [vmem:[#allocation2 + $0xda] sm:$0xff]  ;;  %v1543_v42 = vadd.f32 %v1511_v15, %v1434_v14  ;;  %v1780_v18 = vld [vmem:[#allocation2 + $0xe2] sm:$0xff] }
 0x230   : > { %v1811_v38 = vadd.f32 %v1779_v17, %v1699_v6  ;;  %1577 = vst.msk [vmem:[#allocation2 + $0x110] sm:$0xff] %vm419_vm1, %v1545_v12  ;;  %v1812_v19 = vadd.f32 %v1780_v18, %v1702_v16  ;;  %4026 = vmatmul.mubr.msk.bf16.gmra.mrb[156].mxu1 %vm743_vm3, %v4399_v26  ;;  %v1777_v20 = vld [vmem:[#allocation2 + $0xc2] sm:$0xff]  ;;  %v1778_v21 = vld [vmem:[#allocation2 + $0xca] sm:$0xff] }
 0x231   : > { %1575 = vst.msk [vmem:[#allocation2 + $0xf8] sm:$0xff] %vm419_vm1, %v1543_v42  ;;  %v1809_v22 = vadd.f32 %v3841_v37, %v1777_v20  ;;  %v1810_v57 = vadd.f32 %v3842_v46, %v1778_v21  ;;  %v1514_v26 = vld [vmem:[#allocation2 + $0x120] sm:$0xff]  ;;  %v1523_v21 = vld [vmem:[#allocation2 + $0x188] sm:$0xff] }
 0x232   : > { %1843 = vst.msk [vmem:[#allocation2 + $0xda] sm:$0xff] %vm419_vm1, %v1811_v38  ;;  %1844 = vst.msk [vmem:[#allocation2 + $0xe2] sm:$0xff] %vm419_vm1, %v1812_v19  ;;  %v1522_v15 = vld [vmem:[#allocation2 + $0x180] sm:$0xff] }
 0x233   : > { %v3815_v23 = vpop.f32.mrb[52].mxu1  ;;  %v3849_v25 = vpop.f32.mrb[84].mxu0  ;;  %1841 = vst.msk [vmem:[#allocation2 + $0xc2] sm:$0xff] %vm419_vm1, %v1809_v22  ;;  %1842 = vst.msk [vmem:[#allocation2 + $0xca] sm:$0xff] %vm419_vm1, %v1810_v57  ;;  %v1525_v18 = vld [vmem:[#allocation2 + $0x1a0] sm:$0xff] }
 0x234   : > { %v1548_v28 = vadd.f32 %v3815_v23, %v1516_v2  ;;  %v1447_v11 = vpop.f32.mrb[53].mxu1  ;;  %v1715_v29 = vpop.f32.mrb[85].mxu0 }
 0x235   : > { %v1546_v30 = vadd.f32 %v1514_v26, %v1447_v11  ;;  %v3816_v31 = vpop.f32.mrb[54].mxu1  ;;  %v3850_v49 = vpop.f32.mrb[86].mxu0 }
 0x236   : > { %1580 = vst.msk [vmem:[#allocation2 + $0x138] sm:$0xff] %vm419_vm1, %v1548_v28  ;;  %v1549_v32 = vadd.f32 %v3816_v31, %v1517_v48  ;;  %v1450_v41 = vpop.f32.mrb[55].mxu1  ;;  %v1718_v33 = vpop.f32.mrb[87].mxu0  ;;  %v2033_v48 = vld [vmem:[#allocation2 + $0x31] sm:$0xff] }
 0x237   : > { %1578 = vst.msk [vmem:[#allocation2 + $0x120] sm:$0xff] %vm419_vm1, %v1546_v30  ;;  %v1783_v34 = vld [vmem:[#allocation2 + $0x10a] sm:$0xff]  ;;  %v1547_v35 = vadd.f32 %v1515_v3, %v1450_v41  ;;  %v1784_v36 = vld [vmem:[#allocation2 + $0x112] sm:$0xff] }
 0x238   : > { %v1815_v37 = vadd.f32 %v1783_v34, %v1715_v29  ;;  %1581 = vst.msk [vmem:[#allocation2 + $0x140] sm:$0xff] %vm419_vm1, %v1549_v32  ;;  %v1816_v56 = vadd.f32 %v1784_v36, %v1718_v33  ;;  %v1781_v40 = vld [vmem:[#allocation2 + $0xf2] sm:$0xff]  ;;  %v1782_v43 = vld [vmem:[#allocation2 + $0xfa] sm:$0xff] }
 0x239   : > { %1579 = vst.msk [vmem:[#allocation2 + $0x128] sm:$0xff] %vm419_vm1, %v1547_v35  ;;  %v1813_v60 = vadd.f32 %v3845_v39, %v1781_v40  ;;  %v1814_v44 = vadd.f32 %v3846_v9, %v1782_v43  ;;  %v2031_v3 = vld [vmem:[#allocation2 + $0x19] sm:$0xff]  ;;  %v2032_v43 = vld [vmem:[#allocation2 + $0x21] sm:$0xff] }
 0x23a   : > { %1847 = vst.msk [vmem:[#allocation2 + $0x10a] sm:$0xff] %vm419_vm1, %v1815_v37  ;;  %1848 = vst.msk [vmem:[#allocation2 + $0x112] sm:$0xff] %vm419_vm1, %v1816_v56  ;;  %v2034_v36 = vld [vmem:[#allocation2 + $0x39] sm:$0xff] }
 0x23b   : > { %v3819_v45 = vpop.f32.mrb[56].mxu1  ;;  %v3853_v46 = vpop.f32.mrb[88].mxu0  ;;  %1845 = vst.msk [vmem:[#allocation2 + $0xf2] sm:$0xff] %vm419_vm1, %v1813_v60  ;;  %1846 = vst.msk [vmem:[#allocation2 + $0xfa] sm:$0xff] %vm419_vm1, %v1814_v44 }
 0x23c   : > { %v1552_v47 = vadd.f32 %v3819_v45, %v1520_v13  ;;  %v1463_v50 = vpop.f32.mrb[57].mxu1  ;;  %v1731_v52 = vpop.f32.mrb[89].mxu0 }
 0x23d   : > { %v1550_v53 = vadd.f32 %v1518_v51, %v1463_v50  ;;  %v3820_v54 = vpop.f32.mrb[58].mxu1  ;;  %v3854_v24 = vpop.f32.mrb[90].mxu0  ;;  %v2037_v51 = vld [vmem:[#allocation2 + $0x61] sm:$0xff] }
 0x23e   : > { %1584 = vst.msk [vmem:[#allocation2 + $0x168] sm:$0xff] %vm419_vm1, %v1552_v47  ;;  %v1553_v58 = vadd.f32 %v3820_v54, %v1521_v55  ;;  %v1466_v61 = vpop.f32.mrb[59].mxu1  ;;  %v1734_v63 = vpop.f32.mrb[91].mxu0  ;;  %v2035_v55 = vld [vmem:[#allocation2 + $0x49] sm:$0xff] }
 0x23f   : > { %1582 = vst.msk [vmem:[#allocation2 + $0x150] sm:$0xff] %vm419_vm1, %v1550_v53  ;;  %v1787_v0 = vld [vmem:[#allocation2 + $0x13a] sm:$0xff]  ;;  %v1551_v59 = vadd.f32 %v1519_v62, %v1466_v61  ;;  %v1788_v1 = vld [vmem:[#allocation2 + $0x142] sm:$0xff] }
 0x240   : > { %v1819_v39 = vadd.f32 %v1787_v0, %v1731_v52  ;;  %1585 = vst.msk [vmem:[#allocation2 + $0x170] sm:$0xff] %vm419_vm1, %v1553_v58  ;;  %v1820_v10 = vadd.f32 %v1788_v1, %v1734_v63  ;;  %v1785_v4 = vld [vmem:[#allocation2 + $0x122] sm:$0xff]  ;;  %v1786_v5 = vld [vmem:[#allocation2 + $0x12a] sm:$0xff] }
 0x241   : > { %1583 = vst.msk [vmem:[#allocation2 + $0x158] sm:$0xff] %vm419_vm1, %v1551_v59  ;;  %v1817_v6 = vadd.f32 %v3849_v25, %v1785_v4  ;;  %v1818_v7 = vadd.f32 %v3850_v49, %v1786_v5  ;;  %v2038_v63 = vld [vmem:[#allocation2 + $0x69] sm:$0xff]  ;;  %v2036_v4 = vld [vmem:[#allocation2 + $0x51] sm:$0xff] }
 0x242   : > { %1851 = vst.msk [vmem:[#allocation2 + $0x13a] sm:$0xff] %vm419_vm1, %v1819_v39  ;;  %1852 = vst.msk [vmem:[#allocation2 + $0x142] sm:$0xff] %vm419_vm1, %v1820_v10 }
 0x243   : > { %v3823_v8 = vpop.f32.mrb[60].mxu1  ;;  %v3857_v9 = vpop.f32.mrb[92].mxu0  ;;  %1849 = vst.msk [vmem:[#allocation2 + $0x122] sm:$0xff] %vm419_vm1, %v1817_v6  ;;  %1850 = vst.msk [vmem:[#allocation2 + $0x12a] sm:$0xff] %vm419_vm1, %v1818_v7 }
 0x244   : > { %v1556_v12 = vadd.f32 %v3823_v8, %v1524_v27  ;;  %v1479_v14 = vpop.f32.mrb[61].mxu1  ;;  %v1747_v16 = vpop.f32.mrb[93].mxu0 }
 0x245   : > { %v1554_v17 = vadd.f32 %v1522_v15, %v1479_v14  ;;  %v3824_v42 = vpop.f32.mrb[62].mxu1  ;;  %v3858_v38 = vpop.f32.mrb[94].mxu0  ;;  %v2041_v15 = vld [vmem:[#allocation2 + $0x91] sm:$0xff] }
 0x246   : > { %1588 = vst.msk [vmem:[#allocation2 + $0x198] sm:$0xff] %vm419_vm1, %v1556_v12  ;;  %v1557_v19 = vadd.f32 %v3824_v42, %v1525_v18  ;;  %v1482_v20 = vpop.f32.mrb[63].mxu1  ;;  %v1750_v22 = vpop.f32.mrb[95].mxu0  ;;  %v2039_v18 = vld [vmem:[#allocation2 + $0x79] sm:$0xff] }
 0x247   : > { %1586 = vst.msk [vmem:[#allocation2 + $0x180] sm:$0xff] %vm419_vm1, %v1554_v17  ;;  %v1791_v57 = vld [vmem:[#allocation2 + $0x16a] sm:$0xff]  ;;  %v1555_v23 = vadd.f32 %v1523_v21, %v1482_v20  ;;  %v1792_v2 = vld [vmem:[#allocation2 + $0x172] sm:$0xff] }
 0x248   : > { %v1823_v25 = vadd.f32 %v1791_v57, %v1747_v16  ;;  %1589 = vst.msk [vmem:[#allocation2 + $0x1a0] sm:$0xff] %vm419_vm1, %v1557_v19  ;;  %v1824_v28 = vadd.f32 %v1792_v2, %v1750_v22  ;;  %v1789_v11 = vld [vmem:[#allocation2 + $0x152] sm:$0xff]  ;;  %v1790_v26 = vld [vmem:[#allocation2 + $0x15a] sm:$0xff] }
 0x249   : > { %1587 = vst.msk [vmem:[#allocation2 + $0x188] sm:$0xff] %vm419_vm1, %v1555_v23  ;;  %v1821_v29 = vadd.f32 %v3853_v46, %v1789_v11  ;;  %v1822_v30 = vadd.f32 %v3854_v24, %v1790_v26  ;;  %v2042_v22 = vld [vmem:[#allocation2 + $0x99] sm:$0xff]  ;;  %v2040_v11 = vld [vmem:[#allocation2 + $0x81] sm:$0xff] }
 0x24a   : > { %1855 = vst.msk [vmem:[#allocation2 + $0x16a] sm:$0xff] %vm419_vm1, %v1823_v25  ;;  %1856 = vst.msk [vmem:[#allocation2 + $0x172] sm:$0xff] %vm419_vm1, %v1824_v28 }
 0x24b   : > { %v3863_v31 = vpop.f32.mrb[64].mxu1  ;;  %v3897_v49 = vpop.f32.mrb[96].mxu0  ;;  %1853 = vst.msk [vmem:[#allocation2 + $0x152] sm:$0xff] %vm419_vm1, %v1821_v29  ;;  %1854 = vst.msk [vmem:[#allocation2 + $0x15a] sm:$0xff] %vm419_vm1, %v1822_v30 }
 0x24c   : > { %v2065_v32 = vadd.f32 %v3863_v31, %v2033_v48  ;;  %v1904_v41 = vpop.f32.mrb[65].mxu1  ;;  %v2172_v33 = vpop.f32.mrb[97].mxu0 }
 0x24d   : > { %v2063_v34 = vadd.f32 %v2031_v3, %v1904_v41  ;;  %v3864_v35 = vpop.f32.mrb[66].mxu1  ;;  %v3898_v37 = vpop.f32.mrb[98].mxu0  ;;  %v2045_v3 = vld [vmem:[#allocation2 + $0xc1] sm:$0xff] }
 0x24e   : > { %2097 = vst.msk [vmem:[#allocation2 + $0x31] sm:$0xff] %vm419_vm1, %v2065_v32  ;;  %v2066_v56 = vadd.f32 %v3864_v35, %v2034_v36  ;;  %v1907_v40 = vpop.f32.mrb[67].mxu1  ;;  %v2175_v60 = vpop.f32.mrb[99].mxu0  ;;  %v2043_v36 = vld [vmem:[#allocation2 + $0xa9] sm:$0xff] }
 0x24f   : > { %2095 = vst.msk [vmem:[#allocation2 + $0x19] sm:$0xff] %vm419_vm1, %v2063_v34  ;;  %v2064_v44 = vadd.f32 %v2032_v43, %v1907_v40 }
 0x250   : > { %2098 = vst.msk [vmem:[#allocation2 + $0x39] sm:$0xff] %vm419_vm1, %v2066_v56  ;;  %v1793_v45 = vld [vmem:[#allocation2 + $0x182] sm:$0xff]  ;;  %v1794_v13 = vld [vmem:[#allocation2 + $0x18a] sm:$0xff] }
 0x251   : > { %2096 = vst.msk [vmem:[#allocation2 + $0x21] sm:$0xff] %vm419_vm1, %v2064_v44  ;;  %v1825_v46 = vadd.f32 %v3857_v9, %v1793_v45  ;;  %v1826_v47 = vadd.f32 %v3858_v38, %v1794_v13 }
 0x253   : > { %v3867_v50 = vpop.f32.mrb[68].mxu1  ;;  %v3901_v52 = vpop.f32.mrb[100].mxu0  ;;  %1857 = vst.msk [vmem:[#allocation2 + $0x182] sm:$0xff] %vm419_vm1, %v1825_v46  ;;  %1858 = vst.msk [vmem:[#allocation2 + $0x18a] sm:$0xff] %vm419_vm1, %v1826_v47 }
 0x254   : > { %v2069_v53 = vadd.f32 %v3867_v50, %v2037_v51  ;;  %v1920_v54 = vpop.f32.mrb[69].mxu1  ;;  %v2188_v24 = vpop.f32.mrb[101].mxu0  ;;  %v2044_v50 = vld [vmem:[#allocation2 + $0xb1] sm:$0xff] }
 0x255   : > { %v2301_v58 = vld [vmem:[#allocation2 + $0x30] sm:$0xff]  ;;  %v2067_v61 = vadd.f32 %v2035_v55, %v1920_v54  ;;  %v3868_v62 = vpop.f32.mrb[70].mxu1  ;;  %v3902_v0 = vpop.f32.mrb[102].mxu0 }
 0x256   : > { %v2333_v59 = vadd.f32 %v3897_v49, %v2301_v58  ;;  %v2299_v1 = vld [vmem:[#allocation2 + $0x18] sm:$0xff]  ;;  %2101 = vst.msk [vmem:[#allocation2 + $0x61] sm:$0xff] %vm419_vm1, %v2069_v53  ;;  %v2070_v39 = vadd.f32 %v3868_v62, %v2038_v63  ;;  %v1923_v10 = vpop.f32.mrb[71].mxu1  ;;  %v2191_v5 = vpop.f32.mrb[103].mxu0 }
 0x257   : > { %v2331_v6 = vadd.f32 %v2299_v1, %v2172_v33  ;;  %v2302_v7 = vld [vmem:[#allocation2 + $0x38] sm:$0xff]  ;;  %2099 = vst.msk [vmem:[#allocation2 + $0x49] sm:$0xff] %vm419_vm1, %v2067_v61  ;;  %v2068_v8 = vadd.f32 %v2036_v4, %v1923_v10 }
 0x258   : > { %2365 = vst.msk [vmem:[#allocation2 + $0x30] sm:$0xff] %vm419_vm1, %v2333_v59  ;;  %v2334_v27 = vadd.f32 %v3898_v37, %v2302_v7  ;;  %v2300_v9 = vld [vmem:[#allocation2 + $0x20] sm:$0xff]  ;;  %2102 = vst.msk [vmem:[#allocation2 + $0x69] sm:$0xff] %vm419_vm1, %v2070_v39  ;;  %v2049_v62 = vld [vmem:[#allocation2 + $0xf1] sm:$0xff] }
 0x259   : > { %2363 = vst.msk [vmem:[#allocation2 + $0x18] sm:$0xff] %vm419_vm1, %v2331_v6  ;;  %v2332_v12 = vadd.f32 %v2300_v9, %v2175_v60  ;;  %2100 = vst.msk [vmem:[#allocation2 + $0x51] sm:$0xff] %vm419_vm1, %v2068_v8  ;;  %v2046_v60 = vld [vmem:[#allocation2 + $0xc9] sm:$0xff]  ;;  %v2047_v1 = vld [vmem:[#allocation2 + $0xd9] sm:$0xff] }
 0x25a   : > { %2366 = vst.msk [vmem:[#allocation2 + $0x38] sm:$0xff] %vm419_vm1, %v2334_v27  ;;  %v2050_v6 = vld [vmem:[#allocation2 + $0xf9] sm:$0xff] }
 0x25b   : > { %2364 = vst.msk [vmem:[#allocation2 + $0x20] sm:$0xff] %vm419_vm1, %v2332_v12  ;;  %v3871_v14 = vpop.f32.mrb[72].mxu1  ;;  %v3905_v16 = vpop.f32.mrb[104].mxu0 }
 0x25c   : > { %v2073_v17 = vadd.f32 %v3871_v14, %v2041_v15  ;;  %v1936_v42 = vpop.f32.mrb[73].mxu1  ;;  %v2204_v38 = vpop.f32.mrb[105].mxu0  ;;  %v2048_v14 = vld [vmem:[#allocation2 + $0xe1] sm:$0xff] }
 0x25d   : > { %v2305_v19 = vld [vmem:[#allocation2 + $0x60] sm:$0xff]  ;;  %v2071_v20 = vadd.f32 %v2039_v18, %v1936_v42  ;;  %v3872_v21 = vpop.f32.mrb[74].mxu1  ;;  %v3906_v57 = vpop.f32.mrb[106].mxu0 }
 0x25e   : > { %v2337_v23 = vadd.f32 %v3901_v52, %v2305_v19  ;;  %v2303_v2 = vld [vmem:[#allocation2 + $0x48] sm:$0xff]  ;;  %2105 = vst.msk [vmem:[#allocation2 + $0x91] sm:$0xff] %vm419_vm1, %v2073_v17  ;;  %v2074_v25 = vadd.f32 %v3872_v21, %v2042_v22  ;;  %v1939_v28 = vpop.f32.mrb[75].mxu1  ;;  %v2207_v26 = vpop.f32.mrb[107].mxu0 }
 0x25f   : > { %v2335_v29 = vadd.f32 %v2303_v2, %v2188_v24  ;;  %v2306_v30 = vld [vmem:[#allocation2 + $0x68] sm:$0xff]  ;;  %2103 = vst.msk [vmem:[#allocation2 + $0x79] sm:$0xff] %vm419_vm1, %v2071_v20  ;;  %v2072_v31 = vadd.f32 %v2040_v11, %v1939_v28 }
 0x260   : > { %2369 = vst.msk [vmem:[#allocation2 + $0x60] sm:$0xff] %vm419_vm1, %v2337_v23  ;;  %v2338_v48 = vadd.f32 %v3902_v0, %v2306_v30  ;;  %v2304_v49 = vld [vmem:[#allocation2 + $0x50] sm:$0xff]  ;;  %2106 = vst.msk [vmem:[#allocation2 + $0x99] sm:$0xff] %vm419_vm1, %v2074_v25  ;;  %v2053_v21 = vld [vmem:[#allocation2 + $0x121] sm:$0xff] }
 0x261   : > { %2367 = vst.msk [vmem:[#allocation2 + $0x48] sm:$0xff] %vm419_vm1, %v2335_v29  ;;  %v2336_v32 = vadd.f32 %v2304_v49, %v2191_v5  ;;  %2104 = vst.msk [vmem:[#allocation2 + $0x81] sm:$0xff] %vm419_vm1, %v2072_v31  ;;  %v2051_v2 = vld [vmem:[#allocation2 + $0x109] sm:$0xff] }
 0x262   : > { %2370 = vst.msk [vmem:[#allocation2 + $0x68] sm:$0xff] %vm419_vm1, %v2338_v48  ;;  %v2054_v29 = vld [vmem:[#allocation2 + $0x129] sm:$0xff] }
 0x263   : > { %2368 = vst.msk [vmem:[#allocation2 + $0x50] sm:$0xff] %vm419_vm1, %v2336_v32  ;;  %v3875_v41 = vpop.f32.mrb[76].mxu1  ;;  %v3909_v33 = vpop.f32.mrb[108].mxu0 }
 0x264   : > { %v2077_v34 = vadd.f32 %v3875_v41, %v2045_v3  ;;  %v1952_v35 = vpop.f32.mrb[77].mxu1  ;;  %v2220_v37 = vpop.f32.mrb[109].mxu0  ;;  %v2052_v41 = vld [vmem:[#allocation2 + $0x111] sm:$0xff] }
 0x265   : > { %v2309_v56 = vld [vmem:[#allocation2 + $0x90] sm:$0xff]  ;;  %v2075_v40 = vadd.f32 %v2043_v36, %v1952_v35  ;;  %v3876_v43 = vpop.f32.mrb[78].mxu1  ;;  %v3910_v44 = vpop.f32.mrb[110].mxu0 }
 0x266   : > { %v2341_v45 = vadd.f32 %v3905_v16, %v2309_v56  ;;  %v2307_v13 = vld [vmem:[#allocation2 + $0x78] sm:$0xff]  ;;  %2109 = vst.msk [vmem:[#allocation2 + $0xc1] sm:$0xff] %vm419_vm1, %v2077_v34  ;;  %v2078_v46 = vadd.f32 %v3876_v43, %v2046_v60  ;;  %v1955_v47 = vpop.f32.mrb[79].mxu1  ;;  %v2223_v51 = vpop.f32.mrb[111].mxu0 }
 0x267   : > { %v2339_v52 = vadd.f32 %v2307_v13, %v2204_v38  ;;  %v2310_v53 = vld [vmem:[#allocation2 + $0x98] sm:$0xff]  ;;  %2107 = vst.msk [vmem:[#allocation2 + $0xa9] sm:$0xff] %vm419_vm1, %v2075_v40  ;;  %v2076_v54 = vadd.f32 %v2044_v50, %v1955_v47 }
 0x268   : > { %2373 = vst.msk [vmem:[#allocation2 + $0x90] sm:$0xff] %vm419_vm1, %v2341_v45  ;;  %v2342_v55 = vadd.f32 %v3906_v57, %v2310_v53  ;;  %v2308_v24 = vld [vmem:[#allocation2 + $0x80] sm:$0xff]  ;;  %2110 = vst.msk [vmem:[#allocation2 + $0xc9] sm:$0xff] %vm419_vm1, %v2078_v46  ;;  %v2057_v43 = vld [vmem:[#allocation2 + $0x151] sm:$0xff] }
 0x269   : > { %2371 = vst.msk [vmem:[#allocation2 + $0x78] sm:$0xff] %vm419_vm1, %v2339_v52  ;;  %v2340_v58 = vadd.f32 %v2308_v24, %v2207_v26  ;;  %2108 = vst.msk [vmem:[#allocation2 + $0xb1] sm:$0xff] %vm419_vm1, %v2076_v54  ;;  %v2055_v13 = vld [vmem:[#allocation2 + $0x139] sm:$0xff] }
 0x26a   : > { %2374 = vst.msk [vmem:[#allocation2 + $0x98] sm:$0xff] %vm419_vm1, %v2342_v55  ;;  %v2058_v52 = vld [vmem:[#allocation2 + $0x159] sm:$0xff] }
 0x26b   : > { %2372 = vst.msk [vmem:[#allocation2 + $0x80] sm:$0xff] %vm419_vm1, %v2340_v58  ;;  %v3879_v61 = vpop.f32.mrb[80].mxu1  ;;  %v3913_v63 = vpop.f32.mrb[112].mxu0 }
 0x26c   : > { %v2081_v0 = vadd.f32 %v3879_v61, %v2049_v62  ;;  %v1968_v59 = vpop.f32.mrb[81].mxu1  ;;  %v2236_v39 = vpop.f32.mrb[113].mxu0  ;;  %v2056_v61 = vld [vmem:[#allocation2 + $0x141] sm:$0xff] }
 0x26d   : > { %v2313_v10 = vld [vmem:[#allocation2 + $0xc0] sm:$0xff]  ;;  %v2079_v4 = vadd.f32 %v2047_v1, %v1968_v59  ;;  %v3880_v5 = vpop.f32.mrb[82].mxu1  ;;  %v3914_v7 = vpop.f32.mrb[114].mxu0 }
 0x26e   : > { %v2345_v8 = vadd.f32 %v3909_v33, %v2313_v10  ;;  %v2311_v27 = vld [vmem:[#allocation2 + $0xa8] sm:$0xff]  ;;  %2113 = vst.msk [vmem:[#allocation2 + $0xf1] sm:$0xff] %vm419_vm1, %v2081_v0  ;;  %v2082_v9 = vadd.f32 %v3880_v5, %v2050_v6  ;;  %v1971_v12 = vpop.f32.mrb[83].mxu1  ;;  %v2239_v15 = vpop.f32.mrb[115].mxu0 }
 0x26f   : > { %v2343_v16 = vadd.f32 %v2311_v27, %v2220_v37  ;;  %v2314_v17 = vld [vmem:[#allocation2 + $0xc8] sm:$0xff]  ;;  %2111 = vst.msk [vmem:[#allocation2 + $0xd9] sm:$0xff] %vm419_vm1, %v2079_v4  ;;  %v2080_v42 = vadd.f32 %v2048_v14, %v1971_v12 }
 0x270   : > { %2377 = vst.msk [vmem:[#allocation2 + $0xc0] sm:$0xff] %vm419_vm1, %v2345_v8  ;;  %v2346_v18 = vadd.f32 %v3910_v44, %v2314_v17  ;;  %v2312_v38 = vld [vmem:[#allocation2 + $0xb0] sm:$0xff]  ;;  %2114 = vst.msk [vmem:[#allocation2 + $0xf9] sm:$0xff] %vm419_vm1, %v2082_v9  ;;  %v2061_v5 = vld [vmem:[#allocation2 + $0x181] sm:$0xff] }
 0x271   : > { %2375 = vst.msk [vmem:[#allocation2 + $0xa8] sm:$0xff] %vm419_vm1, %v2343_v16  ;;  %v2344_v19 = vadd.f32 %v2312_v38, %v2223_v51  ;;  %2112 = vst.msk [vmem:[#allocation2 + $0xe1] sm:$0xff] %vm419_vm1, %v2080_v42  ;;  %v2059_v27 = vld [vmem:[#allocation2 + $0x169] sm:$0xff] }
 0x272   : > { %2378 = vst.msk [vmem:[#allocation2 + $0xc8] sm:$0xff] %vm419_vm1, %v2346_v18  ;;  %v2062_v16 = vld [vmem:[#allocation2 + $0x189] sm:$0xff] }
 0x273   : > { %2376 = vst.msk [vmem:[#allocation2 + $0xb0] sm:$0xff] %vm419_vm1, %v2344_v19  ;;  %v3883_v20 = vpop.f32.mrb[84].mxu1  ;;  %v3917_v22 = vpop.f32.mrb[116].mxu0 }
 0x274   : > { %v2085_v57 = vadd.f32 %v3883_v20, %v2053_v21  ;;  %v1984_v23 = vpop.f32.mrb[85].mxu1  ;;  %v2252_v25 = vpop.f32.mrb[117].mxu0  ;;  %v2060_v20 = vld [vmem:[#allocation2 + $0x171] sm:$0xff] }
 0x275   : > { %v2317_v28 = vld [vmem:[#allocation2 + $0xf0] sm:$0xff]  ;;  %v2083_v11 = vadd.f32 %v2051_v2, %v1984_v23  ;;  %v3884_v26 = vpop.f32.mrb[86].mxu1  ;;  %v3918_v30 = vpop.f32.mrb[118].mxu0 }
 0x276   : > { %v2349_v31 = vadd.f32 %v3913_v63, %v2317_v28  ;;  %v2315_v48 = vld [vmem:[#allocation2 + $0xd8] sm:$0xff]  ;;  %2117 = vst.msk [vmem:[#allocation2 + $0x121] sm:$0xff] %vm419_vm1, %v2085_v57  ;;  %v2086_v49 = vadd.f32 %v3884_v26, %v2054_v29  ;;  %v1987_v32 = vpop.f32.mrb[87].mxu1  ;;  %v2255_v3 = vpop.f32.mrb[119].mxu0 }
 0x277   : > { %v2347_v33 = vadd.f32 %v2315_v48, %v2236_v39  ;;  %v2318_v34 = vld [vmem:[#allocation2 + $0xf8] sm:$0xff]  ;;  %2115 = vst.msk [vmem:[#allocation2 + $0x109] sm:$0xff] %vm419_vm1, %v2083_v11  ;;  %v2084_v35 = vadd.f32 %v2052_v41, %v1987_v32  ;;  %v2567_v11 = vld [vmem:[#allocation2 + $0x2] sm:$0xff]  ;;  %v2568_v32 = vld [vmem:[#allocation2 + $0xa] sm:$0xff] }
 0x278   : > { %2381 = vst.msk [vmem:[#allocation2 + $0xf0] sm:$0xff] %vm419_vm1, %v2349_v31  ;;  %v2350_v36 = vadd.f32 %v3914_v7, %v2318_v34  ;;  %v2316_v37 = vld [vmem:[#allocation2 + $0xe0] sm:$0xff]  ;;  %2118 = vst.msk [vmem:[#allocation2 + $0x129] sm:$0xff] %vm419_vm1, %v2086_v49 }
 0x279   : > { %2379 = vst.msk [vmem:[#allocation2 + $0xd8] sm:$0xff] %vm419_vm1, %v2347_v33  ;;  %v2348_v56 = vadd.f32 %v2316_v37, %v2239_v15  ;;  %2116 = vst.msk [vmem:[#allocation2 + $0x111] sm:$0xff] %vm419_vm1, %v2084_v35  ;;  %v2569_v29 = vld [vmem:[#allocation2 + $0x1a] sm:$0xff]  ;;  %v2570_v34 = vld [vmem:[#allocation2 + $0x22] sm:$0xff] }
 0x27a   : > { %2382 = vst.msk [vmem:[#allocation2 + $0xf8] sm:$0xff] %vm419_vm1, %v2350_v36 }
 0x27b   : > { %2380 = vst.msk [vmem:[#allocation2 + $0xe0] sm:$0xff] %vm419_vm1, %v2348_v56  ;;  %v3887_v40 = vpop.f32.mrb[88].mxu1  ;;  %v3921_v60 = vpop.f32.mrb[120].mxu0 }
 0x27c   : > { %v2089_v44 = vadd.f32 %v3887_v40, %v2057_v43  ;;  %v2000_v45 = vpop.f32.mrb[89].mxu1  ;;  %v2268_v46 = vpop.f32.mrb[121].mxu0 }
 0x27d   : > { %v2321_v47 = vld [vmem:[#allocation2 + $0x120] sm:$0xff]  ;;  %v2087_v50 = vadd.f32 %v2055_v13, %v2000_v45  ;;  %v3888_v51 = vpop.f32.mrb[90].mxu1  ;;  %v3922_v53 = vpop.f32.mrb[122].mxu0 }
 0x27e   : > { %v2353_v54 = vadd.f32 %v3917_v22, %v2321_v47  ;;  %v2319_v55 = vld [vmem:[#allocation2 + $0x108] sm:$0xff]  ;;  %2121 = vst.msk [vmem:[#allocation2 + $0x151] sm:$0xff] %vm419_vm1, %v2089_v44  ;;  %v2090_v24 = vadd.f32 %v3888_v51, %v2058_v52  ;;  %v2003_v58 = vpop.f32.mrb[91].mxu1  ;;  %v2271_v62 = vpop.f32.mrb[123].mxu0 }
 0x27f   : > { %v2351_v63 = vadd.f32 %v2319_v55, %v2252_v25  ;;  %v2322_v0 = vld [vmem:[#allocation2 + $0x128] sm:$0xff]  ;;  %2119 = vst.msk [vmem:[#allocation2 + $0x139] sm:$0xff] %vm419_vm1, %v2087_v50  ;;  %v2088_v59 = vadd.f32 %v2056_v61, %v2003_v58  ;;  %v2571_v55 = vld [vmem:[#allocation2 + $0x32] sm:$0xff] }
 0x280   : > { %2385 = vst.msk [vmem:[#allocation2 + $0x120] sm:$0xff] %vm419_vm1, %v2353_v54  ;;  %v2354_v1 = vadd.f32 %v3918_v30, %v2322_v0  ;;  %v2320_v39 = vld [vmem:[#allocation2 + $0x110] sm:$0xff]  ;;  %2122 = vst.msk [vmem:[#allocation2 + $0x159] sm:$0xff] %vm419_vm1, %v2090_v24 }
 0x281   : > { %2383 = vst.msk [vmem:[#allocation2 + $0x108] sm:$0xff] %vm419_vm1, %v2351_v63  ;;  %v2352_v10 = vadd.f32 %v2320_v39, %v2255_v3  ;;  %2120 = vst.msk [vmem:[#allocation2 + $0x141] sm:$0xff] %vm419_vm1, %v2088_v59  ;;  %v2573_v51 = vld [vmem:[#allocation2 + $0x4a] sm:$0xff]  ;;  %v2574_v63 = vld [vmem:[#allocation2 + $0x52] sm:$0xff] }
 0x282   : > { %2386 = vst.msk [vmem:[#allocation2 + $0x128] sm:$0xff] %vm419_vm1, %v2354_v1 }
 0x283   : > { %2384 = vst.msk [vmem:[#allocation2 + $0x110] sm:$0xff] %vm419_vm1, %v2352_v10  ;;  %v3891_v4 = vpop.f32.mrb[92].mxu1  ;;  %v3925_v6 = vpop.f32.mrb[124].mxu0 }
 0x284   : > { %v2093_v7 = vadd.f32 %v3891_v4, %v2061_v5  ;;  %v2016_v8 = vpop.f32.mrb[93].mxu1  ;;  %v2284_v9 = vpop.f32.mrb[125].mxu0  ;;  %v2572_v4 = vld [vmem:[#allocation2 + $0x3a] sm:$0xff] }
 0x285   : > { %v2325_v12 = vld [vmem:[#allocation2 + $0x150] sm:$0xff]  ;;  %v2091_v14 = vadd.f32 %v2059_v27, %v2016_v8  ;;  %v3892_v15 = vpop.f32.mrb[94].mxu1  ;;  %v3926_v17 = vpop.f32.mrb[126].mxu0 }
 0x286   : > { %v2357_v42 = vadd.f32 %v3921_v60, %v2325_v12  ;;  %v2323_v18 = vld [vmem:[#allocation2 + $0x138] sm:$0xff]  ;;  %2125 = vst.msk [vmem:[#allocation2 + $0x181] sm:$0xff] %vm419_vm1, %v2093_v7  ;;  %v2094_v38 = vadd.f32 %v3892_v15, %v2062_v16  ;;  %v2019_v19 = vpop.f32.mrb[95].mxu1  ;;  %v2287_v21 = vpop.f32.mrb[127].mxu0 }
 0x287   : > { %v2355_v22 = vadd.f32 %v2323_v18, %v2268_v46  ;;  %v2326_v57 = vld [vmem:[#allocation2 + $0x158] sm:$0xff]  ;;  %2123 = vst.msk [vmem:[#allocation2 + $0x169] sm:$0xff] %vm419_vm1, %v2091_v14  ;;  %v2092_v23 = vadd.f32 %v2060_v20, %v2019_v19  ;;  %v2575_v19 = vld [vmem:[#allocation2 + $0x62] sm:$0xff] }
 0x288   : > { %2389 = vst.msk [vmem:[#allocation2 + $0x150] sm:$0xff] %vm419_vm1, %v2357_v42  ;;  %v2358_v2 = vadd.f32 %v3922_v53, %v2326_v57  ;;  %v2324_v25 = vld [vmem:[#allocation2 + $0x140] sm:$0xff]  ;;  %2126 = vst.msk [vmem:[#allocation2 + $0x189] sm:$0xff] %vm419_vm1, %v2094_v38 }
 0x289   : > { %2387 = vst.msk [vmem:[#allocation2 + $0x138] sm:$0xff] %vm419_vm1, %v2355_v22  ;;  %v2356_v28 = vadd.f32 %v2324_v25, %v2271_v62  ;;  %2124 = vst.msk [vmem:[#allocation2 + $0x171] sm:$0xff] %vm419_vm1, %v2092_v23  ;;  %v2578_v23 = vld [vmem:[#allocation2 + $0x82] sm:$0xff] }
 0x28a   : > { %2390 = vst.msk [vmem:[#allocation2 + $0x158] sm:$0xff] %vm419_vm1, %v2358_v2 }
 0x28b   : > { %2388 = vst.msk [vmem:[#allocation2 + $0x140] sm:$0xff] %vm419_vm1, %v2356_v28  ;;  %v3931_v26 = vpop.f32.mrb[96].mxu1  ;;  %v3965_v30 = vpop.f32.mrb[128].mxu0 }
 0x28c   : > { %v2601_v31 = vadd.f32 %v3931_v26, %v2569_v29  ;;  %v2440_v48 = vpop.f32.mrb[97].mxu1  ;;  %v2708_v49 = vpop.f32.mrb[129].mxu0  ;;  %v2576_v29 = vld [vmem:[#allocation2 + $0x6a] sm:$0xff] }
 0x28d   : > { %v2329_v41 = vld [vmem:[#allocation2 + $0x180] sm:$0xff]  ;;  %v2599_v3 = vadd.f32 %v2567_v11, %v2440_v48  ;;  %v3932_v33 = vpop.f32.mrb[98].mxu1  ;;  %v3966_v35 = vpop.f32.mrb[130].mxu0 }
 0x28e   : > { %v2361_v36 = vadd.f32 %v3925_v6, %v2329_v41  ;;  %v2327_v37 = vld [vmem:[#allocation2 + $0x168] sm:$0xff]  ;;  %2633 = vst.msk [vmem:[#allocation2 + $0x1a] sm:$0xff] %vm419_vm1, %v2601_v31  ;;  %v2602_v56 = vadd.f32 %v3932_v33, %v2570_v34  ;;  %v2443_v40 = vpop.f32.mrb[99].mxu1  ;;  %v2711_v43 = vpop.f32.mrb[131].mxu0 }
 0x28f   : > { %v2359_v60 = vadd.f32 %v2327_v37, %v2284_v9  ;;  %v2330_v44 = vld [vmem:[#allocation2 + $0x188] sm:$0xff]  ;;  %2631 = vst.msk [vmem:[#allocation2 + $0x2] sm:$0xff] %vm419_vm1, %v2599_v3  ;;  %v2600_v45 = vadd.f32 %v2568_v32, %v2443_v40 }
 0x290   : > { %2393 = vst.msk [vmem:[#allocation2 + $0x180] sm:$0xff] %vm419_vm1, %v2361_v36  ;;  %v2362_v13 = vadd.f32 %v3926_v17, %v2330_v44  ;;  %v2328_v46 = vld [vmem:[#allocation2 + $0x170] sm:$0xff]  ;;  %2634 = vst.msk [vmem:[#allocation2 + $0x22] sm:$0xff] %vm419_vm1, %v2602_v56  ;;  %v2577_v17 = vld [vmem:[#allocation2 + $0x7a] sm:$0xff] }
 0x291   : > { %2391 = vst.msk [vmem:[#allocation2 + $0x168] sm:$0xff] %vm419_vm1, %v2359_v60  ;;  %v2360_v47 = vadd.f32 %v2328_v46, %v2287_v21  ;;  %2632 = vst.msk [vmem:[#allocation2 + $0xa] sm:$0xff] %vm419_vm1, %v2600_v45  ;;  %v2581_v34 = vld [vmem:[#allocation2 + $0xaa] sm:$0xff]  ;;  %v2579_v56 = vld [vmem:[#allocation2 + $0x92] sm:$0xff] }
 0x292   : > { %2394 = vst.msk [vmem:[#allocation2 + $0x188] sm:$0xff] %vm419_vm1, %v2362_v13  ;;  %v2582_v45 = vld [vmem:[#allocation2 + $0xb2] sm:$0xff] }
 0x293   : > { %2392 = vst.msk [vmem:[#allocation2 + $0x170] sm:$0xff] %vm419_vm1, %v2360_v47  ;;  %v3935_v50 = vpop.f32.mrb[100].mxu1  ;;  %v3969_v52 = vpop.f32.mrb[132].mxu0 }
 0x294   : > { %v2605_v53 = vadd.f32 %v3935_v50, %v2573_v51  ;;  %v2456_v54 = vpop.f32.mrb[101].mxu1  ;;  %v2724_v24 = vpop.f32.mrb[133].mxu0 }
 0x295   : > { %v2837_v58 = vld [vmem:[#allocation2 + $0x19] sm:$0xff]  ;;  %v2603_v61 = vadd.f32 %v2571_v55, %v2456_v54  ;;  %v3936_v62 = vpop.f32.mrb[102].mxu1  ;;  %v3970_v0 = vpop.f32.mrb[134].mxu0 }
 0x296   : > { %v2869_v59 = vadd.f32 %v3965_v30, %v2837_v58  ;;  %v2835_v1 = vld [vmem:[#allocation2 + $0x1] sm:$0xff]  ;;  %2637 = vst.msk [vmem:[#allocation2 + $0x4a] sm:$0xff] %vm419_vm1, %v2605_v53  ;;  %v2606_v39 = vadd.f32 %v3936_v62, %v2574_v63  ;;  %v2459_v10 = vpop.f32.mrb[103].mxu1  ;;  %v2727_v5 = vpop.f32.mrb[135].mxu0 }
 0x297   : > { %v2867_v6 = vadd.f32 %v2835_v1, %v2708_v49  ;;  %v2838_v7 = vld [vmem:[#allocation2 + $0x21] sm:$0xff]  ;;  %2635 = vst.msk [vmem:[#allocation2 + $0x32] sm:$0xff] %vm419_vm1, %v2603_v61  ;;  %v2604_v8 = vadd.f32 %v2572_v4, %v2459_v10 }
 0x298   : > { %2901 = vst.msk [vmem:[#allocation2 + $0x19] sm:$0xff] %vm419_vm1, %v2869_v59  ;;  %v2870_v27 = vadd.f32 %v3966_v35, %v2838_v7  ;;  %v2836_v9 = vld [vmem:[#allocation2 + $0x9] sm:$0xff]  ;;  %2638 = vst.msk [vmem:[#allocation2 + $0x52] sm:$0xff] %vm419_vm1, %v2606_v39 }
 0x299   : > { %v3229_v12 = vld [vmem:[#allocation2 + $0x181] sm:$0xff]  ;;  %v3230_v14 = vld [vmem:[#allocation2 + $0x189] sm:$0xff]  ;;  %2899 = vst.msk [vmem:[#allocation2 + $0x1] sm:$0xff] %vm419_vm1, %v2867_v6  ;;  %v2868_v15 = vadd.f32 %v2836_v9, %v2711_v43  ;;  %2636 = vst.msk [vmem:[#allocation2 + $0x3a] sm:$0xff] %vm419_vm1, %v2604_v8 }
 0x29a   : > { %3261 = vst.msk [vmem:[%s4921_s10 + $0xf0] sm:$0xff] %vm419_vm1, %v3229_v12  ;;  %3262 = vst.msk [vmem:[%s4921_s10 + $0xf8] sm:$0xff] %vm419_vm1, %v3230_v14  ;;  %v2583_v10 = vld [vmem:[#allocation2 + $0xc2] sm:$0xff] }
 0x29b   : > { %2902 = vst.msk [vmem:[#allocation2 + $0x21] sm:$0xff] %vm419_vm1, %v2870_v27  ;;  %2900 = vst.msk [vmem:[#allocation2 + $0x9] sm:$0xff] %vm419_vm1, %v2868_v15  ;;  %v3939_v16 = vpop.f32.mrb[104].mxu1  ;;  %v3973_v42 = vpop.f32.mrb[136].mxu0  ;;  %v2586_v8 = vld [vmem:[#allocation2 + $0xe2] sm:$0xff] }
 0x29c   : > { %v2609_v18 = vadd.f32 %v3939_v16, %v2577_v17  ;;  %v2472_v38 = vpop.f32.mrb[105].mxu1  ;;  %v2740_v20 = vpop.f32.mrb[137].mxu0  ;;  %v2584_v16 = vld [vmem:[#allocation2 + $0xca] sm:$0xff] }
 0x29d   : > { %v2841_v21 = vld [vmem:[#allocation2 + $0x49] sm:$0xff]  ;;  %v2607_v22 = vadd.f32 %v2575_v19, %v2472_v38  ;;  %v3940_v57 = vpop.f32.mrb[106].mxu1  ;;  %v3974_v2 = vpop.f32.mrb[138].mxu0 }
 0x29e   : > { %v2873_v25 = vadd.f32 %v3969_v52, %v2841_v21  ;;  %v2839_v28 = vld [vmem:[#allocation2 + $0x31] sm:$0xff]  ;;  %2641 = vst.msk [vmem:[#allocation2 + $0x7a] sm:$0xff] %vm419_vm1, %v2609_v18  ;;  %v2610_v11 = vadd.f32 %v3940_v57, %v2578_v23  ;;  %v2475_v26 = vpop.f32.mrb[107].mxu1  ;;  %v2743_v30 = vpop.f32.mrb[139].mxu0  ;;  %v2580_v52 = vld [vmem:[#allocation2 + $0x9a] sm:$0xff] }
 0x29f   : > { %v2871_v31 = vadd.f32 %v2839_v28, %v2724_v24  ;;  %v2842_v48 = vld [vmem:[#allocation2 + $0x51] sm:$0xff]  ;;  %2639 = vst.msk [vmem:[#allocation2 + $0x62] sm:$0xff] %vm419_vm1, %v2607_v22  ;;  %v2608_v49 = vadd.f32 %v2576_v29, %v2475_v26 }
 0x2a0   : > { %2905 = vst.msk [vmem:[#allocation2 + $0x49] sm:$0xff] %vm419_vm1, %v2873_v25  ;;  %v2874_v32 = vadd.f32 %v3970_v0, %v2842_v48  ;;  %v2840_v41 = vld [vmem:[#allocation2 + $0x39] sm:$0xff]  ;;  %2642 = vst.msk [vmem:[#allocation2 + $0x82] sm:$0xff] %vm419_vm1, %v2610_v11  ;;  %v2589_v57 = vld [vmem:[#allocation2 + $0x10a] sm:$0xff] }
 0x2a1   : > { %2903 = vst.msk [vmem:[#allocation2 + $0x31] sm:$0xff] %vm419_vm1, %v2871_v31  ;;  %v2872_v3 = vadd.f32 %v2840_v41, %v2727_v5  ;;  %2640 = vst.msk [vmem:[#allocation2 + $0x6a] sm:$0xff] %vm419_vm1, %v2608_v49  ;;  %v2585_v0 = vld [vmem:[#allocation2 + $0xda] sm:$0xff]  ;;  %v2587_v28 = vld [vmem:[#allocation2 + $0xf2] sm:$0xff] }
 0x2a2   : > { %2906 = vst.msk [vmem:[#allocation2 + $0x51] sm:$0xff] %vm419_vm1, %v2874_v32  ;;  %v2590_v31 = vld [vmem:[#allocation2 + $0x112] sm:$0xff] }
 0x2a3   : > { %2904 = vst.msk [vmem:[#allocation2 + $0x39] sm:$0xff] %vm419_vm1, %v2872_v3  ;;  %v3943_v33 = vpop.f32.mrb[108].mxu1  ;;  %v3977_v35 = vpop.f32.mrb[140].mxu0 }
 0x2a4   : > { %v2613_v36 = vadd.f32 %v3943_v33, %v2581_v34  ;;  %v2488_v37 = vpop.f32.mrb[109].mxu1  ;;  %v2756_v40 = vpop.f32.mrb[141].mxu0  ;;  %v2588_v33 = vld [vmem:[#allocation2 + $0xfa] sm:$0xff] }
 0x2a5   : > { %v2845_v43 = vld [vmem:[#allocation2 + $0x79] sm:$0xff]  ;;  %v2611_v60 = vadd.f32 %v2579_v56, %v2488_v37  ;;  %v3944_v44 = vpop.f32.mrb[110].mxu1  ;;  %v3978_v13 = vpop.f32.mrb[142].mxu0 }
 0x2a6   : > { %v2877_v46 = vadd.f32 %v3973_v42, %v2845_v43  ;;  %v2843_v47 = vld [vmem:[#allocation2 + $0x61] sm:$0xff]  ;;  %2645 = vst.msk [vmem:[#allocation2 + $0xaa] sm:$0xff] %vm419_vm1, %v2613_v36  ;;  %v2614_v50 = vadd.f32 %v3944_v44, %v2582_v45  ;;  %v2491_v51 = vpop.f32.mrb[111].mxu1  ;;  %v2759_v53 = vpop.f32.mrb[143].mxu0 }
 0x2a7   : > { %v2875_v54 = vadd.f32 %v2843_v47, %v2740_v20  ;;  %v2846_v55 = vld [vmem:[#allocation2 + $0x81] sm:$0xff]  ;;  %2643 = vst.msk [vmem:[#allocation2 + $0x92] sm:$0xff] %vm419_vm1, %v2611_v60  ;;  %v2612_v24 = vadd.f32 %v2580_v52, %v2491_v51 }
 0x2a8   : > { %2909 = vst.msk [vmem:[#allocation2 + $0x79] sm:$0xff] %vm419_vm1, %v2877_v46  ;;  %v2878_v58 = vadd.f32 %v3974_v2, %v2846_v55  ;;  %v2844_v61 = vld [vmem:[#allocation2 + $0x69] sm:$0xff]  ;;  %2646 = vst.msk [vmem:[#allocation2 + $0xb2] sm:$0xff] %vm419_vm1, %v2614_v50  ;;  %v2593_v44 = vld [vmem:[#allocation2 + $0x13a] sm:$0xff] }
 0x2a9   : > { %2907 = vst.msk [vmem:[#allocation2 + $0x61] sm:$0xff] %vm419_vm1, %v2875_v54  ;;  %v2876_v62 = vadd.f32 %v2844_v61, %v2743_v30  ;;  %2644 = vst.msk [vmem:[#allocation2 + $0x9a] sm:$0xff] %vm419_vm1, %v2612_v24  ;;  %v2591_v47 = vld [vmem:[#allocation2 + $0x122] sm:$0xff] }
 0x2aa   : > { %2910 = vst.msk [vmem:[#allocation2 + $0x81] sm:$0xff] %vm419_vm1, %v2878_v58  ;;  %v2594_v54 = vld [vmem:[#allocation2 + $0x142] sm:$0xff] }
 0x2ab   : > { %2908 = vst.msk [vmem:[#allocation2 + $0x69] sm:$0xff] %vm419_vm1, %v2876_v62  ;;  %v3947_v63 = vpop.f32.mrb[112].mxu1  ;;  %v3981_v59 = vpop.f32.mrb[144].mxu0 }
 0x2ac   : > { %v2617_v1 = vadd.f32 %v3947_v63, %v2585_v0  ;;  %v2504_v39 = vpop.f32.mrb[113].mxu1  ;;  %v2772_v4 = vpop.f32.mrb[145].mxu0  ;;  %v2592_v63 = vld [vmem:[#allocation2 + $0x12a] sm:$0xff] }
 0x2ad   : > { %v2849_v5 = vld [vmem:[#allocation2 + $0xa9] sm:$0xff]  ;;  %v2615_v6 = vadd.f32 %v2583_v10, %v2504_v39  ;;  %v3948_v7 = vpop.f32.mrb[114].mxu1  ;;  %v3982_v27 = vpop.f32.mrb[146].mxu0 }
 0x2ae   : > { %v2881_v9 = vadd.f32 %v3977_v35, %v2849_v5  ;;  %v2847_v12 = vld [vmem:[#allocation2 + $0x91] sm:$0xff]  ;;  %2649 = vst.msk [vmem:[#allocation2 + $0xda] sm:$0xff] %vm419_vm1, %v2617_v1  ;;  %v2618_v14 = vadd.f32 %v3948_v7, %v2586_v8  ;;  %v2507_v15 = vpop.f32.mrb[115].mxu1  ;;  %v2775_v17 = vpop.f32.mrb[147].mxu0 }
 0x2af   : > { %v2879_v42 = vadd.f32 %v2847_v12, %v2756_v40  ;;  %v2850_v18 = vld [vmem:[#allocation2 + $0xb1] sm:$0xff]  ;;  %2647 = vst.msk [vmem:[#allocation2 + $0xc2] sm:$0xff] %vm419_vm1, %v2615_v6  ;;  %v2616_v38 = vadd.f32 %v2584_v16, %v2507_v15 }
 0x2b0   : > { %2913 = vst.msk [vmem:[#allocation2 + $0xa9] sm:$0xff] %vm419_vm1, %v2881_v9  ;;  %v2882_v19 = vadd.f32 %v3978_v13, %v2850_v18  ;;  %v2848_v20 = vld [vmem:[#allocation2 + $0x99] sm:$0xff]  ;;  %2650 = vst.msk [vmem:[#allocation2 + $0xe2] sm:$0xff] %vm419_vm1, %v2618_v14  ;;  %v2597_v7 = vld [vmem:[#allocation2 + $0x16a] sm:$0xff] }
 0x2b1   : > { %2911 = vst.msk [vmem:[#allocation2 + $0x91] sm:$0xff] %vm419_vm1, %v2879_v42  ;;  %v2880_v21 = vadd.f32 %v2848_v20, %v2759_v53  ;;  %2648 = vst.msk [vmem:[#allocation2 + $0xca] sm:$0xff] %vm419_vm1, %v2616_v38  ;;  %v2595_v12 = vld [vmem:[#allocation2 + $0x152] sm:$0xff] }
 0x2b2   : > { %2914 = vst.msk [vmem:[#allocation2 + $0xb1] sm:$0xff] %vm419_vm1, %v2882_v19  ;;  %v2598_v42 = vld [vmem:[#allocation2 + $0x172] sm:$0xff] }
 0x2b3   : > { %2912 = vst.msk [vmem:[#allocation2 + $0x99] sm:$0xff] %vm419_vm1, %v2880_v21  ;;  %v3951_v22 = vpop.f32.mrb[116].mxu1  ;;  %v3985_v23 = vpop.f32.mrb[148].mxu0 }
 0x2b4   : > { %v2621_v2 = vadd.f32 %v3951_v22, %v2589_v57  ;;  %v2520_v25 = vpop.f32.mrb[117].mxu1  ;;  %v2788_v11 = vpop.f32.mrb[149].mxu0  ;;  %v2596_v22 = vld [vmem:[#allocation2 + $0x15a] sm:$0xff] }
 0x2b5   : > { %v2853_v26 = vld [vmem:[#allocation2 + $0xd9] sm:$0xff]  ;;  %v2619_v29 = vadd.f32 %v2587_v28, %v2520_v25  ;;  %v3952_v30 = vpop.f32.mrb[118].mxu1  ;;  %v3986_v48 = vpop.f32.mrb[150].mxu0 }
 0x2b6   : > { %v2885_v49 = vadd.f32 %v3981_v59, %v2853_v26  ;;  %v2851_v32 = vld [vmem:[#allocation2 + $0xc1] sm:$0xff]  ;;  %2653 = vst.msk [vmem:[#allocation2 + $0x10a] sm:$0xff] %vm419_vm1, %v2621_v2  ;;  %v2622_v41 = vadd.f32 %v3952_v30, %v2590_v31  ;;  %v2523_v3 = vpop.f32.mrb[119].mxu1  ;;  %v2791_v34 = vpop.f32.mrb[151].mxu0  ;;  %v3105_v30 = vld [vmem:[#allocation2 + $0x18] sm:$0xff] }
 0x2b7   : > { %v2883_v35 = vadd.f32 %v2851_v32, %v2772_v4  ;;  %v2854_v36 = vld [vmem:[#allocation2 + $0xe1] sm:$0xff]  ;;  %2651 = vst.msk [vmem:[#allocation2 + $0xf2] sm:$0xff] %vm419_vm1, %v2619_v29  ;;  %v2620_v37 = vadd.f32 %v2588_v33, %v2523_v3 }
 0x2b8   : > { %2917 = vst.msk [vmem:[#allocation2 + $0xd9] sm:$0xff] %vm419_vm1, %v2885_v49  ;;  %v2886_v56 = vadd.f32 %v3982_v27, %v2854_v36  ;;  %v2852_v40 = vld [vmem:[#allocation2 + $0xc9] sm:$0xff]  ;;  %2654 = vst.msk [vmem:[#allocation2 + $0x112] sm:$0xff] %vm419_vm1, %v2622_v41  ;;  %v3103_v49 = vld [vmem:[#allocation2] sm:$0xff] }
 0x2b9   : > { %2915 = vst.msk [vmem:[#allocation2 + $0xc1] sm:$0xff] %vm419_vm1, %v2883_v35  ;;  %v2884_v43 = vadd.f32 %v2852_v40, %v2775_v17  ;;  %2652 = vst.msk [vmem:[#allocation2 + $0xfa] sm:$0xff] %vm419_vm1, %v2620_v37  ;;  %v3106_v33 = vld [vmem:[#allocation2 + $0x20] sm:$0xff] }
 0x2ba   : > { %2918 = vst.msk [vmem:[#allocation2 + $0xe1] sm:$0xff] %vm419_vm1, %v2886_v56  ;;  %v3104_v56 = vld [vmem:[#allocation2 + $0x8] sm:$0xff] }
 0x2bb   : > { %2916 = vst.msk [vmem:[#allocation2 + $0xc9] sm:$0xff] %vm419_vm1, %v2884_v43  ;;  %v3955_v60 = vpop.f32.mrb[120].mxu1  ;;  %v3989_v45 = vpop.f32.mrb[152].mxu0 }
 0x2bc   : > { %v2625_v13 = vadd.f32 %v3955_v60, %v2593_v44  ;;  %v2536_v46 = vpop.f32.mrb[121].mxu1  ;;  %v2804_v50 = vpop.f32.mrb[153].mxu0 }
 0x2bd   : > { %v2857_v51 = vld [vmem:[#allocation2 + $0x109] sm:$0xff]  ;;  %v2623_v52 = vadd.f32 %v2591_v47, %v2536_v46  ;;  %v3956_v53 = vpop.f32.mrb[122].mxu1  ;;  %v3990_v55 = vpop.f32.mrb[154].mxu0 }
 0x2be   : > { %v2889_v24 = vadd.f32 %v3985_v23, %v2857_v51  ;;  %v2855_v58 = vld [vmem:[#allocation2 + $0xf1] sm:$0xff]  ;;  %2657 = vst.msk [vmem:[#allocation2 + $0x13a] sm:$0xff] %vm419_vm1, %v2625_v13  ;;  %v2626_v61 = vadd.f32 %v3956_v53, %v2594_v54  ;;  %v2539_v62 = vpop.f32.mrb[123].mxu1  ;;  %v2807_v0 = vpop.f32.mrb[155].mxu0  ;;  %v3109_v47 = vld [vmem:[#allocation2 + $0x48] sm:$0xff] }
 0x2bf   : > { %v2887_v59 = vadd.f32 %v2855_v58, %v2788_v11  ;;  %v2858_v1 = vld [vmem:[#allocation2 + $0x111] sm:$0xff]  ;;  %2655 = vst.msk [vmem:[#allocation2 + $0x122] sm:$0xff] %vm419_vm1, %v2623_v52  ;;  %v2624_v39 = vadd.f32 %v2592_v63, %v2539_v62 }
 0x2c0   : > { %2921 = vst.msk [vmem:[#allocation2 + $0x109] sm:$0xff] %vm419_vm1, %v2889_v24  ;;  %v2890_v10 = vadd.f32 %v3986_v48, %v2858_v1  ;;  %v2856_v4 = vld [vmem:[#allocation2 + $0xf9] sm:$0xff]  ;;  %2658 = vst.msk [vmem:[#allocation2 + $0x142] sm:$0xff] %vm419_vm1, %v2626_v61  ;;  %v3107_v52 = vld [vmem:[#allocation2 + $0x30] sm:$0xff] }
 0x2c1   : > { %2919 = vst.msk [vmem:[#allocation2 + $0xf1] sm:$0xff] %vm419_vm1, %v2887_v59  ;;  %v2888_v5 = vadd.f32 %v2856_v4, %v2791_v34  ;;  %2656 = vst.msk [vmem:[#allocation2 + $0x12a] sm:$0xff] %vm419_vm1, %v2624_v39  ;;  %v3108_v61 = vld [vmem:[#allocation2 + $0x38] sm:$0xff]  ;;  %v3111_v4 = vld [vmem:[#allocation2 + $0x60] sm:$0xff] }
 0x2c2   : > { %2922 = vst.msk [vmem:[#allocation2 + $0x111] sm:$0xff] %vm419_vm1, %v2890_v10  ;;  %v3113_v1 = vld [vmem:[#allocation2 + $0x78] sm:$0xff] }
 0x2c3   : > { %2920 = vst.msk [vmem:[#allocation2 + $0xf9] sm:$0xff] %vm419_vm1, %v2888_v5  ;;  %v3959_v6 = vpop.f32.mrb[124].mxu1  ;;  %v3993_v8 = vpop.f32.mrb[156].mxu0 }
 0x2c4   : > { %v2629_v27 = vadd.f32 %v3959_v6, %v2597_v7  ;;  %v2552_v9 = vpop.f32.mrb[125].mxu1  ;;  %v2820_v14 = vpop.f32.mrb[157].mxu0  ;;  %v3114_v7 = vld [vmem:[#allocation2 + $0x80] sm:$0xff] }
 0x2c5   : > { %v2861_v15 = vld [vmem:[#allocation2 + $0x139] sm:$0xff]  ;;  %v2627_v16 = vadd.f32 %v2595_v12, %v2552_v9  ;;  %v3960_v17 = vpop.f32.mrb[126].mxu1  ;;  %v3994_v18 = vpop.f32.mrb[158].mxu0  ;;  %v3112_v9 = vld [vmem:[#allocation2 + $0x68] sm:$0xff] }
 0x2c6   : > { %v2893_v38 = vadd.f32 %v3989_v45, %v2861_v15  ;;  %v2859_v19 = vld [vmem:[#allocation2 + $0x121] sm:$0xff]  ;;  %2661 = vst.msk [vmem:[#allocation2 + $0x16a] sm:$0xff] %vm419_vm1, %v2629_v27  ;;  %v2630_v20 = vadd.f32 %v3960_v17, %v2598_v42  ;;  %v2555_v21 = vpop.f32.mrb[127].mxu1  ;;  %v2823_v57 = vpop.f32.mrb[159].mxu0 }
 0x2c7   : > { %v2891_v23 = vadd.f32 %v2859_v19, %v2804_v50  ;;  %v2862_v2 = vld [vmem:[#allocation2 + $0x141] sm:$0xff]  ;;  %2659 = vst.msk [vmem:[#allocation2 + $0x152] sm:$0xff] %vm419_vm1, %v2627_v16  ;;  %v2628_v25 = vadd.f32 %v2596_v22, %v2555_v21 }
 0x2c8   : > { %2925 = vst.msk [vmem:[#allocation2 + $0x139] sm:$0xff] %vm419_vm1, %v2893_v38  ;;  %v2894_v28 = vadd.f32 %v3990_v55, %v2862_v2  ;;  %v2860_v11 = vld [vmem:[#allocation2 + $0x129] sm:$0xff]  ;;  %2662 = vst.msk [vmem:[#allocation2 + $0x172] sm:$0xff] %vm419_vm1, %v2630_v20 }
 0x2c9   : > { %2923 = vst.msk [vmem:[#allocation2 + $0x121] sm:$0xff] %vm419_vm1, %v2891_v23  ;;  %v2892_v26 = vadd.f32 %v2860_v11, %v2807_v0  ;;  %2660 = vst.msk [vmem:[#allocation2 + $0x15a] sm:$0xff] %vm419_vm1, %v2628_v25  ;;  %v3110_v55 = vld [vmem:[#allocation2 + $0x50] sm:$0xff]  ;;  %v3116_v25 = vld [vmem:[#allocation2 + $0x98] sm:$0xff] }
 0x2ca   : > { %2926 = vst.msk [vmem:[#allocation2 + $0x141] sm:$0xff] %vm419_vm1, %v2894_v28  ;;  %v3115_v20 = vld [vmem:[#allocation2 + $0x90] sm:$0xff] }
 0x2cb   : > { %2924 = vst.msk [vmem:[#allocation2 + $0x129] sm:$0xff] %vm419_vm1, %v2892_v26  ;;  %v3999_v29 = vpop.f32.mrb[128].mxu1 }
 0x2cc   : > { %v3137_v31 = vadd.f32 %v3999_v29, %v3105_v30  ;;  %v2976_v48 = vpop.f32.mrb[129].mxu1 }
 0x2cd   : > { %v2865_v32 = vld [vmem:[#allocation2 + $0x169] sm:$0xff]  ;;  %v3135_v41 = vadd.f32 %v3103_v49, %v2976_v48  ;;  %v4000_v3 = vpop.f32.mrb[130].mxu1  ;;  %v3121_v48 = vld [vmem:[#allocation2 + $0xd8] sm:$0xff] }
 0x2ce   : > { %v2897_v34 = vadd.f32 %v3993_v8, %v2865_v32  ;;  %v2863_v35 = vld [vmem:[#allocation2 + $0x151] sm:$0xff]  ;;  %3169 = vst.msk [vmem:[#allocation2 + $0x18] sm:$0xff] %vm419_vm1, %v3137_v31  ;;  %v3138_v36 = vadd.f32 %v4000_v3, %v3106_v33  ;;  %v2979_v37 = vpop.f32.mrb[131].mxu1 }
 0x2cf   : > { %v2895_v40 = vadd.f32 %v2863_v35, %v2820_v14  ;;  %v2866_v43 = vld [vmem:[#allocation2 + $0x171] sm:$0xff]  ;;  %3167 = vst.msk [vmem:[#allocation2] sm:$0xff] %vm419_vm1, %v3135_v41  ;;  %v3136_v60 = vadd.f32 %v3104_v56, %v2979_v37  ;;  %v3119_v41 = vld [vmem:[#allocation2 + $0xc0] sm:$0xff]  ;;  %v3120_v37 = vld [vmem:[#allocation2 + $0xc8] sm:$0xff] }
 0x2d0   : > { %2929 = vst.msk [vmem:[#allocation2 + $0x169] sm:$0xff] %vm419_vm1, %v2897_v34  ;;  %v2898_v44 = vadd.f32 %v3994_v18, %v2866_v43  ;;  %v2864_v45 = vld [vmem:[#allocation2 + $0x159] sm:$0xff]  ;;  %3170 = vst.msk [vmem:[#allocation2 + $0x20] sm:$0xff] %vm419_vm1, %v3138_v36  ;;  %v3117_v18 = vld [vmem:[#allocation2 + $0xa8] sm:$0xff] }
 0x2d1   : > { %2927 = vst.msk [vmem:[#allocation2 + $0x151] sm:$0xff] %vm419_vm1, %v2895_v40  ;;  %v2896_v13 = vadd.f32 %v2864_v45, %v2823_v57  ;;  %3168 = vst.msk [vmem:[#allocation2 + $0x8] sm:$0xff] %vm419_vm1, %v3136_v60  ;;  %v3118_v57 = vld [vmem:[#allocation2 + $0xb0] sm:$0xff]  ;;  %v3122_v34 = vld [vmem:[#allocation2 + $0xe0] sm:$0xff] }
 0x2d2   : > { %2930 = vst.msk [vmem:[#allocation2 + $0x171] sm:$0xff] %vm419_vm1, %v2898_v44 }
 0x2d3   : > { %2928 = vst.msk [vmem:[#allocation2 + $0x159] sm:$0xff] %vm419_vm1, %v2896_v13  ;;  %v4003_v46 = vpop.f32.mrb[132].mxu1  ;;  %v3125_v13 = vld [vmem:[#allocation2 + $0x108] sm:$0xff] }
 0x2d4   : > { %v3141_v50 = vadd.f32 %v4003_v46, %v3109_v47  ;;  %v2992_v51 = vpop.f32.mrb[133].mxu1 }
 0x2d5   : > { %v3139_v53 = vadd.f32 %v3107_v52, %v2992_v51  ;;  %v4004_v54 = vpop.f32.mrb[134].mxu1 }
 0x2d6   : > { %3173 = vst.msk [vmem:[#allocation2 + $0x48] sm:$0xff] %vm419_vm1, %v3141_v50  ;;  %v3142_v24 = vadd.f32 %v4004_v54, %v3110_v55  ;;  %v2995_v58 = vpop.f32.mrb[135].mxu1  ;;  %v3123_v50 = vld [vmem:[#allocation2 + $0xf0] sm:$0xff] }
 0x2d7   : > { %v3199_v62 = vld [vmem:[#allocation2 + $0x19] sm:$0xff]  ;;  %v3200_v63 = vld [vmem:[#allocation2 + $0x21] sm:$0xff]  ;;  %3171 = vst.msk [vmem:[#allocation2 + $0x30] sm:$0xff] %vm419_vm1, %v3139_v53  ;;  %v3140_v0 = vadd.f32 %v3108_v61, %v2995_v58  ;;  %v3126_v53 = vld [vmem:[#allocation2 + $0x110] sm:$0xff] }
 0x2d8   : > { %3231 = vst.msk [vmem:[%s4921_s10] sm:$0xff] %vm419_vm1, %v3199_v62  ;;  %3232 = vst.msk [vmem:[%s4921_s10 + $0x8] sm:$0xff] %vm419_vm1, %v3200_v63 }
 0x2d9   : > { %3174 = vst.msk [vmem:[#allocation2 + $0x50] sm:$0xff] %vm419_vm1, %v3142_v24  ;;  %3172 = vst.msk [vmem:[#allocation2 + $0x38] sm:$0xff] %vm419_vm1, %v3140_v0  ;;  %v3124_v24 = vld [vmem:[#allocation2 + $0xf8] sm:$0xff] }
 0x2db   : > { %v4007_v59 = vpop.f32.mrb[136].mxu1 }
 0x2dc   : > { %v3145_v39 = vadd.f32 %v4007_v59, %v3113_v1  ;;  %v3008_v10 = vpop.f32.mrb[137].mxu1  ;;  %v3129_v1 = vld [vmem:[#allocation2 + $0x138] sm:$0xff] }
 0x2dd   : > { %v3143_v5 = vadd.f32 %v3111_v4, %v3008_v10  ;;  %v4008_v6 = vpop.f32.mrb[138].mxu1  ;;  %v3127_v4 = vld [vmem:[#allocation2 + $0x120] sm:$0xff] }
 0x2de   : > { %3177 = vst.msk [vmem:[#allocation2 + $0x78] sm:$0xff] %vm419_vm1, %v3145_v39  ;;  %v3146_v8 = vadd.f32 %v4008_v6, %v3114_v7  ;;  %v3011_v27 = vpop.f32.mrb[139].mxu1  ;;  %v3130_v7 = vld [vmem:[#allocation2 + $0x140] sm:$0xff] }
 0x2df   : > { %3175 = vst.msk [vmem:[#allocation2 + $0x60] sm:$0xff] %vm419_vm1, %v3143_v5  ;;  %v3144_v15 = vadd.f32 %v3112_v9, %v3011_v27  ;;  %v3128_v9 = vld [vmem:[#allocation2 + $0x128] sm:$0xff] }
 0x2e0   : > { %v3203_v12 = vld [vmem:[#allocation2 + $0x49] sm:$0xff]  ;;  %v3204_v14 = vld [vmem:[#allocation2 + $0x51] sm:$0xff]  ;;  %v3202_v17 = vld [vmem:[#allocation2 + $0x39] sm:$0xff]  ;;  %3178 = vst.msk [vmem:[#allocation2 + $0x80] sm:$0xff] %vm419_vm1, %v3146_v8 }
 0x2e1   : > { %3235 = vst.msk [vmem:[%s4921_s10 + $0x20] sm:$0xff] %vm419_vm1, %v3203_v12  ;;  %3236 = vst.msk [vmem:[%s4921_s10 + $0x28] sm:$0xff] %vm419_vm1, %v3204_v14  ;;  %v3201_v16 = vld [vmem:[#allocation2 + $0x31] sm:$0xff] }
 0x2e2   : > { %3233 = vst.msk [vmem:[%s4921_s10 + $0x10] sm:$0xff] %vm419_vm1, %v3201_v16  ;;  %3234 = vst.msk [vmem:[%s4921_s10 + $0x18] sm:$0xff] %vm419_vm1, %v3202_v17 }
 0x2e3   : > { %3176 = vst.msk [vmem:[#allocation2 + $0x68] sm:$0xff] %vm419_vm1, %v3144_v15  ;;  %v4011_v42 = vpop.f32.mrb[140].mxu1 }
 0x2e4   : > { %v3149_v38 = vadd.f32 %v4011_v42, %v3117_v18  ;;  %v3024_v19 = vpop.f32.mrb[141].mxu1  ;;  %v3133_v18 = vld [vmem:[#allocation2 + $0x168] sm:$0xff] }
 0x2e5   : > { %v3147_v21 = vadd.f32 %v3115_v20, %v3024_v19  ;;  %v4012_v22 = vpop.f32.mrb[142].mxu1  ;;  %v3131_v20 = vld [vmem:[#allocation2 + $0x150] sm:$0xff] }
 0x2e6   : > { %3181 = vst.msk [vmem:[#allocation2 + $0xa8] sm:$0xff] %vm419_vm1, %v3149_v38  ;;  %v3150_v23 = vadd.f32 %v4012_v22, %v3118_v57  ;;  %v3027_v2 = vpop.f32.mrb[143].mxu1  ;;  %v3134_v57 = vld [vmem:[#allocation2 + $0x170] sm:$0xff] }
 0x2e7   : > { %v3207_v28 = vld [vmem:[#allocation2 + $0x79] sm:$0xff]  ;;  %v3208_v11 = vld [vmem:[#allocation2 + $0x81] sm:$0xff]  ;;  %3179 = vst.msk [vmem:[#allocation2 + $0x90] sm:$0xff] %vm419_vm1, %v3147_v21  ;;  %v3148_v26 = vadd.f32 %v3116_v25, %v3027_v2 }
 0x2e8   : > { %3239 = vst.msk [vmem:[%s4921_s10 + $0x40] sm:$0xff] %vm419_vm1, %v3207_v28  ;;  %3240 = vst.msk [vmem:[%s4921_s10 + $0x48] sm:$0xff] %vm419_vm1, %v3208_v11  ;;  %v3132_v25 = vld [vmem:[#allocation2 + $0x158] sm:$0xff] }
 0x2e9   : > { %3182 = vst.msk [vmem:[#allocation2 + $0xb0] sm:$0xff] %vm419_vm1, %v3150_v23  ;;  %3180 = vst.msk [vmem:[#allocation2 + $0x98] sm:$0xff] %vm419_vm1, %v3148_v26 }
 0x2ea   : > { %v3205_v29 = vld [vmem:[#allocation2 + $0x61] sm:$0xff]  ;;  %v3206_v30 = vld [vmem:[#allocation2 + $0x69] sm:$0xff] }
 0x2eb   : > { %3237 = vst.msk [vmem:[%s4921_s10 + $0x30] sm:$0xff] %vm419_vm1, %v3205_v29  ;;  %3238 = vst.msk [vmem:[%s4921_s10 + $0x38] sm:$0xff] %vm419_vm1, %v3206_v30  ;;  %v4015_v31 = vpop.f32.mrb[144].mxu1 }
 0x2ec   : > { %v3153_v49 = vadd.f32 %v4015_v31, %v3121_v48  ;;  %v3040_v32 = vpop.f32.mrb[145].mxu1 }
 0x2ed   : > { %v3151_v3 = vadd.f32 %v3119_v41, %v3040_v32  ;;  %v4016_v33 = vpop.f32.mrb[146].mxu1 }
 0x2ee   : > { %3185 = vst.msk [vmem:[#allocation2 + $0xd8] sm:$0xff] %vm419_vm1, %v3153_v49  ;;  %v3154_v35 = vadd.f32 %v4016_v33, %v3122_v34  ;;  %v3043_v36 = vpop.f32.mrb[147].mxu1 }
 0x2ef   : > { %3183 = vst.msk [vmem:[#allocation2 + $0xc0] sm:$0xff] %vm419_vm1, %v3151_v3  ;;  %v3152_v43 = vadd.f32 %v3120_v37, %v3043_v36 }
 0x2f0   : > { %v3211_v56 = vld [vmem:[#allocation2 + $0xa9] sm:$0xff]  ;;  %v3212_v40 = vld [vmem:[#allocation2 + $0xb1] sm:$0xff]  ;;  %v3210_v44 = vld [vmem:[#allocation2 + $0x99] sm:$0xff]  ;;  %3186 = vst.msk [vmem:[#allocation2 + $0xe0] sm:$0xff] %vm419_vm1, %v3154_v35 }
 0x2f1   : > { %3243 = vst.msk [vmem:[%s4921_s10 + $0x60] sm:$0xff] %vm419_vm1, %v3211_v56  ;;  %3244 = vst.msk [vmem:[%s4921_s10 + $0x68] sm:$0xff] %vm419_vm1, %v3212_v40  ;;  %v3209_v60 = vld [vmem:[#allocation2 + $0x91] sm:$0xff] }
 0x2f2   : > { %3241 = vst.msk [vmem:[%s4921_s10 + $0x50] sm:$0xff] %vm419_vm1, %v3209_v60  ;;  %3242 = vst.msk [vmem:[%s4921_s10 + $0x58] sm:$0xff] %vm419_vm1, %v3210_v44 }
 0x2f3   : > { %3184 = vst.msk [vmem:[#allocation2 + $0xc8] sm:$0xff] %vm419_vm1, %v3152_v43  ;;  %v4019_v45 = vpop.f32.mrb[148].mxu1 }
 0x2f4   : > { %v3157_v46 = vadd.f32 %v4019_v45, %v3125_v13  ;;  %v3056_v47 = vpop.f32.mrb[149].mxu1 }
 0x2f5   : > { %v3155_v51 = vadd.f32 %v3123_v50, %v3056_v47  ;;  %v4020_v52 = vpop.f32.mrb[150].mxu1 }
 0x2f6   : > { %3189 = vst.msk [vmem:[#allocation2 + $0x108] sm:$0xff] %vm419_vm1, %v3157_v46  ;;  %v3158_v54 = vadd.f32 %v4020_v52, %v3126_v53  ;;  %v3059_v55 = vpop.f32.mrb[151].mxu1 }
 0x2f7   : > { %v3215_v58 = vld [vmem:[#allocation2 + $0xd9] sm:$0xff]  ;;  %v3216_v61 = vld [vmem:[#allocation2 + $0xe1] sm:$0xff]  ;;  %3187 = vst.msk [vmem:[#allocation2 + $0xf0] sm:$0xff] %vm419_vm1, %v3155_v51  ;;  %v3156_v62 = vadd.f32 %v3124_v24, %v3059_v55 }
 0x2f8   : > { %3247 = vst.msk [vmem:[%s4921_s10 + $0x80] sm:$0xff] %vm419_vm1, %v3215_v58  ;;  %3248 = vst.msk [vmem:[%s4921_s10 + $0x88] sm:$0xff] %vm419_vm1, %v3216_v61 }
 0x2f9   : > { %3190 = vst.msk [vmem:[#allocation2 + $0x110] sm:$0xff] %vm419_vm1, %v3158_v54  ;;  %3188 = vst.msk [vmem:[#allocation2 + $0xf8] sm:$0xff] %vm419_vm1, %v3156_v62 }
 0x2fa   : > { %v3213_v63 = vld [vmem:[#allocation2 + $0xc1] sm:$0xff]  ;;  %v3214_v0 = vld [vmem:[#allocation2 + $0xc9] sm:$0xff] }
 0x2fb   : > { %3245 = vst.msk [vmem:[%s4921_s10 + $0x70] sm:$0xff] %vm419_vm1, %v3213_v63  ;;  %3246 = vst.msk [vmem:[%s4921_s10 + $0x78] sm:$0xff] %vm419_vm1, %v3214_v0  ;;  %v4023_v59 = vpop.f32.mrb[152].mxu1 }
 0x2fc   : > { %v3161_v39 = vadd.f32 %v4023_v59, %v3129_v1  ;;  %v3072_v10 = vpop.f32.mrb[153].mxu1 }
 0x2fd   : > { %v3159_v5 = vadd.f32 %v3127_v4, %v3072_v10  ;;  %v4024_v6 = vpop.f32.mrb[154].mxu1 }
 0x2fe   : > { %3193 = vst.msk [vmem:[#allocation2 + $0x138] sm:$0xff] %vm419_vm1, %v3161_v39  ;;  %v3162_v8 = vadd.f32 %v4024_v6, %v3130_v7  ;;  %v3075_v27 = vpop.f32.mrb[155].mxu1 }
 0x2ff   : > { %3191 = vst.msk [vmem:[#allocation2 + $0x120] sm:$0xff] %vm419_vm1, %v3159_v5  ;;  %v3160_v15 = vadd.f32 %v3128_v9, %v3075_v27 }
 0x300   : > { %v3219_v12 = vld [vmem:[#allocation2 + $0x109] sm:$0xff]  ;;  %v3220_v14 = vld [vmem:[#allocation2 + $0x111] sm:$0xff]  ;;  %v3218_v17 = vld [vmem:[#allocation2 + $0xf9] sm:$0xff]  ;;  %3194 = vst.msk [vmem:[#allocation2 + $0x140] sm:$0xff] %vm419_vm1, %v3162_v8 }
 0x301   : > { %3251 = vst.msk [vmem:[%s4921_s10 + $0xa0] sm:$0xff] %vm419_vm1, %v3219_v12  ;;  %3252 = vst.msk [vmem:[%s4921_s10 + $0xa8] sm:$0xff] %vm419_vm1, %v3220_v14  ;;  %v3217_v16 = vld [vmem:[#allocation2 + $0xf1] sm:$0xff] }
 0x302   : > { %3249 = vst.msk [vmem:[%s4921_s10 + $0x90] sm:$0xff] %vm419_vm1, %v3217_v16  ;;  %3250 = vst.msk [vmem:[%s4921_s10 + $0x98] sm:$0xff] %vm419_vm1, %v3218_v17 }
 0x303   : > { %3192 = vst.msk [vmem:[#allocation2 + $0x128] sm:$0xff] %vm419_vm1, %v3160_v15  ;;  %v4027_v42 = vpop.f32.mrb[156].mxu1 }
 0x304   : > { %v3165_v38 = vadd.f32 %v4027_v42, %v3133_v18  ;;  %v3088_v19 = vpop.f32.mrb[157].mxu1 }
 0x305   : > { %v3163_v21 = vadd.f32 %v3131_v20, %v3088_v19  ;;  %v4028_v22 = vpop.f32.mrb[158].mxu1 }
 0x306   : > { %3197 = vst.msk [vmem:[#allocation2 + $0x168] sm:$0xff] %vm419_vm1, %v3165_v38  ;;  %v3166_v23 = vadd.f32 %v4028_v22, %v3134_v57  ;;  %v3091_v2 = vpop.f32.mrb[159].mxu1 }
 0x307   : > { %v3223_v28 = vld [vmem:[#allocation2 + $0x139] sm:$0xff]  ;;  %v3224_v11 = vld [vmem:[#allocation2 + $0x141] sm:$0xff]  ;;  %3195 = vst.msk [vmem:[#allocation2 + $0x150] sm:$0xff] %vm419_vm1, %v3163_v21  ;;  %v3164_v26 = vadd.f32 %v3132_v25, %v3091_v2 }
 0x308   : > { %3255 = vst.msk [vmem:[%s4921_s10 + $0xc0] sm:$0xff] %vm419_vm1, %v3223_v28  ;;  %3256 = vst.msk [vmem:[%s4921_s10 + $0xc8] sm:$0xff] %vm419_vm1, %v3224_v11 }
 0x309   : > { %3198 = vst.msk [vmem:[#allocation2 + $0x170] sm:$0xff] %vm419_vm1, %v3166_v23  ;;  %3196 = vst.msk [vmem:[#allocation2 + $0x158] sm:$0xff] %vm419_vm1, %v3164_v26 }
 0x30a   : > { %v3221_v29 = vld [vmem:[#allocation2 + $0x121] sm:$0xff]  ;;  %v3222_v30 = vld [vmem:[#allocation2 + $0x129] sm:$0xff] }
 0x30b   : > { %3253 = vst.msk [vmem:[%s4921_s10 + $0xb0] sm:$0xff] %vm419_vm1, %v3221_v29  ;;  %3254 = vst.msk [vmem:[%s4921_s10 + $0xb8] sm:$0xff] %vm419_vm1, %v3222_v30 }
 0x310   : > { %v3227_v31 = vld [vmem:[#allocation2 + $0x169] sm:$0xff]  ;;  %v3228_v48 = vld [vmem:[#allocation2 + $0x171] sm:$0xff]  ;;  %v3226_v32 = vld [vmem:[#allocation2 + $0x159] sm:$0xff] }
 0x311   : > { %3259 = vst.msk [vmem:[%s4921_s10 + $0xe0] sm:$0xff] %vm419_vm1, %v3227_v31  ;;  %3260 = vst.msk [vmem:[%s4921_s10 + $0xe8] sm:$0xff] %vm419_vm1, %v3228_v48  ;;  %v3225_v49 = vld [vmem:[#allocation2 + $0x151] sm:$0xff] }
 0x312   : > { %3257 = vst.msk [vmem:[%s4921_s10 + $0xd0] sm:$0xff] %vm419_vm1, %v3225_v49  ;;  %3258 = vst.msk [vmem:[%s4921_s10 + $0xd8] sm:$0xff] %vm419_vm1, %v3226_v32 }
 0x313 PF: > { %s16_s21 = sadd.s32 1, %s4063_s21  }
 0x314   : > { %p13_p4 = scmp.ge.s32.totalorder %s16_s21, 4  }
 0x316   :  { %15 = sbr.rel (!%p13_p4) target bundleno = 1 (0x1), region = 84 }

</bundles_post_ra>
